<compile_context>
chip_gen: v7x
topology: tpu7x:2x2x1
jax: 0.10.0
libtpu: 0.0.40
codegen_flags: <defaults>
</compile_context>

<pallas_src>
import functools

import jax
import jax.numpy as jnp
from jax.experimental import pallas as pl
from jax.experimental.pallas import tpu as pltpu

BN_EPS = 1e-5                        # nn.BatchNorm2d default eps
_VMEM_LIMIT = 48 * 1024 * 1024       # explicit scoped-VMEM limit (< v7x's 64 MiB physical)


def _round_up(x, m):
    return (x + m - 1) // m * m


# ---------------------------------------------------------------------------
# Conv pass kernels: [BN+ReLU ->] conv3x3 -> (y bf16, partial BN stats f32)
# ---------------------------------------------------------------------------
def _conv_tile_body(body_ref, top_ref, bot_ref, scale_ref, shift_ref, w_ref,
                    y_ref, s_ref, ss_ref, win_ref, col_ref,
                    *, th, wid, cin, cout, cpad):
    t = pl.program_id(1)
    n_ht = pl.num_programs(1)

    x_body = body_ref[0].astype(jnp.float32)           # (th, wid, cin)
    x_top = top_ref[0].astype(jnp.float32)              # (1, wid, cin)  row above tile
    x_bot = bot_ref[0].astype(jnp.float32)              # (1, wid, cin)  row below tile

    if scale_ref is not None:                            # fused BN1 + ReLU (pass 2 only)
        sc = scale_ref[...].reshape(1, 1, cin)
        sh = shift_ref[...].reshape(1, 1, cin)
        x_body = jnp.maximum(x_body * sc + sh, 0.0)
        x_top = jnp.maximum(x_top * sc + sh, 0.0)
        x_bot = jnp.maximum(x_bot * sc + sh, 0.0)

    # Halo rows that fall outside the image are the conv's zero padding.
    x_top = x_top * (t > 0).astype(jnp.float32)
    x_bot = x_bot * (t < n_ht - 1).astype(jnp.float32)

    # Zero-padded (th+2, wid+2, cin) window in VMEM scratch.  The zero fill provides the
    # left/right padding columns; the three stores fill halo rows + interior.
    win_ref[...] = jnp.zeros((th + 2, wid + 2, cin), jnp.float32)
    win_ref[0:1, 1:wid + 1, :] = x_top
    win_ref[th + 1:th + 2, 1:wid + 1, :] = x_bot
    win_ref[1:th + 1, 1:wid + 1, :] = x_body

    # im2col: (th*wid, 9*cpad) built once per step -> single K = 9*Cin MXU contraction.
    if cpad != cin:
        # Padded K columns must be finite (their weight rows are zero).
        col_ref[...] = jnp.zeros((th * wid, 9 * cpad), jnp.float32)
    for dy in range(3):
        for dx in range(3):
            k = dy * 3 + dx
            patch = win_ref[dy:dy + th, dx:dx + wid, :].reshape(th * wid, cin)
            col_ref[:, k * cpad:k * cpad + cin] = patch
    # TODO(synk): col_ref could be bf16 directly to halve this scratch at large C.

    acc = jnp.dot(col_ref[...].astype(jnp.bfloat16), w_ref[...],
                  preferred_element_type=jnp.float32)    # (th*wid, cout) f32 accumulation

    y_ref[...] = acc.reshape(1, th, wid, cout).astype(y_ref.dtype)
    # Per-step partial BatchNorm statistics (reduced by tiny XLA glue afterwards), so
    # every grid axis stays "parallel" — no shared accumulator / serialization.
    s_ref[...] = jnp.sum(acc, axis=0).reshape(1, 1, 1, cout)
    ss_ref[...] = jnp.sum(acc * acc, axis=0).reshape(1, 1, 1, cout)


def _conv1_kernel(body_ref, top_ref, bot_ref, w_ref, y_ref, s_ref, ss_ref,
                  win_ref, col_ref, *, th, wid, cin, cout, cpad):
    _conv_tile_body(body_ref, top_ref, bot_ref, None, None, w_ref,
                    y_ref, s_ref, ss_ref, win_ref, col_ref,
                    th=th, wid=wid, cin=cin, cout=cout, cpad=cpad)


def _conv2_kernel(body_ref, top_ref, bot_ref, scale_ref, shift_ref, w_ref,
                  y_ref, s_ref, ss_ref, win_ref, col_ref, *, th, wid, cin, cout, cpad):
    _conv_tile_body(body_ref, top_ref, bot_ref, scale_ref, shift_ref, w_ref,
                    y_ref, s_ref, ss_ref, win_ref, col_ref,
                    th=th, wid=wid, cin=cin, cout=cout, cpad=cpad)


def _bn_add_relu_kernel(y_ref, res_ref, scale_ref, shift_ref, o_ref):
    # Elementwise epilogue: BN2 + residual add + ReLU over lane-dense (rows, lane) blocks.
    y = y_ref[...].astype(jnp.float32)
    res = res_ref[...].astype(jnp.float32)
    o_ref[...] = jnp.maximum(y * scale_ref[...] + shift_ref[...] + res, 0.0).astype(o_ref.dtype)


# ---------------------------------------------------------------------------
# Tiling helpers (static Python)
# ---------------------------------------------------------------------------
def _pick_h_tile(n, hgt, wid, cin, budget_bytes=10 << 20):
    """Largest H tile (divisor of H) whose per-step VMEM footprint fits the budget,
    preferring enough grid steps (>= 8) for pipelining / megacore sharding."""
    cpad = _round_up(cin, 128)
    per_row_bytes = wid * (36 * cpad + 24 * cin) + 1024   # col+win scratch, in/out blocks, slack
    cap = max(1, budget_bytes // per_row_bytes)
    divs = [d for d in range(1, hgt + 1) if hgt % d == 0 and d <= cap]
    if not divs:
        return 1
    pipelined = [d for d in divs if n * (hgt // d) >= 8]
    return max(pipelined) if pipelined else max(divs)


def _pick_row_tile(rows, lane, budget_elems=512 * 1024):
    """Largest row tile (multiple of 8 when tiled) within a per-block element budget."""
    cap = max(8, budget_elems // max(1, lane))
    if rows <= cap:
        return rows
    start = min(cap, rows)
    start -= start % 8
    for d in range(start, 7, -8):
        if rows % d == 0:
            return d
    return max(8, start)   # non-dividing tile: Pallas masks the ragged last block


# ---------------------------------------------------------------------------
# Wrappers
# ---------------------------------------------------------------------------
def _prep_weight(w, c, cpad):
    # PyTorch (Cout, Cin, 3, 3) -> (dy, dx, Cin, Cout), Cin zero-padded to the lane tile,
    # flattened to (9*Cpad, Cout) matching the im2col K ordering.
    wt = jnp.transpose(w.astype(jnp.float32), (2, 3, 1, 0))
    if cpad != c:
        wt = jnp.pad(wt, ((0, 0), (0, 0), (0, cpad - c), (0, 0)))
    return wt.reshape(9 * cpad, c).astype(jnp.bfloat16)


def _bn_scale_shift(s_part, ss_part, count, gamma, beta):
    """(1, C) scale/shift for training-mode BN from per-step partial sums (tiny XLA glue)."""
    total = jnp.sum(s_part, axis=(0, 1, 2))
    total_sq = jnp.sum(ss_part, axis=(0, 1, 2))
    mean = total / count
    # TODO(synk): E[x^2]-E[x]^2 in f32 can lose precision for huge-magnitude activations;
    #             a mean-shifted / Welford-style partial accumulation would be more robust.
    var = jnp.maximum(total_sq / count - mean * mean, 0.0)   # biased variance (training BN)
    scale = gamma.astype(jnp.float32) * jax.lax.rsqrt(var + BN_EPS)
    shift = beta.astype(jnp.float32) - mean * scale
    return scale.reshape(1, -1), shift.reshape(1, -1)


def _conv3x3_pass(x_nhwc, w_taps, scale_shift, th):
    """One fused pass: [BN+ReLU ->] conv3x3 (H-tiled) -> (y bf16, partial BN sums f32)."""
    n, hgt, wid, cin = x_nhwc.shape
    cpad = w_taps.shape[0] // 9
    cout = w_taps.shape[1]
    n_ht = hgt // th

    body_spec = pl.BlockSpec((1, th, wid, cin), lambda b, t: (b, t, 0, 0))
    top_spec = pl.BlockSpec((1, 1, wid, cin),
                            lambda b, t: (b, jnp.maximum(t * th - 1, 0), 0, 0))
    bot_spec = pl.BlockSpec((1, 1, wid, cin),
                            lambda b, t: (b, jnp.minimum((t + 1) * th, hgt - 1), 0, 0))
    # TODO(synk): weights / scale / shift could be single-buffered (pipeline_mode=pl.Buffered(1))
    #             since their index_map is constant; left at the default to keep lowering simple.
    w_spec = pl.BlockSpec((9 * cpad, cout), lambda b, t: (0, 0))

    inputs = [x_nhwc, x_nhwc, x_nhwc]
    in_specs = [body_spec, top_spec, bot_spec]
    if scale_shift is None:
        kernel = functools.partial(_conv1_kernel, th=th, wid=wid, cin=cin, cout=cout, cpad=cpad)
    else:
        kernel = functools.partial(_conv2_kernel, th=th, wid=wid, cin=cin, cout=cout, cpad=cpad)
        scale, shift = scale_shift
        inputs += [scale, shift]
        in_specs += [pl.BlockSpec((1, cin), lambda b, t: (0, 0)),
                     pl.BlockSpec((1, cin), lambda b, t: (0, 0))]
    inputs.append(w_taps)
    in_specs.append(w_spec)

    flops = 2 * n * hgt * wid * 9 * cin * cout
    bytes_accessed = (x_nhwc.size * x_nhwc.dtype.itemsize
                      + w_taps.size * w_taps.dtype.itemsize
                      + n * hgt * wid * cout * 2 + 2 * n * n_ht * cout * 4)

    return pl.pallas_call(
        kernel,
        grid=(n, n_ht),
        in_specs=in_specs,
        out_specs=(pl.BlockSpec((1, th, wid, cout), lambda b, t: (b, t, 0, 0)),
                   pl.BlockSpec((1, 1, 1, cout), lambda b, t: (b, t, 0, 0)),
                   pl.BlockSpec((1, 1, 1, cout), lambda b, t: (b, t, 0, 0))),
        out_shape=(jax.ShapeDtypeStruct((n, hgt, wid, cout), jnp.bfloat16),
                   jax.ShapeDtypeStruct((n, n_ht, 1, cout), jnp.float32),
                   jax.ShapeDtypeStruct((n, n_ht, 1, cout), jnp.float32)),
        scratch_shapes=[pltpu.VMEM((th + 2, wid + 2, cin), jnp.float32),
                        pltpu.VMEM((th * wid, 9 * cpad), jnp.float32)],
        compiler_params=pltpu.CompilerParams(
            dimension_semantics=("parallel", "parallel"),
            vmem_limit_bytes=_VMEM_LIMIT),
        cost_estimate=pl.CostEstimate(flops=flops, transcendentals=0,
                                      bytes_accessed=bytes_accessed),
    )(*inputs)


def resblock_forward(x_nchw, w1, gamma1, beta1, w2, gamma2, beta2):
    """Pallas TPU ResBlock.forward (training-mode BatchNorm, PyTorch NCHW interface)."""
    n, c, hgt, wid = x_nchw.shape
    count = n * hgt * wid
    cpad = _round_up(c, 128)

    # Glue: NCHW -> NHWC (channels on lanes), bf16 operands for the MXU / halved HBM traffic.
    # TODO(synk): drop both transposes (full HBM round trips) if the surrounding model is NHWC.
    x_nhwc = jnp.transpose(x_nchw, (0, 2, 3, 1)).astype(jnp.bfloat16)
    w1_taps = _prep_weight(w1, c, cpad)
    w2_taps = _prep_weight(w2, c, cpad)

    th = _pick_h_tile(n, hgt, wid, c)

    # Pass 1: conv1 + per-step partial BN1 statistics.
    y1, s1, ss1 = _conv3x3_pass(x_nhwc, w1_taps, None, th)
    scale1, shift1 = _bn_scale_shift(s1, ss1, count, gamma1, beta1)

    # Pass 2: fused BN1-normalize + ReLU + conv2 + partial BN2 statistics.  Reads y1
    # directly (no jnp.pad HBM round trip); halo / zero padding rebuilt in-kernel.
    y2, s2, ss2 = _conv3x3_pass(y1, w2_taps, (scale1, shift1), th)
    scale2, shift2 = _bn_scale_shift(s2, ss2, count, gamma2, beta2)

    # Pass 3: BN2 + residual add + ReLU over lane-dense (rows, lane) blocks.
    rows, lane = n * hgt, wid * c
    while lane < 128 and rows % 2 == 0:     # fold rows into lanes when W*C is narrow
        lane *= 2
        rows //= 2
    reps = lane // c
    scale_row = jnp.tile(scale2.reshape(-1), reps).reshape(1, lane)
    shift_row = jnp.tile(shift2.reshape(-1), reps).reshape(1, lane)
    tr = _pick_row_tile(rows, lane)
    # TODO(synk): with a bf16 output this could alias onto y2 via input_output_aliases.
    out2d = pl.pallas_call(
        _bn_add_relu_kernel,
        grid=(pl.cdiv(rows, tr),),
        in_specs=[pl.BlockSpec((tr, lane), lambda i: (i, 0)),
                  pl.BlockSpec((tr, lane), lambda i: (i, 0)),
                  pl.BlockSpec((1, lane), lambda i: (0, 0)),
                  pl.BlockSpec((1, lane), lambda i: (0, 0))],
        out_specs=pl.BlockSpec((tr, lane), lambda i: (i, 0)),
        out_shape=jax.ShapeDtypeStruct((rows, lane), jnp.float32),
        compiler_params=pltpu.CompilerParams(dimension_semantics=("parallel",),
                                             vmem_limit_bytes=_VMEM_LIMIT),
    )(y2.reshape(rows, lane), x_nhwc.reshape(rows, lane), scale_row, shift_row)

    out_nhwc = out2d.reshape(n, hgt, wid, c).astype(x_nchw.dtype)
    return jnp.transpose(out_nhwc, (0, 3, 1, 2))        # back to NCHW


# ---------------------------------------------------------------------------
# Self-test
# ---------------------------------------------------------------------------
if __name__ == "__main__":
    key = jax.random.PRNGKey(0)
    kx, kw1, kg1, kb1, kw2, kg2, kb2 = jax.random.split(key, 7)
    N, C, H, W = 2, 4, 16, 16

    x = jax.random.normal(kx, (N, C, H, W), jnp.float32)
    w1 = 0.1 * jax.random.normal(kw1, (C, C, 3, 3), jnp.float32)        # block[0].weight
    g1 = 1.0 + 0.1 * jax.random.normal(kg1, (C,), jnp.float32)          # block[1].weight
    b1 = 0.1 * jax.random.normal(kb1, (C,), jnp.float32)                # block[1].bias
    w2 = 0.1 * jax.random.normal(kw2, (C, C, 3, 3), jnp.float32)        # block[3].weight
    g2 = 1.0 + 0.1 * jax.random.normal(kg2, (C,), jnp.float32)          # block[4].weight
    b2 = 0.1 * jax.random.normal(kb2, (C,), jnp.float32)                # block[4].bias

    fwd = jax.jit(resblock_forward)
    out = jax.block_until_ready(fwd(x, w1, g1, b1, w2, g2, b2))

    # Pure-JAX f32 reference: conv3x3 -> BN(train) -> ReLU -> conv3x3 -> BN(train) -> +x -> ReLU.
    def conv3x3_ref(z, w):
        return jax.lax.conv_general_dilated(z, w, (1, 1), [(1, 1), (1, 1)],
                                            dimension_numbers=("NCHW", "OIHW", "NCHW"))

    def bn_ref(z, g, b):
        mu = jnp.mean(z, axis=(0, 2, 3), keepdims=True)
        var = jnp.mean((z - mu) ** 2, axis=(0, 2, 3), keepdims=True)
        return ((z - mu) * jax.lax.rsqrt(var + BN_EPS) * g.reshape(1, -1, 1, 1)
                + b.reshape(1, -1, 1, 1))

    h_ref = jnp.maximum(bn_ref(conv3x3_ref(x, w1), g1, b1), 0.0)
    ref = jnp.maximum(bn_ref(conv3x3_ref(h_ref, w2), g2, b2) + x, 0.0)

    assert out.shape == (N, C, H, W), out.shape
    err = float(jnp.max(jnp.abs(out - ref)))
    # bf16 activations / intermediates (f32 accumulation) -> slightly loosened tolerance.
    assert jnp.allclose(out, ref, atol=5e-2, rtol=5e-2), err
    print("KERNEL_OK")
</pallas_src>

<mosaic_0001>
module attributes {stable_mosaic.version = 11 : i64} {
  func.func @_conv1_kernel(%arg0: i32, %arg1: i32, %arg2: memref<1x4x16x4xbf16, #tpu.memory_space<vmem>>, %arg3: memref<1x1x16x4xbf16, #tpu.memory_space<vmem>>, %arg4: memref<1x1x16x4xbf16, #tpu.memory_space<vmem>>, %arg5: memref<1152x4xbf16, #tpu.memory_space<vmem>>, %arg6: memref<1x4x16x4xbf16, #tpu.memory_space<vmem>>, %arg7: memref<1x1x1x4xf32, #tpu.memory_space<vmem>>, %arg8: memref<1x1x1x4xf32, #tpu.memory_space<vmem>>, %arg9: memref<6x18x4xf32, #tpu.memory_space<vmem>>, %arg10: memref<64x1152xf32, #tpu.memory_space<vmem>>) attributes {dimension_semantics = [#tpu.dimension_semantics<parallel>, #tpu.dimension_semantics<parallel>], iteration_bounds = array<i64: 2, 4>, scalar_prefetch = 0 : i64, scratch_operands = 2 : i64, tpu.core_type = #tpu.core_type<tc>, window_params = [{transform_indices = @transform_0, window_bounds = array<i64: 1, 4, 16, 4>}, {transform_indices = @transform_1, window_bounds = array<i64: 1, 1, 16, 4>}, {transform_indices = @transform_2, window_bounds = array<i64: 1, 1, 16, 4>}, {pipeline_mode = #tpu.pipeline_mode<synchronous>, transform_indices = @transform_3, window_bounds = array<i64: 1152, 4>}, {transform_indices = @transform_4, window_bounds = array<i64: 1, 4, 16, 4>}, {transform_indices = @transform_5, window_bounds = array<i64: 1, 1, 1, 4>}, {transform_indices = @transform_6, window_bounds = array<i64: 1, 1, 1, 4>}]} {
    %c0 = arith.constant 0 : index
    %c0_0 = arith.constant 0 : index
    %c0_1 = arith.constant 0 : index
    %c0_2 = arith.constant 0 : index
    %0 = vector.load %arg2[%c0, %c0_0, %c0_1, %c0_2] : memref<1x4x16x4xbf16, #tpu.memory_space<vmem>>, vector<1x4x16x4xbf16>
    %1 = vector.shape_cast %0 : vector<1x4x16x4xbf16> to vector<4x16x4xbf16>
    %2 = arith.extf %1 : vector<4x16x4xbf16> to vector<4x16x4xf32>
    %c0_3 = arith.constant 0 : index
    %c0_4 = arith.constant 0 : index
    %c0_5 = arith.constant 0 : index
    %c0_6 = arith.constant 0 : index
    %3 = vector.load %arg3[%c0_3, %c0_4, %c0_5, %c0_6] : memref<1x1x16x4xbf16, #tpu.memory_space<vmem>>, vector<1x1x16x4xbf16>
    %4 = vector.shape_cast %3 : vector<1x1x16x4xbf16> to vector<1x16x4xbf16>
    %5 = arith.extf %4 : vector<1x16x4xbf16> to vector<1x16x4xf32>
    %c0_7 = arith.constant 0 : index
    %c0_8 = arith.constant 0 : index
    %c0_9 = arith.constant 0 : index
    %c0_10 = arith.constant 0 : index
    %6 = vector.load %arg4[%c0_7, %c0_8, %c0_9, %c0_10] : memref<1x1x16x4xbf16, #tpu.memory_space<vmem>>, vector<1x1x16x4xbf16>
    %7 = vector.shape_cast %6 : vector<1x1x16x4xbf16> to vector<1x16x4xbf16>
    %8 = arith.extf %7 : vector<1x16x4xbf16> to vector<1x16x4xf32>
    %c0_i32 = arith.constant 0 : i32
    %9 = arith.cmpi sgt, %arg1, %c0_i32 : i32
    %10 = arith.extui %9 : i1 to i32
    %11 = arith.sitofp %10 : i32 to f32
    %12 = vector.broadcast %11 : f32 to vector<1x16x4xf32>
    %13 = arith.mulf %5, %12 : vector<1x16x4xf32>
    %c3_i32 = arith.constant 3 : i32
    %14 = arith.cmpi slt, %arg1, %c3_i32 : i32
    %15 = arith.extui %14 : i1 to i32
    %16 = arith.sitofp %15 : i32 to f32
    %17 = vector.broadcast %16 : f32 to vector<1x16x4xf32>
    %18 = arith.mulf %8, %17 : vector<1x16x4xf32>
    %cst = arith.constant 0.000000e+00 : f32
    %19 = vector.broadcast %cst : f32 to vector<6x18x4xf32>
    %c0_11 = arith.constant 0 : index
    %c0_12 = arith.constant 0 : index
    %c0_13 = arith.constant 0 : index
    %20 = vector.load %arg9[%c0_11, %c0_12, %c0_13] : memref<6x18x4xf32, #tpu.memory_space<vmem>>, vector<6x18x4xf32>
    tpu.vector_store %arg9[%c0_11, %c0_12, %c0_13], %19 {strides = array<i32>} : memref<6x18x4xf32, #tpu.memory_space<vmem>>, vector<6x18x4xf32>,
    %c0_14 = arith.constant 0 : index
    %c1 = arith.constant 1 : index
    %c0_15 = arith.constant 0 : index
    %21 = vector.load %arg9[%c0_14, %c1, %c0_15] : memref<6x18x4xf32, #tpu.memory_space<vmem>>, vector<1x16x4xf32>
    tpu.vector_store %arg9[%c0_14, %c1, %c0_15], %13 {strides = array<i32>} : memref<6x18x4xf32, #tpu.memory_space<vmem>>, vector<1x16x4xf32>,
    %c5 = arith.constant 5 : index
    %c1_16 = arith.constant 1 : index
    %c0_17 = arith.constant 0 : index
    %22 = vector.load %arg9[%c5, %c1_16, %c0_17] : memref<6x18x4xf32, #tpu.memory_space<vmem>>, vector<1x16x4xf32>
    tpu.vector_store %arg9[%c5, %c1_16, %c0_17], %18 {strides = array<i32>} : memref<6x18x4xf32, #tpu.memory_space<vmem>>, vector<1x16x4xf32>,
    %c1_18 = arith.constant 1 : index
    %c1_19 = arith.constant 1 : index
    %c0_20 = arith.constant 0 : index
    %23 = vector.load %arg9[%c1_18, %c1_19, %c0_20] : memref<6x18x4xf32, #tpu.memory_space<vmem>>, vector<4x16x4xf32>
    tpu.vector_store %arg9[%c1_18, %c1_19, %c0_20], %2 {strides = array<i32>} : memref<6x18x4xf32, #tpu.memory_space<vmem>>, vector<4x16x4xf32>,
    %cst_21 = arith.constant 0.000000e+00 : f32
    %24 = vector.broadcast %cst_21 : f32 to vector<64x1152xf32>
    %c0_22 = arith.constant 0 : index
    %c0_23 = arith.constant 0 : index
    %25 = vector.load %arg10[%c0_22, %c0_23] : memref<64x1152xf32, #tpu.memory_space<vmem>>, vector<64x1152xf32>
    tpu.vector_store %arg10[%c0_22, %c0_23], %24 {strides = array<i32>} : memref<64x1152xf32, #tpu.memory_space<vmem>>, vector<64x1152xf32>,
    %c0_24 = arith.constant 0 : index
    %c0_25 = arith.constant 0 : index
    %c0_26 = arith.constant 0 : index
    %26 = vector.load %arg9[%c0_24, %c0_25, %c0_26] : memref<6x18x4xf32, #tpu.memory_space<vmem>>, vector<4x16x4xf32>
    %27 = vector.shape_cast %26 : vector<4x16x4xf32> to vector<64x4xf32>
    %c0_27 = arith.constant 0 : index
    %c0_28 = arith.constant 0 : index
    %28 = vector.load %arg10[%c0_27, %c0_28] : memref<64x1152xf32, #tpu.memory_space<vmem>>, vector<64x4xf32>
    tpu.vector_store %arg10[%c0_27, %c0_28], %27 {strides = array<i32>} : memref<64x1152xf32, #tpu.memory_space<vmem>>, vector<64x4xf32>,
    %c0_29 = arith.constant 0 : index
    %c1_30 = arith.constant 1 : index
    %c0_31 = arith.constant 0 : index
    %29 = vector.load %arg9[%c0_29, %c1_30, %c0_31] : memref<6x18x4xf32, #tpu.memory_space<vmem>>, vector<4x16x4xf32>
    %30 = vector.shape_cast %29 : vector<4x16x4xf32> to vector<64x4xf32>
    %c0_32 = arith.constant 0 : index
    %c128 = arith.constant 128 : index
    %31 = vector.load %arg10[%c0_32, %c128] : memref<64x1152xf32, #tpu.memory_space<vmem>>, vector<64x4xf32>
    tpu.vector_store %arg10[%c0_32, %c128], %30 {strides = array<i32>} : memref<64x1152xf32, #tpu.memory_space<vmem>>, vector<64x4xf32>,
    %c0_33 = arith.constant 0 : index
    %c2 = arith.constant 2 : index
    %c0_34 = arith.constant 0 : index
    %32 = vector.load %arg9[%c0_33, %c2, %c0_34] : memref<6x18x4xf32, #tpu.memory_space<vmem>>, vector<4x16x4xf32>
    %33 = vector.shape_cast %32 : vector<4x16x4xf32> to vector<64x4xf32>
    %c0_35 = arith.constant 0 : index
    %c256 = arith.constant 256 : index
    %34 = vector.load %arg10[%c0_35, %c256] : memref<64x1152xf32, #tpu.memory_space<vmem>>, vector<64x4xf32>
    tpu.vector_store %arg10[%c0_35, %c256], %33 {strides = array<i32>} : memref<64x1152xf32, #tpu.memory_space<vmem>>, vector<64x4xf32>,
    %c1_36 = arith.constant 1 : index
    %c0_37 = arith.constant 0 : index
    %c0_38 = arith.constant 0 : index
    %35 = vector.load %arg9[%c1_36, %c0_37, %c0_38] : memref<6x18x4xf32, #tpu.memory_space<vmem>>, vector<4x16x4xf32>
    %36 = vector.shape_cast %35 : vector<4x16x4xf32> to vector<64x4xf32>
    %c0_39 = arith.constant 0 : index
    %c384 = arith.constant 384 : index
    %37 = vector.load %arg10[%c0_39, %c384] : memref<64x1152xf32, #tpu.memory_space<vmem>>, vector<64x4xf32>
    tpu.vector_store %arg10[%c0_39, %c384], %36 {strides = array<i32>} : memref<64x1152xf32, #tpu.memory_space<vmem>>, vector<64x4xf32>,
    %c1_40 = arith.constant 1 : index
    %c1_41 = arith.constant 1 : index
    %c0_42 = arith.constant 0 : index
    %38 = vector.load %arg9[%c1_40, %c1_41, %c0_42] : memref<6x18x4xf32, #tpu.memory_space<vmem>>, vector<4x16x4xf32>
    %39 = vector.shape_cast %38 : vector<4x16x4xf32> to vector<64x4xf32>
    %c0_43 = arith.constant 0 : index
    %c512 = arith.constant 512 : index
    %40 = vector.load %arg10[%c0_43, %c512] : memref<64x1152xf32, #tpu.memory_space<vmem>>, vector<64x4xf32>
    tpu.vector_store %arg10[%c0_43, %c512], %39 {strides = array<i32>} : memref<64x1152xf32, #tpu.memory_space<vmem>>, vector<64x4xf32>,
    %c1_44 = arith.constant 1 : index
    %c2_45 = arith.constant 2 : index
    %c0_46 = arith.constant 0 : index
    %41 = vector.load %arg9[%c1_44, %c2_45, %c0_46] : memref<6x18x4xf32, #tpu.memory_space<vmem>>, vector<4x16x4xf32>
    %42 = vector.shape_cast %41 : vector<4x16x4xf32> to vector<64x4xf32>
    %c0_47 = arith.constant 0 : index
    %c640 = arith.constant 640 : index
    %43 = vector.load %arg10[%c0_47, %c640] : memref<64x1152xf32, #tpu.memory_space<vmem>>, vector<64x4xf32>
    tpu.vector_store %arg10[%c0_47, %c640], %42 {strides = array<i32>} : memref<64x1152xf32, #tpu.memory_space<vmem>>, vector<64x4xf32>,
    %c2_48 = arith.constant 2 : index
    %c0_49 = arith.constant 0 : index
    %c0_50 = arith.constant 0 : index
    %44 = vector.load %arg9[%c2_48, %c0_49, %c0_50] : memref<6x18x4xf32, #tpu.memory_space<vmem>>, vector<4x16x4xf32>
    %45 = vector.shape_cast %44 : vector<4x16x4xf32> to vector<64x4xf32>
    %c0_51 = arith.constant 0 : index
    %c768 = arith.constant 768 : index
    %46 = vector.load %arg10[%c0_51, %c768] : memref<64x1152xf32, #tpu.memory_space<vmem>>, vector<64x4xf32>
    tpu.vector_store %arg10[%c0_51, %c768], %45 {strides = array<i32>} : memref<64x1152xf32, #tpu.memory_space<vmem>>, vector<64x4xf32>,
    %c2_52 = arith.constant 2 : index
    %c1_53 = arith.constant 1 : index
    %c0_54 = arith.constant 0 : index
    %47 = vector.load %arg9[%c2_52, %c1_53, %c0_54] : memref<6x18x4xf32, #tpu.memory_space<vmem>>, vector<4x16x4xf32>
    %48 = vector.shape_cast %47 : vector<4x16x4xf32> to vector<64x4xf32>
    %c0_55 = arith.constant 0 : index
    %c896 = arith.constant 896 : index
    %49 = vector.load %arg10[%c0_55, %c896] : memref<64x1152xf32, #tpu.memory_space<vmem>>, vector<64x4xf32>
    tpu.vector_store %arg10[%c0_55, %c896], %48 {strides = array<i32>} : memref<64x1152xf32, #tpu.memory_space<vmem>>, vector<64x4xf32>,
    %c2_56 = arith.constant 2 : index
    %c2_57 = arith.constant 2 : index
    %c0_58 = arith.constant 0 : index
    %50 = vector.load %arg9[%c2_56, %c2_57, %c0_58] : memref<6x18x4xf32, #tpu.memory_space<vmem>>, vector<4x16x4xf32>
    %51 = vector.shape_cast %50 : vector<4x16x4xf32> to vector<64x4xf32>
    %c0_59 = arith.constant 0 : index
    %c1024 = arith.constant 1024 : index
    %52 = vector.load %arg10[%c0_59, %c1024] : memref<64x1152xf32, #tpu.memory_space<vmem>>, vector<64x4xf32>
    tpu.vector_store %arg10[%c0_59, %c1024], %51 {strides = array<i32>} : memref<64x1152xf32, #tpu.memory_space<vmem>>, vector<64x4xf32>,
    %c0_60 = arith.constant 0 : index
    %c0_61 = arith.constant 0 : index
    %53 = vector.load %arg10[%c0_60, %c0_61] : memref<64x1152xf32, #tpu.memory_space<vmem>>, vector<64x1152xf32>
    %54 = arith.truncf %53 : vector<64x1152xf32> to vector<64x1152xbf16>
    %c0_62 = arith.constant 0 : index
    %c0_63 = arith.constant 0 : index
    %55 = vector.load %arg5[%c0_62, %c0_63] : memref<1152x4xbf16, #tpu.memory_space<vmem>>, vector<1152x4xbf16>
    %cst_64 = arith.constant dense<0.000000e+00> : vector<64x4xf32>
    %56 = tpu.matmul %54, %55, %cst_64 {dimension_numbers = #tpu.dot_dimension_numbers<[1], [0], [0], [1], [0, 0, 1, 1], [], []>} : vector<64x1152xbf16>, vector<1152x4xbf16>, vector<64x4xf32> -> vector<64x4xf32>
    %57 = vector.shape_cast %56 : vector<64x4xf32> to vector<1x4x16x4xf32>
    %58 = arith.truncf %57 : vector<1x4x16x4xf32> to vector<1x4x16x4xbf16>
    %c0_65 = arith.constant 0 : index
    %c0_66 = arith.constant 0 : index
    %c0_67 = arith.constant 0 : index
    %c0_68 = arith.constant 0 : index
    %59 = vector.load %arg6[%c0_65, %c0_66, %c0_67, %c0_68] : memref<1x4x16x4xbf16, #tpu.memory_space<vmem>>, vector<1x4x16x4xbf16>
    tpu.vector_store %arg6[%c0_65, %c0_66, %c0_67, %c0_68], %58 {strides = array<i32>} : memref<1x4x16x4xbf16, #tpu.memory_space<vmem>>, vector<1x4x16x4xbf16>,
    %cst_69 = arith.constant dense<0.000000e+00> : vector<4xf32>
    %60 = vector.multi_reduction <add>, %56, %cst_69 [0] : vector<64x4xf32> to vector<4xf32>
    %61 = vector.shape_cast %60 : vector<4xf32> to vector<1x1x1x4xf32>
    %c0_70 = arith.constant 0 : index
    %c0_71 = arith.constant 0 : index
    %c0_72 = arith.constant 0 : index
    %c0_73 = arith.constant 0 : index
    %62 = vector.load %arg7[%c0_70, %c0_71, %c0_72, %c0_73] : memref<1x1x1x4xf32, #tpu.memory_space<vmem>>, vector<1x1x1x4xf32>
    tpu.vector_store %arg7[%c0_70, %c0_71, %c0_72, %c0_73], %61 {strides = array<i32>} : memref<1x1x1x4xf32, #tpu.memory_space<vmem>>, vector<1x1x1x4xf32>,
    %63 = arith.mulf %56, %56 : vector<64x4xf32>
    %cst_74 = arith.constant dense<0.000000e+00> : vector<4xf32>
    %64 = vector.multi_reduction <add>, %63, %cst_74 [0] : vector<64x4xf32> to vector<4xf32>
    %65 = vector.shape_cast %64 : vector<4xf32> to vector<1x1x1x4xf32>
    %c0_75 = arith.constant 0 : index
    %c0_76 = arith.constant 0 : index
    %c0_77 = arith.constant 0 : index
    %c0_78 = arith.constant 0 : index
    %66 = vector.load %arg8[%c0_75, %c0_76, %c0_77, %c0_78] : memref<1x1x1x4xf32, #tpu.memory_space<vmem>>, vector<1x1x1x4xf32>
    tpu.vector_store %arg8[%c0_75, %c0_76, %c0_77, %c0_78], %65 {strides = array<i32>} : memref<1x1x1x4xf32, #tpu.memory_space<vmem>>, vector<1x1x1x4xf32>,
    return
  }
  func.func @transform_0(%arg0: i32, %arg1: i32) -> (i32, i32, i32, i32) {
    %c0_i32 = arith.constant 0 : i32
    %c0_i32_0 = arith.constant 0 : i32
    %c0_i32_1 = arith.constant 0 : i32
    return %arg0, %arg1, %c0_i32, %c0_i32_0 : i32, i32, i32, i32
  }
  func.func @transform_1(%arg0: i32, %arg1: i32) -> (i32, i32, i32, i32) {
    %c4_i32 = arith.constant 4 : i32
    %0 = arith.muli %arg1, %c4_i32 : i32
    %c1_i32 = arith.constant 1 : i32
    %1 = arith.subi %0, %c1_i32 : i32
    %c0_i32 = arith.constant 0 : i32
    %2 = arith.maxsi %1, %c0_i32 : i32
    %c0_i32_0 = arith.constant 0 : i32
    %c0_i32_1 = arith.constant 0 : i32
    %c0_i32_2 = arith.constant 0 : i32
    return %arg0, %2, %c0_i32_0, %c0_i32_1 : i32, i32, i32, i32
  }
  func.func @transform_2(%arg0: i32, %arg1: i32) -> (i32, i32, i32, i32) {
    %c1_i32 = arith.constant 1 : i32
    %0 = arith.addi %arg1, %c1_i32 : i32
    %c4_i32 = arith.constant 4 : i32
    %1 = arith.muli %0, %c4_i32 : i32
    %c15_i32 = arith.constant 15 : i32
    %2 = arith.minsi %1, %c15_i32 : i32
    %c0_i32 = arith.constant 0 : i32
    %c0_i32_0 = arith.constant 0 : i32
    %c0_i32_1 = arith.constant 0 : i32
    return %arg0, %2, %c0_i32, %c0_i32_0 : i32, i32, i32, i32
  }
  func.func @transform_3(%arg0: i32, %arg1: i32) -> (i32, i32) {
    %c0_i32 = arith.constant 0 : i32
    %c0_i32_0 = arith.constant 0 : i32
    %c0_i32_1 = arith.constant 0 : i32
    return %c0_i32, %c0_i32_0 : i32, i32
  }
  func.func @transform_4(%arg0: i32, %arg1: i32) -> (i32, i32, i32, i32) {
    %c0_i32 = arith.constant 0 : i32
    %c0_i32_0 = arith.constant 0 : i32
    %c0_i32_1 = arith.constant 0 : i32
    return %arg0, %arg1, %c0_i32, %c0_i32_0 : i32, i32, i32, i32
  }
  func.func @transform_5(%arg0: i32, %arg1: i32) -> (i32, i32, i32, i32) {
    %c0_i32 = arith.constant 0 : i32
    %c0_i32_0 = arith.constant 0 : i32
    %c0_i32_1 = arith.constant 0 : i32
    return %arg0, %arg1, %c0_i32, %c0_i32_0 : i32, i32, i32, i32
  }
  func.func @transform_6(%arg0: i32, %arg1: i32) -> (i32, i32, i32, i32) {
    %c0_i32 = arith.constant 0 : i32
    %c0_i32_0 = arith.constant 0 : i32
    %c0_i32_1 = arith.constant 0 : i32
    return %arg0, %arg1, %c0_i32, %c0_i32_0 : i32, i32, i32, i32
  }
}

module attributes {stable_mosaic.version = 11 : i64} {
  func.func @_conv2_kernel(%arg0: i32, %arg1: i32, %arg2: memref<1x4x16x4xbf16, #tpu.memory_space<vmem>>, %arg3: memref<1x1x16x4xbf16, #tpu.memory_space<vmem>>, %arg4: memref<1x1x16x4xbf16, #tpu.memory_space<vmem>>, %arg5: memref<1x4xf32, #tpu.memory_space<vmem>>, %arg6: memref<1x4xf32, #tpu.memory_space<vmem>>, %arg7: memref<1152x4xbf16, #tpu.memory_space<vmem>>, %arg8: memref<1x4x16x4xbf16, #tpu.memory_space<vmem>>, %arg9: memref<1x1x1x4xf32, #tpu.memory_space<vmem>>, %arg10: memref<1x1x1x4xf32, #tpu.memory_space<vmem>>, %arg11: memref<6x18x4xf32, #tpu.memory_space<vmem>>, %arg12: memref<64x1152xf32, #tpu.memory_space<vmem>>) attributes {dimension_semantics = [#tpu.dimension_semantics<parallel>, #tpu.dimension_semantics<parallel>], iteration_bounds = array<i64: 2, 4>, scalar_prefetch = 0 : i64, scratch_operands = 2 : i64, tpu.core_type = #tpu.core_type<tc>, window_params = [{transform_indices = @transform_0, window_bounds = array<i64: 1, 4, 16, 4>}, {transform_indices = @transform_1, window_bounds = array<i64: 1, 1, 16, 4>}, {transform_indices = @transform_2, window_bounds = array<i64: 1, 1, 16, 4>}, {pipeline_mode = #tpu.pipeline_mode<synchronous>, transform_indices = @transform_3, window_bounds = array<i64: 1, 4>}, {pipeline_mode = #tpu.pipeline_mode<synchronous>, transform_indices = @transform_4, window_bounds = array<i64: 1, 4>}, {pipeline_mode = #tpu.pipeline_mode<synchronous>, transform_indices = @transform_5, window_bounds = array<i64: 1152, 4>}, {transform_indices = @transform_6, window_bounds = array<i64: 1, 4, 16, 4>}, {transform_indices = @transform_7, window_bounds = array<i64: 1, 1, 1, 4>}, {transform_indices = @transform_8, window_bounds = array<i64: 1, 1, 1, 4>}]} {
    %c0 = arith.constant 0 : index
    %c0_0 = arith.constant 0 : index
    %c0_1 = arith.constant 0 : index
    %c0_2 = arith.constant 0 : index
    %0 = vector.load %arg2[%c0, %c0_0, %c0_1, %c0_2] : memref<1x4x16x4xbf16, #tpu.memory_space<vmem>>, vector<1x4x16x4xbf16>
    %1 = vector.shape_cast %0 : vector<1x4x16x4xbf16> to vector<4x16x4xbf16>
    %2 = arith.extf %1 : vector<4x16x4xbf16> to vector<4x16x4xf32>
    %c0_3 = arith.constant 0 : index
    %c0_4 = arith.constant 0 : index
    %c0_5 = arith.constant 0 : index
    %c0_6 = arith.constant 0 : index
    %3 = vector.load %arg3[%c0_3, %c0_4, %c0_5, %c0_6] : memref<1x1x16x4xbf16, #tpu.memory_space<vmem>>, vector<1x1x16x4xbf16>
    %4 = vector.shape_cast %3 : vector<1x1x16x4xbf16> to vector<1x16x4xbf16>
    %5 = arith.extf %4 : vector<1x16x4xbf16> to vector<1x16x4xf32>
    %c0_7 = arith.constant 0 : index
    %c0_8 = arith.constant 0 : index
    %c0_9 = arith.constant 0 : index
    %c0_10 = arith.constant 0 : index
    %6 = vector.load %arg4[%c0_7, %c0_8, %c0_9, %c0_10] : memref<1x1x16x4xbf16, #tpu.memory_space<vmem>>, vector<1x1x16x4xbf16>
    %7 = vector.shape_cast %6 : vector<1x1x16x4xbf16> to vector<1x16x4xbf16>
    %8 = arith.extf %7 : vector<1x16x4xbf16> to vector<1x16x4xf32>
    %c0_11 = arith.constant 0 : index
    %c0_12 = arith.constant 0 : index
    %9 = vector.load %arg5[%c0_11, %c0_12] : memref<1x4xf32, #tpu.memory_space<vmem>>, vector<1x4xf32>
    %10 = vector.shape_cast %9 : vector<1x4xf32> to vector<1x1x4xf32>
    %c0_13 = arith.constant 0 : index
    %c0_14 = arith.constant 0 : index
    %11 = vector.load %arg6[%c0_13, %c0_14] : memref<1x4xf32, #tpu.memory_space<vmem>>, vector<1x4xf32>
    %12 = vector.shape_cast %11 : vector<1x4xf32> to vector<1x1x4xf32>
    %13 = vector.broadcast %10 : vector<1x1x4xf32> to vector<4x16x4xf32>
    %14 = arith.mulf %2, %13 : vector<4x16x4xf32>
    %15 = vector.broadcast %12 : vector<1x1x4xf32> to vector<4x16x4xf32>
    %16 = arith.addf %14, %15 : vector<4x16x4xf32>
    %cst = arith.constant 0.000000e+00 : f32
    %17 = vector.broadcast %cst : f32 to vector<4x16x4xf32>
    %18 = arith.maximumf %16, %17 : vector<4x16x4xf32>
    %19 = vector.broadcast %10 : vector<1x1x4xf32> to vector<1x16x4xf32>
    %20 = arith.mulf %5, %19 : vector<1x16x4xf32>
    %21 = vector.broadcast %12 : vector<1x1x4xf32> to vector<1x16x4xf32>
    %22 = arith.addf %20, %21 : vector<1x16x4xf32>
    %cst_15 = arith.constant 0.000000e+00 : f32
    %23 = vector.broadcast %cst_15 : f32 to vector<1x16x4xf32>
    %24 = arith.maximumf %22, %23 : vector<1x16x4xf32>
    %25 = vector.broadcast %10 : vector<1x1x4xf32> to vector<1x16x4xf32>
    %26 = arith.mulf %8, %25 : vector<1x16x4xf32>
    %27 = vector.broadcast %12 : vector<1x1x4xf32> to vector<1x16x4xf32>
    %28 = arith.addf %26, %27 : vector<1x16x4xf32>
    %cst_16 = arith.constant 0.000000e+00 : f32
    %29 = vector.broadcast %cst_16 : f32 to vector<1x16x4xf32>
    %30 = arith.maximumf %28, %29 : vector<1x16x4xf32>
    %c0_i32 = arith.constant 0 : i32
    %31 = arith.cmpi sgt, %arg1, %c0_i32 : i32
    %32 = arith.extui %31 : i1 to i32
    %33 = arith.sitofp %32 : i32 to f32
    %34 = vector.broadcast %33 : f32 to vector<1x16x4xf32>
    %35 = arith.mulf %24, %34 : vector<1x16x4xf32>
    %c3_i32 = arith.constant 3 : i32
    %36 = arith.cmpi slt, %arg1, %c3_i32 : i32
    %37 = arith.extui %36 : i1 to i32
    %38 = arith.sitofp %37 : i32 to f32
    %39 = vector.broadcast %38 : f32 to vector<1x16x4xf32>
    %40 = arith.mulf %30, %39 : vector<1x16x4xf32>
    %cst_17 = arith.constant 0.000000e+00 : f32
    %41 = vector.broadcast %cst_17 : f32 to vector<6x18x4xf32>
    %c0_18 = arith.constant 0 : index
    %c0_19 = arith.constant 0 : index
    %c0_20 = arith.constant 0 : index
    %42 = vector.load %arg11[%c0_18, %c0_19, %c0_20] : memref<6x18x4xf32, #tpu.memory_space<vmem>>, vector<6x18x4xf32>
    tpu.vector_store %arg11[%c0_18, %c0_19, %c0_20], %41 {strides = array<i32>} : memref<6x18x4xf32, #tpu.memory_space<vmem>>, vector<6x18x4xf32>,
    %c0_21 = arith.constant 0 : index
    %c1 = arith.constant 1 : index
    %c0_22 = arith.constant 0 : index
    %43 = vector.load %arg11[%c0_21, %c1, %c0_22] : memref<6x18x4xf32, #tpu.memory_space<vmem>>, vector<1x16x4xf32>
    tpu.vector_store %arg11[%c0_21, %c1, %c0_22], %35 {strides = array<i32>} : memref<6x18x4xf32, #tpu.memory_space<vmem>>, vector<1x16x4xf32>,
    %c5 = arith.constant 5 : index
    %c1_23 = arith.constant 1 : index
    %c0_24 = arith.constant 0 : index
    %44 = vector.load %arg11[%c5, %c1_23, %c0_24] : memref<6x18x4xf32, #tpu.memory_space<vmem>>, vector<1x16x4xf32>
    tpu.vector_store %arg11[%c5, %c1_23, %c0_24], %40 {strides = array<i32>} : memref<6x18x4xf32, #tpu.memory_space<vmem>>, vector<1x16x4xf32>,
    %c1_25 = arith.constant 1 : index
    %c1_26 = arith.constant 1 : index
    %c0_27 = arith.constant 0 : index
    %45 = vector.load %arg11[%c1_25, %c1_26, %c0_27] : memref<6x18x4xf32, #tpu.memory_space<vmem>>, vector<4x16x4xf32>
    tpu.vector_store %arg11[%c1_25, %c1_26, %c0_27], %18 {strides = array<i32>} : memref<6x18x4xf32, #tpu.memory_space<vmem>>, vector<4x16x4xf32>,
    %cst_28 = arith.constant 0.000000e+00 : f32
    %46 = vector.broadcast %cst_28 : f32 to vector<64x1152xf32>
    %c0_29 = arith.constant 0 : index
    %c0_30 = arith.constant 0 : index
    %47 = vector.load %arg12[%c0_29, %c0_30] : memref<64x1152xf32, #tpu.memory_space<vmem>>, vector<64x1152xf32>
    tpu.vector_store %arg12[%c0_29, %c0_30], %46 {strides = array<i32>} : memref<64x1152xf32, #tpu.memory_space<vmem>>, vector<64x1152xf32>,
    %c0_31 = arith.constant 0 : index
    %c0_32 = arith.constant 0 : index
    %c0_33 = arith.constant 0 : index
    %48 = vector.load %arg11[%c0_31, %c0_32, %c0_33] : memref<6x18x4xf32, #tpu.memory_space<vmem>>, vector<4x16x4xf32>
    %49 = vector.shape_cast %48 : vector<4x16x4xf32> to vector<64x4xf32>
    %c0_34 = arith.constant 0 : index
    %c0_35 = arith.constant 0 : index
    %50 = vector.load %arg12[%c0_34, %c0_35] : memref<64x1152xf32, #tpu.memory_space<vmem>>, vector<64x4xf32>
    tpu.vector_store %arg12[%c0_34, %c0_35], %49 {strides = array<i32>} : memref<64x1152xf32, #tpu.memory_space<vmem>>, vector<64x4xf32>,
    %c0_36 = arith.constant 0 : index
    %c1_37 = arith.constant 1 : index
    %c0_38 = arith.constant 0 : index
    %51 = vector.load %arg11[%c0_36, %c1_37, %c0_38] : memref<6x18x4xf32, #tpu.memory_space<vmem>>, vector<4x16x4xf32>
    %52 = vector.shape_cast %51 : vector<4x16x4xf32> to vector<64x4xf32>
    %c0_39 = arith.constant 0 : index
    %c128 = arith.constant 128 : index
    %53 = vector.load %arg12[%c0_39, %c128] : memref<64x1152xf32, #tpu.memory_space<vmem>>, vector<64x4xf32>
    tpu.vector_store %arg12[%c0_39, %c128], %52 {strides = array<i32>} : memref<64x1152xf32, #tpu.memory_space<vmem>>, vector<64x4xf32>,
    %c0_40 = arith.constant 0 : index
    %c2 = arith.constant 2 : index
    %c0_41 = arith.constant 0 : index
    %54 = vector.load %arg11[%c0_40, %c2, %c0_41] : memref<6x18x4xf32, #tpu.memory_space<vmem>>, vector<4x16x4xf32>
    %55 = vector.shape_cast %54 : vector<4x16x4xf32> to vector<64x4xf32>
    %c0_42 = arith.constant 0 : index
    %c256 = arith.constant 256 : index
    %56 = vector.load %arg12[%c0_42, %c256] : memref<64x1152xf32, #tpu.memory_space<vmem>>, vector<64x4xf32>
    tpu.vector_store %arg12[%c0_42, %c256], %55 {strides = array<i32>} : memref<64x1152xf32, #tpu.memory_space<vmem>>, vector<64x4xf32>,
    %c1_43 = arith.constant 1 : index
    %c0_44 = arith.constant 0 : index
    %c0_45 = arith.constant 0 : index
    %57 = vector.load %arg11[%c1_43, %c0_44, %c0_45] : memref<6x18x4xf32, #tpu.memory_space<vmem>>, vector<4x16x4xf32>
    %58 = vector.shape_cast %57 : vector<4x16x4xf32> to vector<64x4xf32>
    %c0_46 = arith.constant 0 : index
    %c384 = arith.constant 384 : index
    %59 = vector.load %arg12[%c0_46, %c384] : memref<64x1152xf32, #tpu.memory_space<vmem>>, vector<64x4xf32>
    tpu.vector_store %arg12[%c0_46, %c384], %58 {strides = array<i32>} : memref<64x1152xf32, #tpu.memory_space<vmem>>, vector<64x4xf32>,
    %c1_47 = arith.constant 1 : index
    %c1_48 = arith.constant 1 : index
    %c0_49 = arith.constant 0 : index
    %60 = vector.load %arg11[%c1_47, %c1_48, %c0_49] : memref<6x18x4xf32, #tpu.memory_space<vmem>>, vector<4x16x4xf32>
    %61 = vector.shape_cast %60 : vector<4x16x4xf32> to vector<64x4xf32>
    %c0_50 = arith.constant 0 : index
    %c512 = arith.constant 512 : index
    %62 = vector.load %arg12[%c0_50, %c512] : memref<64x1152xf32, #tpu.memory_space<vmem>>, vector<64x4xf32>
    tpu.vector_store %arg12[%c0_50, %c512], %61 {strides = array<i32>} : memref<64x1152xf32, #tpu.memory_space<vmem>>, vector<64x4xf32>,
    %c1_51 = arith.constant 1 : index
    %c2_52 = arith.constant 2 : index
    %c0_53 = arith.constant 0 : index
    %63 = vector.load %arg11[%c1_51, %c2_52, %c0_53] : memref<6x18x4xf32, #tpu.memory_space<vmem>>, vector<4x16x4xf32>
    %64 = vector.shape_cast %63 : vector<4x16x4xf32> to vector<64x4xf32>
    %c0_54 = arith.constant 0 : index
    %c640 = arith.constant 640 : index
    %65 = vector.load %arg12[%c0_54, %c640] : memref<64x1152xf32, #tpu.memory_space<vmem>>, vector<64x4xf32>
    tpu.vector_store %arg12[%c0_54, %c640], %64 {strides = array<i32>} : memref<64x1152xf32, #tpu.memory_space<vmem>>, vector<64x4xf32>,
    %c2_55 = arith.constant 2 : index
    %c0_56 = arith.constant 0 : index
    %c0_57 = arith.constant 0 : index
    %66 = vector.load %arg11[%c2_55, %c0_56, %c0_57] : memref<6x18x4xf32, #tpu.memory_space<vmem>>, vector<4x16x4xf32>
    %67 = vector.shape_cast %66 : vector<4x16x4xf32> to vector<64x4xf32>
    %c0_58 = arith.constant 0 : index
    %c768 = arith.constant 768 : index
    %68 = vector.load %arg12[%c0_58, %c768] : memref<64x1152xf32, #tpu.memory_space<vmem>>, vector<64x4xf32>
    tpu.vector_store %arg12[%c0_58, %c768], %67 {strides = array<i32>} : memref<64x1152xf32, #tpu.memory_space<vmem>>, vector<64x4xf32>,
    %c2_59 = arith.constant 2 : index
    %c1_60 = arith.constant 1 : index
    %c0_61 = arith.constant 0 : index
    %69 = vector.load %arg11[%c2_59, %c1_60, %c0_61] : memref<6x18x4xf32, #tpu.memory_space<vmem>>, vector<4x16x4xf32>
    %70 = vector.shape_cast %69 : vector<4x16x4xf32> to vector<64x4xf32>
    %c0_62 = arith.constant 0 : index
    %c896 = arith.constant 896 : index
    %71 = vector.load %arg12[%c0_62, %c896] : memref<64x1152xf32, #tpu.memory_space<vmem>>, vector<64x4xf32>
    tpu.vector_store %arg12[%c0_62, %c896], %70 {strides = array<i32>} : memref<64x1152xf32, #tpu.memory_space<vmem>>, vector<64x4xf32>,
    %c2_63 = arith.constant 2 : index
    %c2_64 = arith.constant 2 : index
    %c0_65 = arith.constant 0 : index
    %72 = vector.load %arg11[%c2_63, %c2_64, %c0_65] : memref<6x18x4xf32, #tpu.memory_space<vmem>>, vector<4x16x4xf32>
    %73 = vector.shape_cast %72 : vector<4x16x4xf32> to vector<64x4xf32>
    %c0_66 = arith.constant 0 : index
    %c1024 = arith.constant 1024 : index
    %74 = vector.load %arg12[%c0_66, %c1024] : memref<64x1152xf32, #tpu.memory_space<vmem>>, vector<64x4xf32>
    tpu.vector_store %arg12[%c0_66, %c1024], %73 {strides = array<i32>} : memref<64x1152xf32, #tpu.memory_space<vmem>>, vector<64x4xf32>,
    %c0_67 = arith.constant 0 : index
    %c0_68 = arith.constant 0 : index
    %75 = vector.load %arg12[%c0_67, %c0_68] : memref<64x1152xf32, #tpu.memory_space<vmem>>, vector<64x1152xf32>
    %76 = arith.truncf %75 : vector<64x1152xf32> to vector<64x1152xbf16>
    %c0_69 = arith.constant 0 : index
    %c0_70 = arith.constant 0 : index
    %77 = vector.load %arg7[%c0_69, %c0_70] : memref<1152x4xbf16, #tpu.memory_space<vmem>>, vector<1152x4xbf16>
    %cst_71 = arith.constant dense<0.000000e+00> : vector<64x4xf32>
    %78 = tpu.matmul %76, %77, %cst_71 {dimension_numbers = #tpu.dot_dimension_numbers<[1], [0], [0], [1], [0, 0, 1, 1], [], []>} : vector<64x1152xbf16>, vector<1152x4xbf16>, vector<64x4xf32> -> vector<64x4xf32>
    %79 = vector.shape_cast %78 : vector<64x4xf32> to vector<1x4x16x4xf32>
    %80 = arith.truncf %79 : vector<1x4x16x4xf32> to vector<1x4x16x4xbf16>
    %c0_72 = arith.constant 0 : index
    %c0_73 = arith.constant 0 : index
    %c0_74 = arith.constant 0 : index
    %c0_75 = arith.constant 0 : index
    %81 = vector.load %arg8[%c0_72, %c0_73, %c0_74, %c0_75] : memref<1x4x16x4xbf16, #tpu.memory_space<vmem>>, vector<1x4x16x4xbf16>
    tpu.vector_store %arg8[%c0_72, %c0_73, %c0_74, %c0_75], %80 {strides = array<i32>} : memref<1x4x16x4xbf16, #tpu.memory_space<vmem>>, vector<1x4x16x4xbf16>,
    %cst_76 = arith.constant dense<0.000000e+00> : vector<4xf32>
    %82 = vector.multi_reduction <add>, %78, %cst_76 [0] : vector<64x4xf32> to vector<4xf32>
    %83 = vector.shape_cast %82 : vector<4xf32> to vector<1x1x1x4xf32>
    %c0_77 = arith.constant 0 : index
    %c0_78 = arith.constant 0 : index
    %c0_79 = arith.constant 0 : index
    %c0_80 = arith.constant 0 : index
    %84 = vector.load %arg9[%c0_77, %c0_78, %c0_79, %c0_80] : memref<1x1x1x4xf32, #tpu.memory_space<vmem>>, vector<1x1x1x4xf32>
    tpu.vector_store %arg9[%c0_77, %c0_78, %c0_79, %c0_80], %83 {strides = array<i32>} : memref<1x1x1x4xf32, #tpu.memory_space<vmem>>, vector<1x1x1x4xf32>,
    %85 = arith.mulf %78, %78 : vector<64x4xf32>
    %cst_81 = arith.constant dense<0.000000e+00> : vector<4xf32>
    %86 = vector.multi_reduction <add>, %85, %cst_81 [0] : vector<64x4xf32> to vector<4xf32>
    %87 = vector.shape_cast %86 : vector<4xf32> to vector<1x1x1x4xf32>
    %c0_82 = arith.constant 0 : index
    %c0_83 = arith.constant 0 : index
    %c0_84 = arith.constant 0 : index
    %c0_85 = arith.constant 0 : index
    %88 = vector.load %arg10[%c0_82, %c0_83, %c0_84, %c0_85] : memref<1x1x1x4xf32, #tpu.memory_space<vmem>>, vector<1x1x1x4xf32>
    tpu.vector_store %arg10[%c0_82, %c0_83, %c0_84, %c0_85], %87 {strides = array<i32>} : memref<1x1x1x4xf32, #tpu.memory_space<vmem>>, vector<1x1x1x4xf32>,
    return
  }
  func.func @transform_0(%arg0: i32, %arg1: i32) -> (i32, i32, i32, i32) {
    %c0_i32 = arith.constant 0 : i32
    %c0_i32_0 = arith.constant 0 : i32
    %c0_i32_1 = arith.constant 0 : i32
    return %arg0, %arg1, %c0_i32, %c0_i32_0 : i32, i32, i32, i32
  }
  func.func @transform_1(%arg0: i32, %arg1: i32) -> (i32, i32, i32, i32) {
    %c4_i32 = arith.constant 4 : i32
    %0 = arith.muli %arg1, %c4_i32 : i32
    %c1_i32 = arith.constant 1 : i32
    %1 = arith.subi %0, %c1_i32 : i32
    %c0_i32 = arith.constant 0 : i32
    %2 = arith.maxsi %1, %c0_i32 : i32
    %c0_i32_0 = arith.constant 0 : i32
    %c0_i32_1 = arith.constant 0 : i32
    %c0_i32_2 = arith.constant 0 : i32
    return %arg0, %2, %c0_i32_0, %c0_i32_1 : i32, i32, i32, i32
  }
  func.func @transform_2(%arg0: i32, %arg1: i32) -> (i32, i32, i32, i32) {
    %c1_i32 = arith.constant 1 : i32
    %0 = arith.addi %arg1, %c1_i32 : i32
    %c4_i32 = arith.constant 4 : i32
    %1 = arith.muli %0, %c4_i32 : i32
    %c15_i32 = arith.constant 15 : i32
    %2 = arith.minsi %1, %c15_i32 : i32
    %c0_i32 = arith.constant 0 : i32
    %c0_i32_0 = arith.constant 0 : i32
    %c0_i32_1 = arith.constant 0 : i32
    return %arg0, %2, %c0_i32, %c0_i32_0 : i32, i32, i32, i32
  }
  func.func @transform_3(%arg0: i32, %arg1: i32) -> (i32, i32) {
    %c0_i32 = arith.constant 0 : i32
    %c0_i32_0 = arith.constant 0 : i32
    %c0_i32_1 = arith.constant 0 : i32
    return %c0_i32, %c0_i32_0 : i32, i32
  }
  func.func @transform_4(%arg0: i32, %arg1: i32) -> (i32, i32) {
    %c0_i32 = arith.constant 0 : i32
    %c0_i32_0 = arith.constant 0 : i32
    %c0_i32_1 = arith.constant 0 : i32
    return %c0_i32, %c0_i32_0 : i32, i32
  }
  func.func @transform_5(%arg0: i32, %arg1: i32) -> (i32, i32) {
    %c0_i32 = arith.constant 0 : i32
    %c0_i32_0 = arith.constant 0 : i32
    %c0_i32_1 = arith.constant 0 : i32
    return %c0_i32, %c0_i32_0 : i32, i32
  }
  func.func @transform_6(%arg0: i32, %arg1: i32) -> (i32, i32, i32, i32) {
    %c0_i32 = arith.constant 0 : i32
    %c0_i32_0 = arith.constant 0 : i32
    %c0_i32_1 = arith.constant 0 : i32
    return %arg0, %arg1, %c0_i32, %c0_i32_0 : i32, i32, i32, i32
  }
  func.func @transform_7(%arg0: i32, %arg1: i32) -> (i32, i32, i32, i32) {
    %c0_i32 = arith.constant 0 : i32
    %c0_i32_0 = arith.constant 0 : i32
    %c0_i32_1 = arith.constant 0 : i32
    return %arg0, %arg1, %c0_i32, %c0_i32_0 : i32, i32, i32, i32
  }
  func.func @transform_8(%arg0: i32, %arg1: i32) -> (i32, i32, i32, i32) {
    %c0_i32 = arith.constant 0 : i32
    %c0_i32_0 = arith.constant 0 : i32
    %c0_i32_1 = arith.constant 0 : i32
    return %arg0, %arg1, %c0_i32, %c0_i32_0 : i32, i32, i32, i32
  }
}

module attributes {stable_mosaic.version = 11 : i64} {
  func.func @_bn_add_relu_kernel(%arg0: i32, %arg1: memref<16x128xbf16, #tpu.memory_space<vmem>>, %arg2: memref<16x128xbf16, #tpu.memory_space<vmem>>, %arg3: memref<1x128xf32, #tpu.memory_space<vmem>>, %arg4: memref<1x128xf32, #tpu.memory_space<vmem>>, %arg5: memref<16x128xf32, #tpu.memory_space<vmem>>) attributes {dimension_semantics = [#tpu.dimension_semantics<parallel>], iteration_bounds = array<i64: 1>, scalar_prefetch = 0 : i64, scratch_operands = 0 : i64, tpu.core_type = #tpu.core_type<tc>, window_params = [{transform_indices = @transform_0, window_bounds = array<i64: 16, 128>}, {transform_indices = @transform_1, window_bounds = array<i64: 16, 128>}, {pipeline_mode = #tpu.pipeline_mode<synchronous>, transform_indices = @transform_2, window_bounds = array<i64: 1, 128>}, {pipeline_mode = #tpu.pipeline_mode<synchronous>, transform_indices = @transform_3, window_bounds = array<i64: 1, 128>}, {transform_indices = @transform_4, window_bounds = array<i64: 16, 128>}]} {
    %c0 = arith.constant 0 : index
    %c0_0 = arith.constant 0 : index
    %0 = vector.load %arg1[%c0, %c0_0] : memref<16x128xbf16, #tpu.memory_space<vmem>>, vector<16x128xbf16>
    %1 = arith.extf %0 : vector<16x128xbf16> to vector<16x128xf32>
    %c0_1 = arith.constant 0 : index
    %c0_2 = arith.constant 0 : index
    %2 = vector.load %arg2[%c0_1, %c0_2] : memref<16x128xbf16, #tpu.memory_space<vmem>>, vector<16x128xbf16>
    %3 = arith.extf %2 : vector<16x128xbf16> to vector<16x128xf32>
    %c0_3 = arith.constant 0 : index
    %c0_4 = arith.constant 0 : index
    %4 = vector.load %arg3[%c0_3, %c0_4] : memref<1x128xf32, #tpu.memory_space<vmem>>, vector<1x128xf32>
    %5 = vector.broadcast %4 : vector<1x128xf32> to vector<16x128xf32>
    %6 = arith.mulf %1, %5 : vector<16x128xf32>
    %c0_5 = arith.constant 0 : index
    %c0_6 = arith.constant 0 : index
    %7 = vector.load %arg4[%c0_5, %c0_6] : memref<1x128xf32, #tpu.memory_space<vmem>>, vector<1x128xf32>
    %8 = vector.broadcast %7 : vector<1x128xf32> to vector<16x128xf32>
    %9 = arith.addf %6, %8 : vector<16x128xf32>
    %10 = arith.addf %9, %3 : vector<16x128xf32>
    %cst = arith.constant 0.000000e+00 : f32
    %11 = vector.broadcast %cst : f32 to vector<16x128xf32>
    %12 = arith.maximumf %10, %11 : vector<16x128xf32>
    %c0_7 = arith.constant 0 : index
    %c0_8 = arith.constant 0 : index
    %13 = vector.load %arg5[%c0_7, %c0_8] : memref<16x128xf32, #tpu.memory_space<vmem>>, vector<16x128xf32>
    tpu.vector_store %arg5[%c0_7, %c0_8], %12 {strides = array<i32>} : memref<16x128xf32, #tpu.memory_space<vmem>>, vector<16x128xf32>,
    return
  }
  func.func @transform_0(%arg0: i32) -> (i32, i32) {
    %c0_i32 = arith.constant 0 : i32
    %c0_i32_0 = arith.constant 0 : i32
    return %arg0, %c0_i32 : i32, i32
  }
  func.func @transform_1(%arg0: i32) -> (i32, i32) {
    %c0_i32 = arith.constant 0 : i32
    %c0_i32_0 = arith.constant 0 : i32
    return %arg0, %c0_i32 : i32, i32
  }
  func.func @transform_2(%arg0: i32) -> (i32, i32) {
    %c0_i32 = arith.constant 0 : i32
    %c0_i32_0 = arith.constant 0 : i32
    %c0_i32_1 = arith.constant 0 : i32
    return %c0_i32, %c0_i32_0 : i32, i32
  }
  func.func @transform_3(%arg0: i32) -> (i32, i32) {
    %c0_i32 = arith.constant 0 : i32
    %c0_i32_0 = arith.constant 0 : i32
    %c0_i32_1 = arith.constant 0 : i32
    return %c0_i32, %c0_i32_0 : i32, i32
  }
  func.func @transform_4(%arg0: i32) -> (i32, i32) {
    %c0_i32 = arith.constant 0 : i32
    %c0_i32_0 = arith.constant 0 : i32
    return %arg0, %c0_i32 : i32, i32
  }
}

</mosaic_0001>

<bundles_post_ra>
// kernel: tile.10
= control target key start
LH: loop header
LB: loop body
LE: loop exit
PB: predicated region body
PF: predicated region fallthrough
CT: control target
= control target key end

     0   :  { %s40_s0 = inlined_call_operand.vmem [shape: f32[4], index: 0, kind: input, shape index: {}]   ;;  %s41_s1 = inlined_call_operand.vmem [shape: f32[32,4], index: 1, kind: output, shape index: {}]  }
   0x1   :  { %v4_v0 = vld [vmem:[%s40_s0] ss:$0 sm:$0xff] }
   0x2   :  { %5 = vst [vmem:[%s41_s1] sm:$0xff] %v4_v0  ;;  %12 = vst [vmem:[%s41_s1 + $0x8] sm:$0xff] %v4_v0 }
   0x3   :  { %13 = vst [vmem:[%s41_s1 + $0x10] sm:$0xff] %v4_v0  ;;  %14 = vst [vmem:[%s41_s1 + $0x18] sm:$0xff] %v4_v0 }

// kernel: tile.11
= control target key start
LH: loop header
LB: loop body
LE: loop exit
PB: predicated region body
PF: predicated region fallthrough
CT: control target
= control target key end

     0   :  { %s259_s10 = smov 124   ;;  %s260_s11 = smov 116   ;;  %vm3_vm0 = vcmask 31744   ;;  %vm9_vm1 = vcmask 1048544   ;;  %vm15_vm2 = vcmask 1015744   ;;  %vm21_vm3 = vcmask 982944   ;;  %s399_s0 = inlined_call_operand.vmem [shape: f32[32,4], index: 0, kind: input, shape index: {}]   ;;  %s400_s1 = inlined_call_operand.vmem [shape: f32[1,128], index: 1, kind: output, shape index: {}]  }
   0x1   :  { %v197_v0 = vld [vmem:[%s399_s0 + $0x1f] sm:$0x1]   ;;  %v199_v1 = vld [vmem:[%s399_s0 + $0x1d] sm:$0x1]   ;;  %v198_v2 = vld [vmem:[%s399_s0 + $0x1e] sm:$0x1]  }
   0x2   :  { %7 = vrot.lane.b32.xlu0 %v197_v0, %s259_s10  ;;  %19 = vrot.lane.b32.xlu1 %v199_v1, %s260_s11  ;;  %v200_v3 = vld [vmem:[%s399_s0 + $0x1c] sm:$0x1]   ;;  %s261_s16 = smov 120   ;;  %s262_s17 = smov 112   ;;  %v201_v4 = vld [vmem:[%s399_s0 + $0x1b] sm:$0x1]  }
   0x3   :  { %v202_v5 = vld [vmem:[%s399_s0 + $0x1a] sm:$0x1]   ;;  %s263_s22 = smov 108   ;;  %s264_s23 = smov 104   ;;  %v203_v6 = vld [vmem:[%s399_s0 + $0x19] sm:$0x1]  }
   0x4   :  { %v204_v7 = vld [vmem:[%s399_s0 + $0x18] sm:$0x1]   ;;  %s265_s28 = smov 100   ;;  %s266_s29 = smov 96   ;;  %v205_v8 = vld [vmem:[%s399_s0 + $0x17] sm:$0x1]  }
   0x5   :  { %v206_v9 = vld [vmem:[%s399_s0 + $0x16] sm:$0x1]   ;;  %v2_v10 = vld [vmem:[%s399_s0] sm:$0x1]   ;;  %s267_s7 = smov 92   ;;  %s268_s8 = smov 88  }
   0x6   :  { %13 = vrot.lane.b32.xlu0 %v198_v2, %s261_s16  ;;  %25 = vrot.lane.b32.xlu1 %v200_v3, %s262_s17  ;;  %4 = vst.msk [vmem:[#allocation0] sm:$0x1] %vm3_vm0, %v2_v10   ;;  %v207_v11 = vld [vmem:[%s399_s0 + $0x15] sm:$0x1]   ;;  %v208_v12 = vld [vmem:[%s399_s0 + $0x14] sm:$0x1]  }
   0x7   :  { %s269_s13 = smov 84   ;;  %s270_s14 = smov 80   ;;  %v209_v13 = vld [vmem:[%s399_s0 + $0x13] sm:$0x1]   ;;  %v210_v14 = vld [vmem:[%s399_s0 + $0x12] sm:$0x1]  }
   0x8   :  { %s271_s19 = smov 76   ;;  %s272_s20 = smov 72   ;;  %v211_v15 = vld [vmem:[%s399_s0 + $0x11] sm:$0x1]   ;;  %v212_v16 = vld [vmem:[%s399_s0 + $0x10] sm:$0x1]  }
   0x9   :  { %s273_s25 = smov 68   ;;  %s274_s26 = smov 64   ;;  %v213_v17 = vld [vmem:[%s399_s0 + $0xf] sm:$0x1]   ;;  %v214_v18 = vld [vmem:[%s399_s0 + $0xe] sm:$0x1]  }
   0xa   :  { %31 = vrot.lane.b32.xlu0 %v201_v4, %s263_s22  ;;  %37 = vrot.lane.b32.xlu1 %v202_v5, %s264_s23  ;;  %s275_s2 = smov 60   ;;  %s276_s3 = smov 56   ;;  %v215_v19 = vld [vmem:[%s399_s0 + $0xd] sm:$0x1]   ;;  %v216_v20 = vld [vmem:[%s399_s0 + $0xc] sm:$0x1]  }
   0xb   :  { %s278_s9 = smov 48   ;;  %v217_v21 = vld [vmem:[%s399_s0 + $0xb] sm:$0x1]   ;;  %v218_v22 = vld [vmem:[%s399_s0 + $0xa] sm:$0x1]   ;;  %s280_s15 = smov 40  }
   0xc   :  { %v219_v23 = vld [vmem:[%s399_s0 + $0x9] sm:$0x1]   ;;  %v220_v24 = vld [vmem:[%s399_s0 + $0x8] sm:$0x1]   ;;  %s282_s21 = smov 32   ;;  %s284_s27 = smov 24  }
   0xd   :  { %v221_v25 = vld [vmem:[%s399_s0 + $0x7] sm:$0x1]   ;;  %v222_v26 = vld [vmem:[%s399_s0 + $0x6] sm:$0x1]   ;;  %v223_v27 = vld [vmem:[%s399_s0 + $0x5] sm:$0x1]  }
   0xe   :  { %43 = vrot.lane.b32.xlu0 %v203_v6, %s265_s28  ;;  %49 = vrot.lane.b32.xlu1 %v204_v7, %s266_s29  ;;  %v224_v28 = vld [vmem:[%s399_s0 + $0x4] sm:$0x1]   ;;  %s286_s4 = smov 16   ;;  %v225_v29 = vld [vmem:[%s399_s0 + $0x3] sm:$0x1]   ;;  %s288_s10 = smov 8  }
   0xf   :  { %v226_v30 = vld [vmem:[%s399_s0 + $0x2] sm:$0x1]   ;;  %v227_v31 = vld [vmem:[%s399_s0 + $0x1] sm:$0x1]   ;;  %s289_s0 = smov 4   ;;  %vm27_vm4 = vcmask 950144  }
  0x10   :  { %vm33_vm5 = vcmask 917344   ;;  %vm39_vm6 = vcmask 884544   ;;  %vm45_vm7 = vcmask 851744   ;;  %vm51_vm8 = vcmask 818944  }
  0x11   :  { %vm57_vm9 = vcmask 786144   ;;  %vm63_vm10 = vcmask 753344   ;;  %vm69_vm11 = vcmask 720544   ;;  %vm75_vm12 = vcmask 687744  }
  0x12   :  { %55 = vrot.lane.b32.xlu0 %v205_v8, %s267_s7  ;;  %61 = vrot.lane.b32.xlu1 %v206_v9, %s268_s8  ;;  %s277_s8 = smov 52   ;;  %vm81_vm13 = vcmask 654944   ;;  %vm87_vm14 = vcmask 622144   ;;  %vm93_vm15 = vcmask 589344   ;;  %vm99_vm0 = vcmask 556544  }
  0x16   :  { %67 = vrot.lane.b32.xlu0 %v207_v11, %s269_s13  ;;  %73 = vrot.lane.b32.xlu1 %v208_v12, %s270_s14  ;;  %s279_s14 = smov 44  }
  0x1a   :  { %79 = vrot.lane.b32.xlu0 %v209_v13, %s271_s19  ;;  %85 = vrot.lane.b32.xlu1 %v210_v14, %s272_s20  ;;  %s281_s20 = smov 36  }
  0x1e   :  { %91 = vrot.lane.b32.xlu0 %v211_v15, %s273_s25  ;;  %97 = vrot.lane.b32.xlu1 %v212_v16, %s274_s26  ;;  %s283_s26 = smov 28  }
  0x22   :  { %103 = vrot.lane.b32.xlu0 %v213_v17, %s275_s2  ;;  %109 = vrot.lane.b32.xlu1 %v214_v18, %s276_s3  ;;  %s285_s3 = smov 20  }
  0x26   :  { %115 = vrot.lane.b32.xlu0 %v215_v19, %s277_s8  ;;  %121 = vrot.lane.b32.xlu1 %v216_v20, %s278_s9  ;;  %s287_s9 = smov 12  }
  0x2a   :  { %127 = vrot.lane.b32.xlu0 %v217_v21, %s279_s14  ;;  %133 = vrot.lane.b32.xlu1 %v218_v22, %s280_s15 }
  0x2e   :  { %139 = vrot.lane.b32.xlu0 %v219_v23, %s281_s20  ;;  %145 = vrot.lane.b32.xlu1 %v220_v24, %s282_s21 }
  0x32   :  { %151 = vrot.lane.b32.xlu0 %v221_v25, %s283_s26  ;;  %157 = vrot.lane.b32.xlu1 %v222_v26, %s284_s27 }
  0x36   :  { %163 = vrot.lane.b32.xlu0 %v223_v27, %s285_s3  ;;  %169 = vrot.lane.b32.xlu1 %v224_v28, %s286_s4 }
  0x3a   :  { %175 = vrot.lane.b32.xlu0 %v225_v29, %s287_s9  ;;  %181 = vrot.lane.b32.xlu1 %v226_v30, %s288_s10 }
  0x3e   :  { %187 = vrot.lane.b32.xlu0 %v227_v31, %s289_s0 }
  0x74   :  { %v8_v32 = vpop.permute.xlu0 %7   ;;  %v20_v33 = vpop.permute.xlu1 %19  }
  0x75   :  { %10 = vst.msk [vmem:[#allocation0] sm:$0x1] %vm9_vm1, %v8_v32   ;;  %vm105_vm1 = vcmask 523744  }
  0x78   :  { %v14_v34 = vpop.permute.xlu0 %13   ;;  %v26_v35 = vpop.permute.xlu1 %25  }
  0x79   :  { %16 = vst.msk [vmem:[#allocation0] sm:$0x1] %vm15_vm2, %v14_v34   ;;  %vm111_vm2 = vcmask 490944  }
  0x7a   :  { %22 = vst.msk [vmem:[#allocation0] sm:$0x1] %vm21_vm3, %v20_v33   ;;  %vm117_vm3 = vcmask 458144  }
  0x7b   :  { %28 = vst.msk [vmem:[#allocation0] sm:$0x1] %vm27_vm4, %v26_v35   ;;  %vm123_vm4 = vcmask 425344  }
  0x7c   :  { %v32_v36 = vpop.permute.xlu0 %31   ;;  %v38_v37 = vpop.permute.xlu1 %37  }
  0x7d   :  { %34 = vst.msk [vmem:[#allocation0] sm:$0x1] %vm33_vm5, %v32_v36   ;;  %vm129_vm5 = vcmask 392544  }
  0x7e   :  { %40 = vst.msk [vmem:[#allocation0] sm:$0x1] %vm39_vm6, %v38_v37   ;;  %vm135_vm6 = vcmask 359744  }
  0x80   :  { %v44_v38 = vpop.permute.xlu0 %43   ;;  %v50_v39 = vpop.permute.xlu1 %49  }
  0x81   :  { %46 = vst.msk [vmem:[#allocation0] sm:$0x1] %vm45_vm7, %v44_v38   ;;  %vm141_vm7 = vcmask 326944  }
  0x82   :  { %52 = vst.msk [vmem:[#allocation0] sm:$0x1] %vm51_vm8, %v50_v39   ;;  %vm147_vm8 = vcmask 294144  }
  0x84   :  { %v56_v40 = vpop.permute.xlu0 %55   ;;  %v62_v41 = vpop.permute.xlu1 %61  }
  0x85   :  { %58 = vst.msk [vmem:[#allocation0] sm:$0x1] %vm57_vm9, %v56_v40   ;;  %vm153_vm9 = vcmask 261344  }
  0x86   :  { %64 = vst.msk [vmem:[#allocation0] sm:$0x1] %vm63_vm10, %v62_v41   ;;  %vm159_vm10 = vcmask 228544  }
  0x88   :  { %v68_v42 = vpop.permute.xlu0 %67   ;;  %v74_v43 = vpop.permute.xlu1 %73  }
  0x89   :  { %70 = vst.msk [vmem:[#allocation0] sm:$0x1] %vm69_vm11, %v68_v42   ;;  %vm165_vm11 = vcmask 195744  }
  0x8a   :  { %76 = vst.msk [vmem:[#allocation0] sm:$0x1] %vm75_vm12, %v74_v43   ;;  %vm171_vm12 = vcmask 162944  }
  0x8c   :  { %v80_v44 = vpop.permute.xlu0 %79   ;;  %v86_v45 = vpop.permute.xlu1 %85  }
  0x8d   :  { %82 = vst.msk [vmem:[#allocation0] sm:$0x1] %vm81_vm13, %v80_v44   ;;  %vm177_vm13 = vcmask 130144  }
  0x8e   :  { %88 = vst.msk [vmem:[#allocation0] sm:$0x1] %vm87_vm14, %v86_v45   ;;  %vm183_vm14 = vcmask 97344  }
  0x90   :  { %v92_v46 = vpop.permute.xlu0 %91   ;;  %v98_v47 = vpop.permute.xlu1 %97  }
  0x91   :  { %94 = vst.msk [vmem:[#allocation0] sm:$0x1] %vm93_vm15, %v92_v46   ;;  %vm189_vm15 = vcmask 64544  }
  0x92   :  { %100 = vst.msk [vmem:[#allocation0] sm:$0x1] %vm99_vm0, %v98_v47  }
  0x94   :  { %v104_v48 = vpop.permute.xlu0 %103   ;;  %v110_v49 = vpop.permute.xlu1 %109  }
  0x95   :  { %106 = vst.msk [vmem:[#allocation0] sm:$0x1] %vm105_vm1, %v104_v48  }
  0x96   :  { %112 = vst.msk [vmem:[#allocation0] sm:$0x1] %vm111_vm2, %v110_v49  }
  0x98   :  { %v116_v50 = vpop.permute.xlu0 %115   ;;  %v122_v51 = vpop.permute.xlu1 %121  }
  0x99   :  { %118 = vst.msk [vmem:[#allocation0] sm:$0x1] %vm117_vm3, %v116_v50  }
  0x9a   :  { %124 = vst.msk [vmem:[#allocation0] sm:$0x1] %vm123_vm4, %v122_v51  }
  0x9c   :  { %v128_v52 = vpop.permute.xlu0 %127   ;;  %v134_v53 = vpop.permute.xlu1 %133  }
  0x9d   :  { %130 = vst.msk [vmem:[#allocation0] sm:$0x1] %vm129_vm5, %v128_v52  }
  0x9e   :  { %136 = vst.msk [vmem:[#allocation0] sm:$0x1] %vm135_vm6, %v134_v53  }
  0xa0   :  { %v140_v54 = vpop.permute.xlu0 %139   ;;  %v146_v55 = vpop.permute.xlu1 %145  }
  0xa1   :  { %142 = vst.msk [vmem:[#allocation0] sm:$0x1] %vm141_vm7, %v140_v54  }
  0xa2   :  { %148 = vst.msk [vmem:[#allocation0] sm:$0x1] %vm147_vm8, %v146_v55  }
  0xa4   :  { %v152_v56 = vpop.permute.xlu0 %151   ;;  %v158_v57 = vpop.permute.xlu1 %157  }
  0xa5   :  { %154 = vst.msk [vmem:[#allocation0] sm:$0x1] %vm153_vm9, %v152_v56  }
  0xa6   :  { %160 = vst.msk [vmem:[#allocation0] sm:$0x1] %vm159_vm10, %v158_v57  }
  0xa8   :  { %v164_v58 = vpop.permute.xlu0 %163   ;;  %v170_v59 = vpop.permute.xlu1 %169  }
  0xa9   :  { %166 = vst.msk [vmem:[#allocation0] sm:$0x1] %vm165_vm11, %v164_v58  }
  0xaa   :  { %172 = vst.msk [vmem:[#allocation0] sm:$0x1] %vm171_vm12, %v170_v59  }
  0xac   :  { %v176_v60 = vpop.permute.xlu0 %175   ;;  %v182_v61 = vpop.permute.xlu1 %181  }
  0xad   :  { %178 = vst.msk [vmem:[#allocation0] sm:$0x1] %vm177_vm13, %v176_v60  }
  0xae   :  { %184 = vst.msk [vmem:[#allocation0] sm:$0x1] %vm183_vm14, %v182_v61  }
  0xb0   :  { %v188_v62 = vpop.permute.xlu0 %187  }
  0xb1   :  { %190 = vst.msk [vmem:[#allocation0] sm:$0x1] %vm189_vm15, %v188_v62  }
  0xb8   :  { %v194_v63 = vld [vmem:[#allocation0] sm:$0x1] }
  0xb9   :  { %196 = vst [vmem:[%s400_s1] sm:$0x1] %v194_v63 }

// kernel: resblock_forward.5
= control target key start
LH: loop header
LB: loop body
LE: loop exit
PB: predicated region body
PF: predicated region fallthrough
CT: control target
= control target key end

     0   :  { %s106_s0 = inlined_call_operand.vmem [shape: bf16[16,128], index: 0, kind: input, shape index: {}]   ;;  %s107_s1 = inlined_call_operand.vmem [shape: bf16[16,128], index: 1, kind: input, shape index: {}]   ;;  %s108_s2 = inlined_call_operand.vmem [shape: f32[1,128], index: 2, kind: input, shape index: {}]   ;;  %s109_s3 = inlined_call_operand.vmem [shape: f32[1,128], index: 3, kind: input, shape index: {}]   ;;  %s110_s4 = inlined_call_operand.vmem [shape: f32[16,128], index: 4, kind: output, shape index: {}]  }
   0x1   :  { %v56_v0 = vld [vmem:[%s106_s0] sm:$0xff]  }
   0x2   :  { %v60_v1 = vld [vmem:[%s107_s1] sm:$0xff]   ;;  %v57_v3 = vunpack.c.l.bf16 %v56_v0  ;;  %v58_v4 = vunpack.c.h.bf16 %v56_v0 }
   0x3   :  { %v53_v2 = vld [vmem:[%s108_s2] ss:$0 sm:$0xff]  ;;  %v61_v6 = vunpack.c.l.bf16 %v60_v1  ;;  %v62_v8 = vunpack.c.h.bf16 %v60_v1 }
   0x4   :  { %v54_v5 = vld [vmem:[%s109_s3] ss:$0 sm:$0xff]  ;;  %v32_v7 = vmul.f32 %v57_v3, %v53_v2  ;;  %v33_v9 = vmul.f32 %v58_v4, %v53_v2 }
   0x6   :  { %v41_v10 = vadd.f32 %v54_v5, %v32_v7  ;;  %v42_v11 = vadd.f32 %v54_v5, %v33_v9 }
   0x8   :  { %v43_v12 = vadd.f32 %v61_v6, %v41_v10  ;;  %v44_v13 = vadd.f32 %v62_v8, %v42_v11 }
   0xa   :  { %v45_v14 = vmax.f32 %v43_v12, 0.0  ;;  %v46_v15 = vmax.f32 %v44_v13, 0.0 }
   0xc   :  { %47 = vst [vmem:[%s110_s4] sm:$0xff] %v45_v14  ;;  %48 = vst [vmem:[%s110_s4 + $0x8] sm:$0xff] %v46_v15 }

// kernel: resblock_forward.4
= control target key start
LH: loop header
LB: loop body
LE: loop exit
PB: predicated region body
PF: predicated region fallthrough
CT: control target
= control target key end

     0   :  { %s2751_s27 = smov 0   ;;  %s2753_s28 = smov 0   ;;  %s3399_s0 = inlined_call_operand.vmem [shape: bf16[2,16,16,4], index: 0, kind: input, shape index: {}, may-alias: {0,1,2}]   ;;  %s3400_s1 = inlined_call_operand.vmem [shape: bf16[2,16,16,4], index: 1, kind: input, shape index: {}, may-alias: {0,1,2}]   ;;  %s3401_s2 = inlined_call_operand.vmem [shape: bf16[2,16,16,4], index: 2, kind: input, shape index: {}, may-alias: {0,1,2}]   ;;  %s3402_s3 = inlined_call_operand.vmem [shape: f32[1,4], index: 3, kind: input, shape index: {}]   ;;  %s3403_s4 = inlined_call_operand.vmem [shape: f32[1,4], index: 4, kind: input, shape index: {}]   ;;  %s3404_s5 = inlined_call_operand.vmem [shape: bf16[1152,4], index: 5, kind: input, shape index: {}]   ;;  %s3405_s6 = inlined_call_operand.vmem [shape: bf16[2,16,16,4], index: 6, kind: output, shape index: {0}]   ;;  %s3406_s7 = inlined_call_operand.vmem [shape: f32[2,4,1,4], index: 7, kind: output, shape index: {1}]   ;;  %s3407_s8 = inlined_call_operand.vmem [shape: f32[2,4,1,4], index: 8, kind: output, shape index: {2}]  }
   0x1   :  { %s2755_s29 = smov 0   ;;  %s2757_s30 = smov 0  }
   0x2   :  { %s2759_s9 = smov 0  }
   0x3 LB: > { %s28_s10 = sadd.s32 1, %s2695_s29  ;;  %s31_s11 = sadd.s32 1, %s2699_s30  ;;  %s2703_s9 = sphi %s2759_s9, %s19_s9   ;;  %s2699_s30 = sphi %s2757_s30, %s3417_s30   ;;  %s2695_s29 = sphi %s2755_s29, %s3416_s29   ;;  %s2691_s28 = sphi %s2753_s28, %s3415_s28   ;;  %s2687_s27 = sphi %s2751_s27, %s3414_s27  }
   0x4   : > { %p29_p0 = scmp.ge.s32.totalorder %s28_s10, 4  ;;  %p2185_p1 = scmp.ge.s32.totalorder %s2703_s9, 1 }
   0x5   : > { %p357_p2 = scmp.lt.s32.totalorder %s2703_s9, 9 }
   0x6   : > { %s3419_s10 = smov (%p29_p0, %s28_s10), 0  ;;  %s3421_s11 = smov (!%p29_p0, %s31_s11), %s2699_s30 }
   0x7   : > { %p358_p3 = pnand %p2185_p1, %p357_p2  ;;  %p33_p4 = scmp.ge.s32.totalorder %s3421_s11, 2 }
   0x8   : > { %v2593_v0 = vld [vmem:[%s3404_s5 + $0x40] sm:$0xff] (!%p358_p3)   ;;  %p442_p5 = scmp.lt.s32.totalorder (!%p358_p3), %s2691_s28, 1  ;;  %s2799_s20 = sshll.u32 (!%p358_p3), %s2687_s27, 2  ;;  %v2597_v4 = vld [vmem:[%s3404_s5 + $0x48] sm:$0xff] (!%p358_p3)   ;;  %vm598_vm0 = vcmask (!%p358_p3), 31744   ;;  %v2601_v8 = vld [vmem:[%s3404_s5 + $0x50] sm:$0xff] (!%p358_p3)  }
   0x9   : > { %s3423_s11 = smov (%p33_p4, %s3421_s11), 0  ;;  %361 = sbr.rel (%p358_p3) target bundleno = 394 (0x18a), region = 44 }
   0xa   : > { %3408 = sst [smem:[#allocation4_spill]] %s3423_s11  ;;  %v2594_v1 = vld [vmem:[%s3404_s5 + $0xc0] sm:$0xff] (!%p358_p3)   ;;  %2340 = vmatprep.subr.bf16.mxu0 (!%p358_p3), %v2593_v0  ;;  %p444_p6 = scmp.lt.s32.totalorder (!%p358_p3), %s2799_s20, 15  ;;  %v2598_v5 = vld [vmem:[%s3404_s5 + $0xc8] sm:$0xff] (!%p358_p3)   ;;  %v2826_v9 = vld [vmem:[%s3404_s5 + $0xd0] sm:$0xff] (!%p358_p3)   ;;  %vm601_vm1 = vcmask (!%p358_p3), 25600  }
   0xb   : > { %v2595_v2 = vld [vmem:[%s3404_s5] sm:$0xff] (!%p358_p3)   ;;  %2380 = vmatprep.subr.bf16.mxu1 (!%p358_p3), %v2594_v1  ;;  %v2599_v6 = vld [vmem:[%s3404_s5 + $0x8] sm:$0xff] (!%p358_p3)   ;;  %v2831_v10 = vld [vmem:[%s3404_s5 + $0x10] sm:$0xff] (!%p358_p3)   ;;  %v2705_v11 = vmov (!%p358_p3), 0.0   ;;  %s2191_s24 = sadd.s32 (!%p358_p3), 4294967295, %s2799_s20  ;;  %s2304_s26 = sadd.s32 (!%p358_p3), 4, %s2799_s20 }
   0xc   : > { %v2596_v3 = vld [vmem:[%s3404_s5 + $0x80] sm:$0xff] (!%p358_p3)   ;;  %2341 = vmatpush3.bf16.msra.mxu0 (!%p358_p3), %v2595_v2  ;;  %v2600_v7 = vld [vmem:[%s3404_s5 + $0x88] sm:$0xff] (!%p358_p3)   ;;  %603 = vst.msk [vmem:[#allocation2 + $0x18] sm:$0xff] (!%p358_p3), %vm598_vm0, %v2705_v11  ;;  %604 = vst.msk [vmem:[#allocation2 + $0x20] sm:$0xff] (!%p358_p3), %vm598_vm0, %v2705_v11  ;;  %p454_p7 = scmp.gt.s32.totalorder (!%p358_p3), %s2191_s24, 0  ;;  %p2192_p8 = scmp.lt.s32.totalorder (!%p358_p3), %s2191_s24, 15 }
   0xd   : > { %2381 = vmatpush3.bf16.msra.mxu1 (!%p358_p3), %v2596_v3  ;;  %2342 = vmatprep.subr.bf16.mxu0 (!%p358_p3), %v2597_v4  ;;  %635 = vst [vmem:[#allocation3 + $0x18] sm:$0xff] (!%p358_p3), %v2705_v11  ;;  %644 = vst [vmem:[#allocation3 + $0x60] sm:$0xff] (!%p358_p3), %v2705_v11  ;;  %v2604_v12 = vld [vmem:[%s3404_s5 + $0x90] sm:$0xff] (!%p358_p3)   ;;  %v2605_v13 = vld [vmem:[%s3404_s5 + $0x58] sm:$0xff] (!%p358_p3)   ;;  %p2976_p9 = scmp.lt.s32.totalorder (!%p358_p3), %s2304_s26, 15  ;;  %p586_p10 = scmp.gt.s32.totalorder (!%p358_p3), %s2687_s27, 0 }
   0xe   : > { %2382 = vmatprep.subr.bf16.mxu1 (!%p358_p3), %v2598_v5  ;;  %599 = vst.msk [vmem:[#allocation2] sm:$0xff] (!%p358_p3), %vm598_vm0, %v2705_v11  ;;  %600 = vst.msk [vmem:[#allocation2 + $0x8] sm:$0xff] (!%p358_p3), %vm598_vm0, %v2705_v11  ;;  %v2606_v14 = vld [vmem:[%s3404_s5 + $0xd8] sm:$0xff] (!%p358_p3)   ;;  %v2609_v17 = vld [vmem:[%s3404_s5 + $0x60] sm:$0xff] (!%p358_p3)   ;;  %p499_p11 = scmp.lt.s32.totalorder (!%p358_p3), %s2687_s27, 3  ;;  %vm1890_vm2 = vcmask (!%p358_p3), 27648  }
   0xf   : > { %606 = vst.msk [vmem:[#allocation2 + $0x30] sm:$0xff] (!%p358_p3), %vm598_vm0, %v2705_v11  ;;  %607 = vst.msk [vmem:[#allocation2 + $0x38] sm:$0xff] (!%p358_p3), %vm598_vm0, %v2705_v11  ;;  %v2607_v15 = vld [vmem:[%s3404_s5 + $0x18] sm:$0xff] (!%p358_p3)   ;;  %v2610_v18 = vld [vmem:[%s3404_s5 + $0xe0] sm:$0xff] (!%p358_p3)   ;;  %vm1920_vm3 = vcmask (!%p358_p3), 24576  }
  0x10   : > { %s3425_s28 = smov (!%p442_p5, %s2691_s28), 1  ;;  %2343 = vmatpush3.bf16.msra.mxu0 %v2599_v6  ;;  %609 = vst.msk [vmem:[#allocation2 + $0x48] sm:$0xff] %vm598_vm0, %v2705_v11  ;;  %610 = vst.msk [vmem:[#allocation2 + $0x50] sm:$0xff] %vm598_vm0, %v2705_v11  ;;  %s3427_s24 = smov (!%p454_p7, %s2191_s24), 0  ;;  %v2608_v16 = vld [vmem:[%s3404_s5 + $0x98] sm:$0xff]   ;;  %v2611_v19 = vld [vmem:[%s3404_s5 + $0x20] sm:$0xff]  }
  0x11   : > { %s2821_s16 = scalar_select %p444_p6, %s2799_s20, 15  ;;  %2383 = vmatpush3.bf16.msra.mxu1 %v2600_v7  ;;  %2344 = vmatprep.subr.bf16.mxu0 %v2601_v8  ;;  %612 = vst.msk [vmem:[#allocation2 + $0x60] sm:$0xff] %vm598_vm0, %v2705_v11  ;;  %613 = vst.msk [vmem:[#allocation2 + $0x68] sm:$0xff] %vm598_vm0, %v2705_v11  ;;  %v2612_v20 = vld [vmem:[%s3404_s5 + $0xa0] sm:$0xff]   ;;  %v2613_v21 = vld [vmem:[%s3404_s5 + $0x68] sm:$0xff]  }
  0x12   : > { %615 = vst.msk [vmem:[#allocation2 + $0x78] sm:$0xff] %vm598_vm0, %v2705_v11  ;;  %616 = vst.msk [vmem:[#allocation2 + $0x80] sm:$0xff] %vm598_vm0, %v2705_v11  ;;  %2384 = vmatprep.subr.bf16.mxu1 %v2826_v9  ;;  %s2960_s19 = sshll.u32 %s3425_s28, 5  ;;  %s3429_s24 = smov (!%p2192_p8, %s3427_s24), 15  ;;  %v2614_v22 = vld [vmem:[%s3404_s5 + $0xe8] sm:$0xff]   ;;  %v2617_v25 = vld [vmem:[%s3404_s5 + $0x70] sm:$0xff]  }
  0x13   : > { %632 = vst [vmem:[#allocation3] sm:$0xff] %v2705_v11  ;;  %633 = vst [vmem:[#allocation3 + $0x8] sm:$0xff] %v2705_v11  ;;  %s2187_s14 = sshll.u32 %s2821_s16, 1  ;;  %s2197_s22 = sshll.u32 %s3429_s24, 1  ;;  %v2615_v23 = vld [vmem:[%s3404_s5 + $0x28] sm:$0xff]   ;;  %v2618_v26 = vld [vmem:[%s3404_s5 + $0xf0] sm:$0xff]  }
  0x14   : > { %634 = vst [vmem:[#allocation3 + $0x10] sm:$0xff] %v2705_v11  ;;  %636 = vst [vmem:[#allocation3 + $0x20] sm:$0xff] %v2705_v11  ;;  %2345 = vmatpush3.bf16.msra.mxu0 %v2831_v10  ;;  %s2987_s25 = sadd.s32 %s2960_s19, %s2187_s14  ;;  %s3431_s26 = smov (!%p2976_p9, %s2304_s26), 15  ;;  %v2616_v24 = vld [vmem:[%s3404_s5 + $0xa8] sm:$0xff]   ;;  %v2619_v27 = vld [vmem:[%s3404_s5 + $0x30] sm:$0xff]  }
  0x15   : > { %637 = vst [vmem:[#allocation3 + $0x28] sm:$0xff] %v2705_v11  ;;  %638 = vst [vmem:[#allocation3 + $0x30] sm:$0xff] %v2705_v11  ;;  %2385 = vmatpush3.bf16.msra.mxu1 %v2604_v12  ;;  %2346 = vmatprep.subr.bf16.mxu0 %v2605_v13  ;;  %s462_s24 = sadd.s32 %s2197_s22, %s2960_s19  ;;  %s3433_s26 = smov (!%p2976_p9, %s3431_s26), 15  ;;  %v2620_v28 = vld [vmem:[%s3404_s5 + $0xb0] sm:$0xff]   ;;  %v2621_v29 = vld [vmem:[%s3404_s5 + $0x78] sm:$0xff]  }
  0x16   : > { %639 = vst [vmem:[#allocation3 + $0x38] sm:$0xff] %v2705_v11  ;;  %640 = vst [vmem:[#allocation3 + $0x40] sm:$0xff] %v2705_v11  ;;  %2386 = vmatprep.subr.bf16.mxu1 %v2606_v14  ;;  %s3010_s22 = sshll.u32 %s3433_s26, 1  ;;  %s2199_s17 = sshll.u32 %s462_s24, 2  ;;  %v2622_v30 = vld [vmem:[%s3404_s5 + $0xf8] sm:$0xff]   ;;  %v2625_v39 = vld [vmem:[%s3404_s5 + $0x140] sm:$0xff]  }
  0x17   : > { %641 = vst [vmem:[#allocation3 + $0x48] sm:$0xff] %v2705_v11  ;;  %642 = vst [vmem:[#allocation3 + $0x50] sm:$0xff] %v2705_v11  ;;  %s3410_s26 = sshll.u32 %s2987_s25, 2  ;;  %v2623_v31 = vld [vmem:[%s3404_s5 + $0x38] sm:$0xff]   ;;  %s464_s14 = scalar_lea.vmem %s3400_s1, %s2199_s17  ;;  %v3044_v34 = vld [vmem:[%s3402_s3] ss:$0 sm:$0xff] }
  0x18   : > { %643 = vst [vmem:[#allocation3 + $0x58] sm:$0xff] %v2705_v11  ;;  %645 = vst [vmem:[#allocation3 + $0x68] sm:$0xff] %v2705_v11  ;;  %2347 = vmatpush3.bf16.msra.mxu0 %v2607_v15  ;;  %s3028_s11 = scalar_lea.vmem %s3399_s0, %s3410_s26  ;;  %v2624_v32 = vld [vmem:[%s3404_s5 + $0xb8] sm:$0xff]   ;;  %v3049_v35 = vld [vmem:[%s3403_s4] ss:$0 sm:$0xff]  ;;  %s3411_s16 = sadd.s32 %s3010_s22, %s2960_s19 }
  0x19   : > { %646 = vst [vmem:[#allocation3 + $0x70] sm:$0xff] %v2705_v11  ;;  %647 = vst [vmem:[#allocation3 + $0x78] sm:$0xff] %v2705_v11  ;;  %2387 = vmatpush3.bf16.msra.mxu1 %v2608_v16  ;;  %2348 = vmatprep.subr.bf16.mxu0 %v2609_v17  ;;  %v2314_v33 = vld [vmem:[%s3028_s11] sm:$0xff]   ;;  %s587_s17 = scalar_select %p586_p10, 1, 0  ;;  %v2337_v56 = vld [vmem:[%s3028_s11 + $0x8] sm:$0xff]  }
  0x1a   : > { %648 = vst [vmem:[#allocation3 + $0x80] sm:$0xff] %v2705_v11  ;;  %649 = vst [vmem:[#allocation3 + $0x88] sm:$0xff] %v2705_v11  ;;  %2388 = vmatprep.subr.bf16.mxu1 %v2610_v18  ;;  %v2315_v36 = vunpack.c.l.bf16 %v2314_v33  ;;  %v2316_v37 = vunpack.c.h.bf16 %v2314_v33  ;;  %v2330_v38 = vld [vmem:[%s464_s14] sm:$0xff]   ;;  %v2319_v59 = vunpack.c.l.bf16 %v2337_v56  ;;  %v2320_v60 = vunpack.c.h.bf16 %v2337_v56  ;;  %v2338_v15 = vld [vmem:[%s3028_s11 + $0x10] sm:$0xff]   ;;  %s3255_s23 = sshll.u32 %s3411_s16, 2  ;;  %s3412_s19 = sshll.u32 %s2987_s25, 2 }
  0x1b   : > { %650 = vst [vmem:[#allocation3 + $0x90] sm:$0xff] %v2705_v11  ;;  %651 = vst [vmem:[#allocation3 + $0x98] sm:$0xff] %v2705_v11  ;;  %v2331_v40 = vunpack.c.l.bf16 %v2330_v38  ;;  %v2332_v41 = vunpack.c.h.bf16 %v2330_v38  ;;  %s588_s18 = scvt.s32.f32 %s587_s17  ;;  %v2626_v44 = vld [vmem:[%s3404_s5 + $0x1c0] sm:$0xff]   ;;  %v2323_v16 = vunpack.c.l.bf16 %v2338_v15  ;;  %v2324_v17 = vunpack.c.h.bf16 %v2338_v15  ;;  %v2339_v15 = vld [vmem:[%s3028_s11 + $0x18] sm:$0xff]   ;;  %s481_s13 = scalar_lea.vmem %s3401_s2, %s3255_s23 }
  0x1c   : > { %652 = vst [vmem:[#allocation3 + $0xa0] sm:$0xff] %v2705_v11  ;;  %653 = vst [vmem:[#allocation3 + $0xa8] sm:$0xff] %v2705_v11  ;;  %2349 = vmatpush3.bf16.msra.mxu0 %v2611_v19  ;;  %v544_v42 = vmul.f32 %v2315_v36, %v3044_v34  ;;  %v545_v43 = vmul.f32 %v2316_v37, %v3044_v34  ;;  %v546_v61 = vmul.f32 %v2319_v59, %v3044_v34  ;;  %s3275_s17 = scalar_select %p499_p11, 1, 0 }
  0x1d   : > { %654 = vst [vmem:[#allocation3 + $0xb0] sm:$0xff] %v2705_v11  ;;  %655 = vst [vmem:[#allocation3 + $0xb8] sm:$0xff] %v2705_v11  ;;  %2389 = vmatpush3.bf16.msra.mxu1 %v2612_v20  ;;  %2350 = vmatprep.subr.bf16.mxu0 %v2613_v21  ;;  %v574_v45 = vmul.f32 %v2331_v40, %v3044_v34  ;;  %v575_v46 = vmul.f32 %v2332_v41, %v3044_v34  ;;  %v589_v53 = vstv %s588_s18  ;;  %s3435_s27 = smov (!%p499_p11, %s2687_s27), 3  ;;  %s2211_s25 = sshll.u32 %s3425_s28, 2 }
  0x1e   : > { %656 = vst [vmem:[#allocation3 + $0xc0] sm:$0xff] %v2705_v11  ;;  %657 = vst [vmem:[#allocation3 + $0xc8] sm:$0xff] %v2705_v11  ;;  %2390 = vmatprep.subr.bf16.mxu1 %v2614_v22  ;;  %v558_v47 = vadd.f32 %v3049_v35, %v544_v42  ;;  %v559_v48 = vadd.f32 %v3049_v35, %v545_v43  ;;  %v547_v62 = vmul.f32 %v2320_v60, %v3044_v34  ;;  %v2630_v43 = vld [vmem:[%s3404_s5 + $0x1c8] sm:$0xff]   ;;  %v2634_v60 = vld [vmem:[%s3404_s5 + $0x1d0] sm:$0xff]   ;;  %s594_s18 = scvt.s32.f32 %s3275_s17  ;;  %s3340_s17 = scalar_lea.vmem %s3405_s6, %s3412_s19 }
  0x1f   : > { %658 = vst [vmem:[#allocation3 + $0xd0] sm:$0xff] %v2705_v11  ;;  %659 = vst [vmem:[#allocation3 + $0xd8] sm:$0xff] %v2705_v11  ;;  %v576_v49 = vadd.f32 %v3049_v35, %v574_v45  ;;  %v577_v50 = vadd.f32 %v3049_v35, %v575_v46  ;;  %v560_v63 = vadd.f32 %v3049_v35, %v546_v61  ;;  %s502_s24 = sadd.s32 %s2211_s25, %s3435_s27 }
  0x20   : > { %660 = vst [vmem:[#allocation3 + $0xe0] sm:$0xff] %v2705_v11  ;;  %661 = vst [vmem:[#allocation3 + $0xe8] sm:$0xff] %v2705_v11  ;;  %2351 = vmatpush3.bf16.msra.mxu0 %v2615_v23  ;;  %v566_v51 = vmax.f32 %v558_v47, 0.0  ;;  %v567_v52 = vmax.f32 %v559_v48, 0.0  ;;  %v561_v0 = vadd.f32 %v3049_v35, %v547_v62  ;;  %v548_v23 = vmul.f32 %v2323_v16, %v3044_v34  ;;  %v2631_v48 = vld [vmem:[%s3404_s5 + $0x108] sm:$0xff]   ;;  %v2635_v62 = vld [vmem:[%s3404_s5 + $0x110] sm:$0xff]   ;;  %s503_s11 = scalar_lea.vmem %s3406_s7, %s502_s24  ;;  %s510_s14 = scalar_lea.vmem %s3407_s8, %s502_s24 }
  0x21   : > { %662 = vst [vmem:[#allocation3 + $0xf0] sm:$0xff] %v2705_v11  ;;  %663 = vst [vmem:[#allocation3 + $0xf8] sm:$0xff] %v2705_v11  ;;  %2391 = vmatpush3.bf16.msra.mxu1 %v2616_v24  ;;  %2352 = vmatprep.subr.bf16.mxu0 %v2617_v25  ;;  %v578_v54 = vmax.f32 %v576_v49, 0.0  ;;  %v579_v55 = vmax.f32 %v577_v50, 0.0  ;;  %v568_v3 = vmax.f32 %v560_v63, 0.0  ;;  %v549_v24 = vmul.f32 %v2324_v17, %v3044_v34  ;;  %v2627_v25 = vld [vmem:[%s3404_s5 + $0x100] sm:$0xff]  }
  0x22   : > { %664 = vst [vmem:[#allocation3 + $0x100] sm:$0xff] %v2705_v11  ;;  %665 = vst [vmem:[#allocation3 + $0x108] sm:$0xff] %v2705_v11  ;;  %2392 = vmatprep.subr.bf16.mxu1 %v2618_v26  ;;  %v569_v4 = vmax.f32 %v561_v0, 0.0  ;;  %v2628_v26 = vld [vmem:[%s3404_s5 + $0x180] sm:$0xff]   ;;  %v562_v33 = vadd.f32 %v3049_v35, %v548_v23  ;;  %v2632_v49 = vld [vmem:[%s3404_s5 + $0x188] sm:$0xff]   ;;  %v2327_v17 = vunpack.c.l.bf16 %v2339_v15 }
  0x23   : > { %666 = vst [vmem:[#allocation3 + $0x110] sm:$0xff] %v2705_v11  ;;  %667 = vst [vmem:[#allocation3 + $0x118] sm:$0xff] %v2705_v11  ;;  %v590_v57 = vmul.f32 %v589_v53, %v578_v54  ;;  %v591_v58 = vmul.f32 %v589_v53, %v579_v55  ;;  %v563_v36 = vadd.f32 %v3049_v35, %v549_v24  ;;  %v2633_v55 = vld [vmem:[%s3404_s5 + $0x150] sm:$0xff]   ;;  %v2643_v23 = vld [vmem:[%s3404_s5 + $0x120] sm:$0xff]  }
  0x24   : > { %668 = vst [vmem:[#allocation3 + $0x120] sm:$0xff] %v2705_v11  ;;  %669 = vst [vmem:[#allocation3 + $0x128] sm:$0xff] %v2705_v11  ;;  %2353 = vmatpush3.bf16.msra.mxu0 %v2619_v27  ;;  %v2644_v24 = vld [vmem:[%s3404_s5 + $0x1a0] sm:$0xff]  }
  0x25   : > { %670 = vst [vmem:[#allocation3 + $0x130] sm:$0xff] %v2705_v11  ;;  %671 = vst [vmem:[#allocation3 + $0x138] sm:$0xff] %v2705_v11  ;;  %2393 = vmatpush3.bf16.msra.mxu1 %v2620_v28  ;;  %2354 = vmatprep.subr.bf16.mxu0 %v2621_v29  ;;  %v571_v45 = vmax.f32 %v563_v36, 0.0 }
  0x26   : > { %672 = vst [vmem:[#allocation3 + $0x140] sm:$0xff] %v2705_v11  ;;  %673 = vst [vmem:[#allocation3 + $0x148] sm:$0xff] %v2705_v11  ;;  %2394 = vmatprep.subr.bf16.mxu1 %v2622_v30 }
  0x27   : > { %674 = vst [vmem:[#allocation3 + $0x150] sm:$0xff] %v2705_v11  ;;  %675 = vst [vmem:[#allocation3 + $0x158] sm:$0xff] %v2705_v11 }
  0x28   : > { %676 = vst [vmem:[#allocation3 + $0x160] sm:$0xff] %v2705_v11  ;;  %677 = vst [vmem:[#allocation3 + $0x168] sm:$0xff] %v2705_v11  ;;  %2355 = vmatpush3.bf16.msra.mxu0 %v2623_v31 }
  0x29   : > { %678 = vst [vmem:[#allocation3 + $0x170] sm:$0xff] %v2705_v11  ;;  %679 = vst [vmem:[#allocation3 + $0x178] sm:$0xff] %v2705_v11  ;;  %2395 = vmatpush3.bf16.msra.mxu1 %v2624_v32  ;;  %2420 = vmatprep.subr.bf16.mxu0 %v2625_v39  ;;  %v2629_v32 = vld [vmem:[%s3404_s5 + $0x148] sm:$0xff]  }
  0x2a   : > { %680 = vst [vmem:[#allocation3 + $0x180] sm:$0xff] %v2705_v11  ;;  %681 = vst [vmem:[#allocation3 + $0x188] sm:$0xff] %v2705_v11  ;;  %2460 = vmatprep.subr.bf16.mxu1 %v2626_v44  ;;  %v570_v44 = vmax.f32 %v562_v33, 0.0 }
  0x2b   : > { %682 = vst [vmem:[#allocation3 + $0x190] sm:$0xff] %v2705_v11  ;;  %683 = vst [vmem:[#allocation3 + $0x198] sm:$0xff] %v2705_v11 }
  0x2c   : > { %684 = vst [vmem:[#allocation3 + $0x1a0] sm:$0xff] %v2705_v11  ;;  %685 = vst [vmem:[#allocation3 + $0x1a8] sm:$0xff] %v2705_v11 }
  0x2d   : > { %686 = vst [vmem:[#allocation3 + $0x1b0] sm:$0xff] %v2705_v11  ;;  %687 = vst [vmem:[#allocation3 + $0x1b8] sm:$0xff] %v2705_v11 }
  0x2e   : > { %688 = vst [vmem:[#allocation3 + $0x1c0] sm:$0xff] %v2705_v11  ;;  %689 = vst [vmem:[#allocation3 + $0x1c8] sm:$0xff] %v2705_v11 }
  0x2f   : > { %690 = vst [vmem:[#allocation3 + $0x1d0] sm:$0xff] %v2705_v11  ;;  %691 = vst [vmem:[#allocation3 + $0x1d8] sm:$0xff] %v2705_v11 }
  0x30   : > { %692 = vst [vmem:[#allocation3 + $0x1e0] sm:$0xff] %v2705_v11  ;;  %693 = vst [vmem:[#allocation3 + $0x1e8] sm:$0xff] %v2705_v11 }
  0x31   : > { %694 = vst [vmem:[#allocation3 + $0x1f0] sm:$0xff] %v2705_v11  ;;  %695 = vst [vmem:[#allocation3 + $0x1f8] sm:$0xff] %v2705_v11 }
  0x32   : > { %696 = vst [vmem:[#allocation3 + $0x200] sm:$0xff] %v2705_v11  ;;  %697 = vst [vmem:[#allocation3 + $0x208] sm:$0xff] %v2705_v11 }
  0x33   : > { %698 = vst [vmem:[#allocation3 + $0x210] sm:$0xff] %v2705_v11  ;;  %699 = vst [vmem:[#allocation3 + $0x218] sm:$0xff] %v2705_v11 }
  0x34   : > { %700 = vst [vmem:[#allocation3 + $0x220] sm:$0xff] %v2705_v11  ;;  %701 = vst [vmem:[#allocation3 + $0x228] sm:$0xff] %v2705_v11 }
  0x35   : > { %702 = vst [vmem:[#allocation3 + $0x230] sm:$0xff] %v2705_v11  ;;  %703 = vst [vmem:[#allocation3 + $0x238] sm:$0xff] %v2705_v11 }
  0x36   : > { %605 = vst.msk [vmem:[#allocation2 + $0x28] sm:$0x3] %vm601_vm1, %v2705_v11  ;;  %602 = vst.msk [vmem:[#allocation2 + $0x10] sm:$0x3] %vm601_vm1, %v2705_v11 }
  0x37   : > { %608 = vst.msk [vmem:[#allocation2 + $0x40] sm:$0x3] %vm601_vm1, %v2705_v11  ;;  %611 = vst.msk [vmem:[#allocation2 + $0x58] sm:$0x3] %vm601_vm1, %v2705_v11 }
  0x38   : > { %614 = vst.msk [vmem:[#allocation2 + $0x70] sm:$0x3] %vm601_vm1, %v2705_v11  ;;  %617 = vst.msk [vmem:[#allocation2 + $0x88] sm:$0x3] %vm601_vm1, %v2705_v11 }
  0x39   : > { %624 = vst.msk [vmem:[#allocation2 + $0x19] sm:$0xff] %vm598_vm0, %v566_v51  ;;  %625 = vst.msk [vmem:[#allocation2 + $0x21] sm:$0xff] %vm598_vm0, %v567_v52 }
  0x3a   : > { %618 = vst.msk [vmem:[#allocation2 + $0x1] sm:$0xff] %vm598_vm0, %v590_v57  ;;  %619 = vst.msk [vmem:[#allocation2 + $0x9] sm:$0xff] %vm598_vm0, %v591_v58 }
  0x3b   : > { %626 = vst.msk [vmem:[#allocation2 + $0x31] sm:$0xff] %vm598_vm0, %v568_v3  ;;  %627 = vst.msk [vmem:[#allocation2 + $0x39] sm:$0xff] %vm598_vm0, %v569_v4  ;;  %v2638_v3 = vld [vmem:[%s3404_s5 + $0x1d8] sm:$0xff]  }
  0x3c   : > { %628 = vst.msk [vmem:[#allocation2 + $0x49] sm:$0xff] %vm598_vm0, %v570_v44  ;;  %629 = vst.msk [vmem:[#allocation2 + $0x51] sm:$0xff] %vm598_vm0, %v571_v45 }
  0x40   : > { %v752_v1 = vld [vmem:[#allocation2 + $0x18] sm:$0xff]  ;;  %v753_v2 = vld [vmem:[#allocation2 + $0x20] sm:$0xff] }
  0x41   : > { %v722_v5 = vld [vmem:[#allocation2 + $0x19] sm:$0xff]  ;;  %760 = vst.msk [vmem:[#allocation3 + $0x18] sm:$0xff] %vm598_vm0, %v752_v1  ;;  %761 = vst.msk [vmem:[#allocation3 + $0x60] sm:$0xff] %vm598_vm0, %v753_v2  ;;  %v723_v6 = vld [vmem:[#allocation2 + $0x21] sm:$0xff] }
  0x42   : > { %730 = vst.msk [vmem:[#allocation3 + $0x98] sm:$0xff] %vm598_vm0, %v722_v5  ;;  %v738_v7 = vld [vmem:[#allocation2 + $0x1a] sm:$0xff]  ;;  %v739_v8 = vld [vmem:[#allocation2 + $0x22] sm:$0xff]  ;;  %714 = vst.msk [vmem:[#allocation3 + $0x90] sm:$0xff] %vm598_vm0, %v752_v1 }
  0x43   : > { %715 = vst.msk [vmem:[#allocation3 + $0xd8] sm:$0xff] %vm598_vm0, %v753_v2  ;;  %776 = vst.msk [vmem:[#allocation3 + $0x20] sm:$0xff] %vm598_vm0, %v722_v5  ;;  %v720_v9 = vld [vmem:[#allocation2 + $0x1] sm:$0xff]  ;;  %v721_v10 = vld [vmem:[#allocation2 + $0x9] sm:$0xff] }
  0x44   : > { %731 = vst.msk [vmem:[#allocation3 + $0xe0] sm:$0xff] %vm598_vm0, %v723_v6  ;;  %746 = vst.msk [vmem:[#allocation3 + $0xa0] sm:$0xff] %vm598_vm0, %v738_v7  ;;  %v736_v11 = vld [vmem:[#allocation2 + $0x2] sm:$0xff]  ;;  %v737_v12 = vld [vmem:[#allocation2 + $0xa] sm:$0xff] }
  0x45   : > { %747 = vst.msk [vmem:[#allocation3 + $0xe8] sm:$0xff] %vm598_vm0, %v739_v8  ;;  %792 = vst.msk [vmem:[#allocation3 + $0x28] sm:$0xff] %vm598_vm0, %v738_v7  ;;  %v704_v13 = vld [vmem:[#allocation2] sm:$0xff]  ;;  %v705_v14 = vld [vmem:[#allocation2 + $0x8] sm:$0xff] }
  0x46   : > { %793 = vst.msk [vmem:[#allocation3 + $0x70] sm:$0xff] %vm598_vm0, %v739_v8  ;;  %777 = vst.msk [vmem:[#allocation3 + $0x68] sm:$0xff] %vm598_vm0, %v723_v6  ;;  %v754_v21 = vld [vmem:[#allocation2 + $0x30] sm:$0xff]  ;;  %v755_v22 = vld [vmem:[#allocation2 + $0x38] sm:$0xff] }
  0x47   : > { %728 = vst.msk [vmem:[#allocation3 + $0x8] sm:$0xff] %vm598_vm0, %v720_v9  ;;  %729 = vst.msk [vmem:[#allocation3 + $0x50] sm:$0xff] %vm598_vm0, %v721_v10  ;;  %v724_v46 = vld [vmem:[#allocation2 + $0x31] sm:$0xff]  ;;  %v725_v47 = vld [vmem:[#allocation2 + $0x39] sm:$0xff] }
  0x48   : > { %744 = vst.msk [vmem:[#allocation3 + $0x10] sm:$0xff] %vm598_vm0, %v736_v11  ;;  %745 = vst.msk [vmem:[#allocation3 + $0x58] sm:$0xff] %vm598_vm0, %v737_v12  ;;  %v852_v18 = vld [vmem:[#allocation3 + $0x18] sm:$0xff]  ;;  %v861_v19 = vld [vmem:[#allocation3 + $0x60] sm:$0xff] }
  0x49   : > { %712 = vst.msk [vmem:[#allocation3] sm:$0xff] %vm598_vm0, %v704_v13  ;;  %713 = vst.msk [vmem:[#allocation3 + $0x48] sm:$0xff] %vm598_vm0, %v705_v14  ;;  %v924_v20 = vpack.c.bf16 %v861_v19, %v852_v18  ;;  %v868_v27 = vld [vmem:[#allocation3 + $0x98] sm:$0xff]  ;;  %v740_v53 = vld [vmem:[#allocation2 + $0x32] sm:$0xff]  ;;  %v2328_v18 = vunpack.c.h.bf16 %v2339_v15 }
  0x4a   : > { %762 = vst.msk [vmem:[#allocation3 + $0xa8] sm:$0xff] %vm598_vm0, %v754_v21  ;;  %763 = vst.msk [vmem:[#allocation3 + $0xf0] sm:$0xff] %vm598_vm0, %v755_v22  ;;  %v741_v54 = vld [vmem:[#allocation2 + $0x3a] sm:$0xff]  ;;  %v876_v57 = vld [vmem:[#allocation3 + $0xd8] sm:$0xff] }
  0x4b   : > { %v877_v28 = vld [vmem:[#allocation3 + $0xe0] sm:$0xff]  ;;  %716 = vst.msk [vmem:[#allocation3 + $0x120] sm:$0xff] %vm598_vm0, %v754_v21  ;;  %717 = vst.msk [vmem:[#allocation3 + $0x168] sm:$0xff] %vm598_vm0, %v755_v22  ;;  %1630 = vmatprep.mubr.bf16.mxu1 %v924_v20  ;;  %v867_v56 = vld [vmem:[#allocation3 + $0x90] sm:$0xff] }
  0x4c   : > { %809 = vst.msk [vmem:[#allocation3 + $0x30] sm:$0xff] %vm598_vm0, %v754_v21  ;;  %810 = vst.msk [vmem:[#allocation3 + $0x78] sm:$0xff] %vm598_vm0, %v755_v22  ;;  %v931_v50 = vpack.c.bf16 %v877_v28, %v868_v27  ;;  %v869_v51 = vld [vmem:[#allocation3 + $0xa0] sm:$0xff]  ;;  %v878_v52 = vld [vmem:[#allocation3 + $0xe8] sm:$0xff]  ;;  %v930_v0 = vpack.c.bf16 %v876_v57, %v867_v56  ;;  %v550_v27 = vmul.f32 %v2327_v17, %v3044_v34 }
  0x4d   : > { %732 = vst.msk [vmem:[#allocation3 + $0x128] sm:$0xff] %vm598_vm0, %v724_v46  ;;  %733 = vst.msk [vmem:[#allocation3 + $0x170] sm:$0xff] %vm598_vm0, %v725_v47  ;;  %v932_v63 = vpack.c.bf16 %v878_v52, %v869_v51  ;;  %v2636_v1 = vld [vmem:[%s3404_s5 + $0x190] sm:$0xff]   ;;  %v2637_v2 = vld [vmem:[%s3404_s5 + $0x158] sm:$0xff]   ;;  %v551_v28 = vmul.f32 %v2328_v18, %v3044_v34 }
  0x4e   : > { %v850_v29 = vld [vmem:[#allocation3 + $0x8] sm:$0xff]  ;;  %v859_v30 = vld [vmem:[#allocation3 + $0x50] sm:$0xff]  ;;  %825 = vst.msk [vmem:[#allocation3 + $0x38] sm:$0xff] %vm598_vm0, %v724_v46  ;;  %826 = vst.msk [vmem:[#allocation3 + $0x80] sm:$0xff] %vm598_vm0, %v725_v47 }
  0x4f   : > { %v851_v31 = vld [vmem:[#allocation3 + $0x10] sm:$0xff]  ;;  %v922_v37 = vpack.c.bf16 %v859_v30, %v850_v29  ;;  %v860_v38 = vld [vmem:[#allocation3 + $0x58] sm:$0xff]  ;;  %778 = vst.msk [vmem:[#allocation3 + $0xb0] sm:$0xff] %vm598_vm0, %v724_v46  ;;  %779 = vst.msk [vmem:[#allocation3 + $0xf8] sm:$0xff] %vm598_vm0, %v725_v47 }
  0x50   : > { %v849_v39 = vld [vmem:[#allocation3] sm:$0xff]  ;;  %v858_v40 = vld [vmem:[#allocation3 + $0x48] sm:$0xff]  ;;  %v923_v41 = vpack.c.bf16 %v860_v38, %v851_v31  ;;  %748 = vst.msk [vmem:[#allocation3 + $0x130] sm:$0xff] %vm598_vm0, %v740_v53  ;;  %749 = vst.msk [vmem:[#allocation3 + $0x178] sm:$0xff] %vm598_vm0, %v741_v54  ;;  %v564_v31 = vadd.f32 %v3049_v35, %v550_v27 }
  0x51   : > { %v921_v42 = vpack.c.bf16 %v858_v40, %v849_v39  ;;  %1565 = vmatprep.mubr.bf16.mxu0 %v922_v37  ;;  %794 = vst.msk [vmem:[#allocation3 + $0xb8] sm:$0xff] %vm598_vm0, %v740_v53  ;;  %795 = vst.msk [vmem:[#allocation3 + $0x100] sm:$0xff] %vm598_vm0, %v741_v54  ;;  %v870_v58 = vld [vmem:[#allocation3 + $0xa8] sm:$0xff]  ;;  %v879_v59 = vld [vmem:[#allocation3 + $0xf0] sm:$0xff] }
  0x52   : > { %1631 = vmatmul.mubr.bf16.vlgmr.msra.gmra.mrb[0].mxu1 %v923_v41  ;;  %841 = vst.msk [vmem:[#allocation3 + $0x40] sm:$0xff] %vm598_vm0, %v740_v53  ;;  %842 = vst.msk [vmem:[#allocation3 + $0x88] sm:$0xff] %vm598_vm0, %v741_v54  ;;  %v933_v61 = vpack.c.bf16 %v879_v59, %v870_v58  ;;  %v2639_v6 = vld [vmem:[%s3404_s5 + $0x118] sm:$0xff]   ;;  %v756_v8 = vld [vmem:[#allocation2 + $0x48] sm:$0xff]  ;;  %v572_v41 = vmax.f32 %v564_v31, 0.0 }
  0x53   : > { %1566 = vmatmul.mubr.bf16.vlgmr.msra.gmra.mrb[0].mxu0 %v921_v42  ;;  %2461 = vmatpush3.bf16.msra.mxu1 %v2628_v26  ;;  %v2640_v7 = vld [vmem:[%s3404_s5 + $0x198] sm:$0xff]   ;;  %v757_v9 = vld [vmem:[#allocation2 + $0x50] sm:$0xff]  ;;  %764 = vst.msk [vmem:[#allocation3 + $0x138] sm:$0xff] %vm598_vm0, %v756_v8  ;;  %v2641_v11 = vld [vmem:[%s3404_s5 + $0x160] sm:$0xff]  }
  0x54   : > { %2421 = vmatpush3.bf16.msra.mxu0 %v2627_v25  ;;  %2462 = vmatprep.subr.bf16.mxu1 %v2630_v43  ;;  %v886_v4 = vld [vmem:[#allocation3 + $0x128] sm:$0xff]  ;;  %v895_v5 = vld [vmem:[#allocation3 + $0x170] sm:$0xff]  ;;  %765 = vst.msk [vmem:[#allocation3 + $0x180] sm:$0xff] %vm598_vm0, %v757_v9  ;;  %v885_v13 = vld [vmem:[#allocation3 + $0x120] sm:$0xff] }
  0x55   : > { %2422 = vmatprep.subr.bf16.mxu0 %v2629_v32  ;;  %1573 = vmatprep.mubr.bf16.mxu0 %v931_v50  ;;  %v940_v10 = vpack.c.bf16 %v895_v5, %v886_v4  ;;  %v2642_v12 = vld [vmem:[%s3404_s5 + $0x1e0] sm:$0xff]   ;;  %718 = vst.msk [vmem:[#allocation3 + $0x1b0] sm:$0xff] %vm598_vm0, %v756_v8  ;;  %719 = vst.msk [vmem:[#allocation3 + $0x1f8] sm:$0xff] %vm598_vm0, %v757_v9  ;;  %v894_v14 = vld [vmem:[#allocation3 + $0x168] sm:$0xff]  ;;  %v565_v32 = vadd.f32 %v3049_v35, %v551_v28 }
  0x56   : > { %1638 = vmatprep.mubr.bf16.mxu1 %v933_v61  ;;  %811 = vst.msk [vmem:[#allocation3 + $0xc0] sm:$0xff] %vm598_vm0, %v756_v8  ;;  %812 = vst.msk [vmem:[#allocation3 + $0x108] sm:$0xff] %vm598_vm0, %v757_v9  ;;  %v726_v16 = vld [vmem:[#allocation2 + $0x49] sm:$0xff]  ;;  %v727_v19 = vld [vmem:[#allocation2 + $0x51] sm:$0xff]  ;;  %v939_v26 = vpack.c.bf16 %v894_v14, %v885_v13 }
  0x57   : > { %2463 = vmatpush3.bf16.msra.mxu1 %v2632_v49  ;;  %734 = vst.msk [vmem:[#allocation3 + $0x1b8] sm:$0xff] %vm598_vm0, %v726_v16  ;;  %v742_v20 = vld [vmem:[#allocation2 + $0x4a] sm:$0xff]  ;;  %v743_v21 = vld [vmem:[#allocation2 + $0x52] sm:$0xff]  ;;  %827 = vst.msk [vmem:[#allocation3 + $0xc8] sm:$0xff] %vm598_vm0, %v726_v16  ;;  %v573_v42 = vmax.f32 %v565_v32, 0.0 }
  0x58   : > { %2423 = vmatpush3.bf16.msra.mxu0 %v2631_v48  ;;  %2464 = vmatprep.subr.bf16.mxu1 %v2634_v60  ;;  %780 = vst.msk [vmem:[#allocation3 + $0x140] sm:$0xff] %vm598_vm0, %v726_v16  ;;  %v887_v22 = vld [vmem:[#allocation3 + $0x130] sm:$0xff]  ;;  %735 = vst.msk [vmem:[#allocation3 + $0x200] sm:$0xff] %vm598_vm0, %v727_v19  ;;  %v896_v25 = vld [vmem:[#allocation3 + $0x178] sm:$0xff] }
  0x59   : > { %2424 = vmatprep.subr.bf16.mxu0 %v2633_v55  ;;  %750 = vst.msk [vmem:[#allocation3 + $0x1c0] sm:$0xff] %vm598_vm0, %v742_v20  ;;  %751 = vst.msk [vmem:[#allocation3 + $0x208] sm:$0xff] %vm598_vm0, %v743_v21  ;;  %v2645_v29 = vld [vmem:[%s3404_s5 + $0x168] sm:$0xff]   ;;  %v941_v37 = vpack.c.bf16 %v896_v25, %v887_v22  ;;  %v2649_v47 = vld [vmem:[%s3404_s5 + $0x170] sm:$0xff]  }
  0x5a   : > { %1639 = vmatmul.mubr.bf16.gmra.mrb[4].mxu1 %v932_v63  ;;  %828 = vst.msk [vmem:[#allocation3 + $0x110] sm:$0xff] %vm598_vm0, %v727_v19  ;;  %796 = vst.msk [vmem:[#allocation3 + $0x148] sm:$0xff] %vm598_vm0, %v742_v20  ;;  %v2646_v30 = vld [vmem:[%s3404_s5 + $0x1e8] sm:$0xff]   ;;  %v2650_v49 = vld [vmem:[%s3404_s5 + $0x1f0] sm:$0xff]  }
  0x5b   : > { %1574 = vmatmul.mubr.bf16.gmra.mrb[4].mxu0 %v930_v0  ;;  %2465 = vmatpush3.bf16.msra.mxu1 %v2636_v1  ;;  %797 = vst.msk [vmem:[#allocation3 + $0x190] sm:$0xff] %vm598_vm0, %v743_v21  ;;  %781 = vst.msk [vmem:[#allocation3 + $0x188] sm:$0xff] %vm598_vm0, %v727_v19  ;;  %v888_v33 = vld [vmem:[#allocation3 + $0x138] sm:$0xff]  ;;  %v897_v36 = vld [vmem:[#allocation3 + $0x180] sm:$0xff] }
  0x5c   : > { %2425 = vmatpush3.bf16.msra.mxu0 %v2635_v62  ;;  %2466 = vmatprep.subr.bf16.mxu1 %v2638_v3  ;;  %843 = vst.msk [vmem:[#allocation3 + $0xd0] sm:$0xff] %vm598_vm0, %v742_v20  ;;  %844 = vst.msk [vmem:[#allocation3 + $0x118] sm:$0xff] %vm598_vm0, %v743_v21  ;;  %v2647_v38 = vld [vmem:[%s3404_s5 + $0x128] sm:$0xff]   ;;  %v942_v40 = vpack.c.bf16 %v897_v36, %v888_v33  ;;  %v903_v43 = vld [vmem:[#allocation3 + $0x1b0] sm:$0xff] }
  0x5d   : > { %2426 = vmatprep.subr.bf16.mxu0 %v2637_v2  ;;  %1581 = vmatprep.mubr.bf16.mxu0 %v940_v10  ;;  %v2648_v39 = vld [vmem:[%s3404_s5 + $0x1a8] sm:$0xff]   ;;  %630 = vst.msk [vmem:[#allocation2 + $0x61] sm:$0xff] %vm598_vm0, %v572_v41  ;;  %631 = vst.msk [vmem:[#allocation2 + $0x69] sm:$0xff] %vm598_vm0, %v573_v42  ;;  %v2651_v51 = vld [vmem:[%s3404_s5 + $0x130] sm:$0xff]  }
  0x5e   : > { %v912_v44 = vld [vmem:[#allocation3 + $0x1f8] sm:$0xff]  ;;  %1646 = vmatprep.mubr.bf16.mxu1 %v942_v40  ;;  %v2652_v52 = vld [vmem:[%s3404_s5 + $0x1b0] sm:$0xff]   ;;  %v2653_v53 = vld [vmem:[%s3404_s5 + $0x178] sm:$0xff]  }
  0x5f   : > { %2467 = vmatpush3.bf16.msra.mxu1 %v2640_v7  ;;  %v904_v45 = vld [vmem:[#allocation3 + $0x1b8] sm:$0xff]  ;;  %v913_v46 = vld [vmem:[#allocation3 + $0x200] sm:$0xff]  ;;  %v948_v50 = vpack.c.bf16 %v912_v44, %v903_v43  ;;  %v2654_v54 = vld [vmem:[%s3404_s5 + $0x1f8] sm:$0xff]  }
  0x60   : > { %2427 = vmatpush3.bf16.msra.mxu0 %v2639_v6  ;;  %2468 = vmatprep.subr.bf16.mxu1 %v2642_v12  ;;  %v949_v48 = vpack.c.bf16 %v913_v46, %v904_v45  ;;  %v854_v55 = vld [vmem:[#allocation3 + $0x28] sm:$0xff]  ;;  %v863_v56 = vld [vmem:[#allocation3 + $0x70] sm:$0xff]  ;;  %v853_v60 = vld [vmem:[#allocation3 + $0x20] sm:$0xff]  ;;  %v595_v45 = vstv %s594_s18 }
  0x61   : > { %2428 = vmatprep.subr.bf16.mxu0 %v2641_v11  ;;  %v2655_v57 = vld [vmem:[%s3404_s5 + $0x138] sm:$0xff]   ;;  %v926_v58 = vpack.c.bf16 %v863_v56, %v854_v55  ;;  %v3241_v0 = vld [vmem:[%s3404_s5 + $0x200] sm:$0xff]   ;;  %v872_v1 = vld [vmem:[#allocation3 + $0xb8] sm:$0xff] }
  0x62   : > { %1647 = vmatmul.mubr.bf16.gmra.mrb[8].mxu1 %v941_v37  ;;  %v2656_v59 = vld [vmem:[%s3404_s5 + $0x1b8] sm:$0xff]   ;;  %v905_v2 = vld [vmem:[#allocation3 + $0x1c0] sm:$0xff]  ;;  %v856_v7 = vld [vmem:[#allocation3 + $0x38] sm:$0xff] }
  0x63   : > { %1582 = vmatmul.mubr.bf16.gmra.mrb[8].mxu0 %v939_v26  ;;  %2469 = vmatpush3.bf16.msra.mxu1 %v2644_v24  ;;  %v862_v63 = vld [vmem:[#allocation3 + $0x68] sm:$0xff]  ;;  %v881_v4 = vld [vmem:[#allocation3 + $0x100] sm:$0xff]  ;;  %v3250_v8 = vld [vmem:[%s3404_s5 + $0x208] sm:$0xff]  }
  0x64   : > { %2429 = vmatpush3.bf16.msra.mxu0 %v2643_v23  ;;  %2470 = vmatprep.subr.bf16.mxu1 %v2646_v30  ;;  %v758_v61 = vld [vmem:[#allocation2 + $0x60] sm:$0xff]  ;;  %v759_v62 = vld [vmem:[#allocation2 + $0x68] sm:$0xff]  ;;  %v925_v3 = vpack.c.bf16 %v862_v63, %v853_v60  ;;  %v914_v5 = vld [vmem:[#allocation3 + $0x208] sm:$0xff]  ;;  %v935_v6 = vpack.c.bf16 %v881_v4, %v872_v1 }
  0x65   : > { %2430 = vmatprep.subr.bf16.mxu0 %v2645_v29  ;;  %1589 = vmatprep.mubr.bf16.mxu0 %v949_v48  ;;  %766 = vst.msk [vmem:[#allocation3 + $0x1c8] sm:$0xff] %vm598_vm0, %v758_v61  ;;  %767 = vst.msk [vmem:[#allocation3 + $0x210] sm:$0xff] %vm598_vm0, %v759_v62  ;;  %v865_v9 = vld [vmem:[#allocation3 + $0x80] sm:$0xff]  ;;  %v821_v10 = vld [vmem:[#allocation2 + $0x61] sm:$0xff]  ;;  %v950_v17 = vpack.c.bf16 %v914_v5, %v905_v2 }
  0x66   : > { %813 = vst.msk [vmem:[#allocation3 + $0x150] sm:$0xff] %vm598_vm0, %v758_v61  ;;  %814 = vst.msk [vmem:[#allocation3 + $0x198] sm:$0xff] %vm598_vm0, %v759_v62  ;;  %v3261_v11 = vld [vmem:[%s3404_s5 + $0x210] sm:$0xff]   ;;  %v871_v12 = vld [vmem:[#allocation3 + $0xb0] sm:$0xff]  ;;  %v928_v20 = vpack.c.bf16 %v865_v9, %v856_v7 }
  0x67   : > { %2471 = vmatpush3.bf16.msra.mxu1 %v2648_v39  ;;  %v880_v13 = vld [vmem:[#allocation3 + $0xf8] sm:$0xff]  ;;  %829 = vst.msk [vmem:[#allocation3 + $0x158] sm:$0xff] %vm598_vm0, %v821_v10  ;;  %782 = vst.msk [vmem:[#allocation3 + $0x1d0] sm:$0xff] %vm598_vm0, %v821_v10  ;;  %v890_v18 = vld [vmem:[#allocation3 + $0x148] sm:$0xff] }
  0x68   : > { %2431 = vmatpush3.bf16.msra.mxu0 %v2647_v38  ;;  %2472 = vmatprep.subr.bf16.mxu1 %v2650_v49  ;;  %v822_v14 = vld [vmem:[#allocation2 + $0x69] sm:$0xff]  ;;  %v899_v21 = vld [vmem:[#allocation3 + $0x190] sm:$0xff]  ;;  %v934_v24 = vpack.c.bf16 %v880_v13, %v871_v12  ;;  %v3282_v29 = vld [vmem:[%s3404_s5 + $0x218] sm:$0xff]  }
  0x69   : > { %2432 = vmatprep.subr.bf16.mxu0 %v2649_v47  ;;  %830 = vst.msk [vmem:[#allocation3 + $0x1a0] sm:$0xff] %vm598_vm0, %v822_v14  ;;  %783 = vst.msk [vmem:[#allocation3 + $0x218] sm:$0xff] %vm598_vm0, %v822_v14  ;;  %v855_v22 = vld [vmem:[#allocation3 + $0x30] sm:$0xff]  ;;  %v864_v23 = vld [vmem:[#allocation3 + $0x78] sm:$0xff]  ;;  %v944_v25 = vpack.c.bf16 %v899_v21, %v890_v18 }
  0x6a   : > { %v2334_v26 = vld [vmem:[%s481_s13] sm:$0xff]   ;;  %v791_v28 = vld [vmem:[#allocation2 + $0x6a] sm:$0xff]  ;;  %v874_v32 = vld [vmem:[#allocation3 + $0xc8] sm:$0xff]  ;;  %v927_v38 = vpack.c.bf16 %v864_v23, %v855_v22 }
  0x6b   : > { %1590 = vmatmul.mubr.bf16.gmra.mrb[12].mxu0 %v948_v50  ;;  %2473 = vmatpush3.bf16.msra.mxu1 %v2652_v52  ;;  %v790_v27 = vld [vmem:[#allocation2 + $0x62] sm:$0xff]  ;;  %v2335_v30 = vunpack.c.l.bf16 %v2334_v26  ;;  %v2336_v31 = vunpack.c.h.bf16 %v2334_v26  ;;  %799 = vst.msk [vmem:[#allocation3 + $0x220] sm:$0xff] %vm598_vm0, %v791_v28  ;;  %846 = vst.msk [vmem:[#allocation3 + $0x1a8] sm:$0xff] %vm598_vm0, %v791_v28  ;;  %v889_v39 = vld [vmem:[#allocation3 + $0x140] sm:$0xff] }
  0x6c   : > { %2433 = vmatpush3.bf16.msra.mxu0 %v2651_v51  ;;  %2474 = vmatprep.subr.bf16.mxu1 %v2654_v54  ;;  %v906_v15 = vld [vmem:[#allocation3 + $0x1c8] sm:$0xff]  ;;  %v915_v16 = vld [vmem:[#allocation3 + $0x210] sm:$0xff]  ;;  %798 = vst.msk [vmem:[#allocation3 + $0x1d8] sm:$0xff] %vm598_vm0, %v790_v27  ;;  %845 = vst.msk [vmem:[#allocation3 + $0x160] sm:$0xff] %vm598_vm0, %v790_v27 }
  0x6d   : > { %2434 = vmatprep.subr.bf16.mxu0 %v2653_v53  ;;  %1695 = vmatprep.mubr.bf16.mxu0 %v926_v58  ;;  %v951_v19 = vpack.c.bf16 %v915_v16, %v906_v15  ;;  %v883_v33 = vld [vmem:[#allocation3 + $0x110] sm:$0xff]  ;;  %v580_v36 = vmul.f32 %v2335_v30, %v3044_v34  ;;  %v581_v37 = vmul.f32 %v2336_v31, %v3044_v34  ;;  %v898_v40 = vld [vmem:[#allocation3 + $0x188] sm:$0xff]  ;;  %v873_v50 = vld [vmem:[#allocation3 + $0xc0] sm:$0xff] }
  0x6e   : > { %v937_v41 = vpack.c.bf16 %v883_v33, %v874_v32  ;;  %v3298_v44 = vld [vmem:[%s3404_s5 + $0x220] sm:$0xff]   ;;  %v943_v34 = vpack.c.bf16 %v898_v40, %v889_v39  ;;  %v882_v51 = vld [vmem:[#allocation3 + $0x108] sm:$0xff]  ;;  %v892_v55 = vld [vmem:[#allocation3 + $0x158] sm:$0xff] }
  0x6f   : > { %2475 = vmatpush3.bf16.msra.mxu1 %v2656_v59  ;;  %1654 = vmatprep.mubr.bf16.mxu1 %v951_v19  ;;  %v582_v42 = vadd.f32 %v3049_v35, %v580_v36  ;;  %v583_v43 = vadd.f32 %v3049_v35, %v581_v37  ;;  %v3305_v35 = vld [vmem:[%s3404_s5 + $0x228] sm:$0xff]   ;;  %v907_v58 = vld [vmem:[#allocation3 + $0x1d0] sm:$0xff]  ;;  %v857_v61 = vld [vmem:[#allocation3 + $0x40] sm:$0xff] }
  0x70   : > { %2435 = vmatpush3.bf16.msra.mxu0 %v2655_v57  ;;  %2536 = vmatprep.subr.bf16.mxu1 %v3241_v0  ;;  %v901_v56 = vld [vmem:[#allocation3 + $0x1a0] sm:$0xff]  ;;  %v936_v57 = vpack.c.bf16 %v882_v51, %v873_v50  ;;  %v916_v59 = vld [vmem:[#allocation3 + $0x218] sm:$0xff]  ;;  %v866_v62 = vld [vmem:[#allocation3 + $0x88] sm:$0xff] }
  0x71   : > { %2512 = vmatprep.subr.bf16.mxu0 %v3241_v0  ;;  %1655 = vmatmul.mubr.bf16.gmra.mrb[12].mxu1 %v950_v17  ;;  %v584_v46 = vmax.f32 %v582_v42, 0.0  ;;  %v585_v47 = vmax.f32 %v583_v43, 0.0  ;;  %v946_v60 = vpack.c.bf16 %v901_v56, %v892_v55  ;;  %v2663_v63 = vld [vmem:[%s3404_s5 + $0x230] sm:$0xff]   ;;  %v929_v1 = vpack.c.bf16 %v866_v62, %v857_v61  ;;  %v891_v2 = vld [vmem:[#allocation3 + $0x150] sm:$0xff]  ;;  %v2664_v4 = vld [vmem:[%s3404_s5 + $0x238] sm:$0xff]  }
  0x72   : > { %1760 = vmatprep.mubr.bf16.mxu1 %v928_v20  ;;  %v917_v49 = vld [vmem:[#allocation3 + $0x220] sm:$0xff]  ;;  %v875_v12 = vld [vmem:[#allocation3 + $0xd0] sm:$0xff]  ;;  %v884_v13 = vld [vmem:[#allocation3 + $0x118] sm:$0xff] }
  0x73   : > { %1696 = vmatmul.mubr.bf16.vlgmr.msra.gmra.mrb[16].mxu0 %v925_v3  ;;  %v908_v48 = vld [vmem:[#allocation3 + $0x1d8] sm:$0xff]  ;;  %v596_v52 = vmul.f32 %v595_v45, %v584_v46  ;;  %v597_v53 = vmul.f32 %v595_v45, %v585_v47  ;;  %v938_v14 = vpack.c.bf16 %v884_v13, %v875_v12  ;;  %v893_v15 = vld [vmem:[#allocation3 + $0x160] sm:$0xff]  ;;  %v902_v16 = vld [vmem:[#allocation3 + $0x1a8] sm:$0xff] }
  0x74   : > { %2513 = vmatpush3.bf16.msra.mxu0 %v3241_v0  ;;  %1703 = vmatprep.mubr.bf16.mxu0 %v935_v6  ;;  %v953_v54 = vpack.c.bf16 %v917_v49, %v908_v48  ;;  %v900_v3 = vld [vmem:[#allocation3 + $0x198] sm:$0xff]  ;;  %v947_v23 = vpack.c.bf16 %v902_v16, %v893_v15 }
  0x75   : > { %2514 = vmatprep.subr.bf16.mxu0 %v3250_v8  ;;  %621 = vst.msk [vmem:[#allocation2 + $0x79] sm:$0xff] %vm598_vm0, %v596_v52  ;;  %622 = vst.msk [vmem:[#allocation2 + $0x81] sm:$0xff] %vm598_vm0, %v597_v53 }
  0x78   : > { %2515 = vmatpush3.bf16.msra.mxu0 %v3250_v8 }
  0x79   : > { %2516 = vmatprep.subr.bf16.mxu0 %v3261_v11  ;;  %1761 = vmatmul.mubr.bf16.vlgmr.msra.gmra.mrb[16].mxu1 %v927_v38 }
  0x7a   : > { %2544 = vmatpush3.bf16.msra.mxu1 %v3241_v0  ;;  %1768 = vmatprep.mubr.bf16.mxu1 %v937_v41  ;;  %v952_v0 = vpack.c.bf16 %v916_v59, %v907_v58 }
  0x7b   : > { %1704 = vmatmul.mubr.bf16.gmra.mrb[20].mxu0 %v934_v24  ;;  %2537 = vmatprep.subr.bf16.mxu1 %v3250_v8 }
  0x7c   : > { %2517 = vmatpush3.bf16.msra.mxu0 %v3261_v11  ;;  %1711 = vmatprep.mubr.bf16.mxu0 %v944_v25  ;;  %v823_v5 = vld [vmem:[#allocation2 + $0x79] sm:$0xff]  ;;  %v824_v6 = vld [vmem:[#allocation2 + $0x81] sm:$0xff] }
  0x7d   : > { %2518 = vmatprep.subr.bf16.mxu0 %v3282_v29  ;;  %v807_v7 = vld [vmem:[#allocation2 + $0x78] sm:$0xff]  ;;  %831 = vst.msk [vmem:[#allocation3 + $0x1e8] sm:$0xff] %vm598_vm0, %v823_v5  ;;  %832 = vst.msk [vmem:[#allocation3 + $0x230] sm:$0xff] %vm598_vm0, %v824_v6  ;;  %v840_v10 = vld [vmem:[#allocation2 + $0x82] sm:$0xff] }
  0x7e   : > { %2545 = vmatpush3.bf16.msra.mxu1 %v3250_v8  ;;  %v808_v8 = vld [vmem:[#allocation2 + $0x80] sm:$0xff]  ;;  %815 = vst.msk [vmem:[#allocation3 + $0x1e0] sm:$0xff] %vm598_vm0, %v807_v7  ;;  %848 = vst.msk [vmem:[#allocation3 + $0x238] sm:$0xff] %vm598_vm0, %v840_v10 }
  0x7f   : > { %2538 = vmatprep.subr.bf16.mxu1 %v3261_v11  ;;  %v839_v9 = vld [vmem:[#allocation2 + $0x7a] sm:$0xff]  ;;  %816 = vst.msk [vmem:[#allocation3 + $0x228] sm:$0xff] %vm598_vm0, %v808_v8 }
  0x80   : > { %2519 = vmatpush3.bf16.msra.mxu0 %v3282_v29  ;;  %847 = vst.msk [vmem:[#allocation3 + $0x1f0] sm:$0xff] %vm598_vm0, %v839_v9 }
  0x81   : > { %2520 = vmatprep.subr.bf16.mxu0 %v3298_v44  ;;  %1769 = vmatmul.mubr.bf16.gmra.mrb[20].mxu1 %v936_v57 }
  0x82   : > { %2546 = vmatpush3.bf16.msra.mxu1 %v3261_v11  ;;  %1776 = vmatprep.mubr.bf16.mxu1 %v946_v60  ;;  %v945_v11 = vpack.c.bf16 %v900_v3, %v891_v2 }
  0x83   : > { %1712 = vmatmul.mubr.bf16.gmra.mrb[24].mxu0 %v943_v34  ;;  %2539 = vmatprep.subr.bf16.mxu1 %v3282_v29 }
  0x84   : > { %2521 = vmatpush3.bf16.msra.mxu0 %v3298_v44  ;;  %1719 = vmatprep.mubr.bf16.mxu0 %v953_v54  ;;  %v910_v17 = vld [vmem:[#allocation3 + $0x1e8] sm:$0xff]  ;;  %v919_v18 = vld [vmem:[#allocation3 + $0x230] sm:$0xff] }
  0x85   : > { %2522 = vmatprep.subr.bf16.mxu0 %v3305_v35  ;;  %v909_v19 = vld [vmem:[#allocation3 + $0x1e0] sm:$0xff]  ;;  %v955_v20 = vpack.c.bf16 %v919_v18, %v910_v17  ;;  %v920_v25 = vld [vmem:[#allocation3 + $0x238] sm:$0xff] }
  0x86   : > { %2547 = vmatpush3.bf16.msra.mxu1 %v3282_v29  ;;  %v918_v21 = vld [vmem:[#allocation3 + $0x228] sm:$0xff] }
  0x87   : > { %2540 = vmatprep.subr.bf16.mxu1 %v3298_v44  ;;  %v954_v22 = vpack.c.bf16 %v918_v21, %v909_v19  ;;  %v911_v24 = vld [vmem:[#allocation3 + $0x1f0] sm:$0xff] }
  0x88   : > { %2523 = vmatpush3.bf16.msra.mxu0 %v3305_v35  ;;  %v956_v26 = vpack.c.bf16 %v920_v25, %v911_v24 }
  0x89   : > { %2524 = vmatprep.subr.bf16.mxu0 %v2663_v63  ;;  %1777 = vmatmul.mubr.bf16.gmra.mrb[24].mxu1 %v945_v11 }
  0x8a   : > { %2548 = vmatpush3.bf16.msra.mxu1 %v3298_v44  ;;  %1784 = vmatprep.mubr.bf16.mxu1 %v955_v20 }
  0x8b   : > { %1720 = vmatmul.mubr.bf16.gmra.mrb[28].mxu0 %v952_v0  ;;  %2541 = vmatprep.subr.bf16.mxu1 %v3305_v35 }
  0x8c   : > { %2525 = vmatpush3.bf16.msra.mxu0 %v2663_v63  ;;  %2528 = vmatprep.mubr.bf16.mxu0 %v929_v1 }
  0x8d   : > { %2526 = vmatprep.subr.bf16.mxu0 %v2664_v4 }
  0x8e   : > { %2549 = vmatpush3.bf16.msra.mxu1 %v3305_v35 }
  0x8f   : > { %2542 = vmatprep.subr.bf16.mxu1 %v2663_v63 }
  0x90   : > { %2527 = vmatpush3.bf16.msra.mxu0 %v2664_v4 }
  0x91   : > { %1785 = vmatmul.mubr.bf16.gmra.mrb[28].mxu1 %v954_v22 }
  0x92   : > { %2550 = vmatpush3.bf16.msra.mxu1 %v2663_v63  ;;  %2532 = vmatprep.mubr.bf16.mxu1 %v947_v23 }
  0x93   : > { %2529 = vmatmul.mubr.bf16.vlgmr.msra.gmra.mrb[32].mxu0 %v938_v14  ;;  %2543 = vmatprep.subr.bf16.mxu1 %v2664_v4 }
  0x96   : > { %2551 = vmatpush3.bf16.msra.mxu1 %v2664_v4 }
  0x99   : > { %2533 = vmatmul.mubr.bf16.vlgmr.msra.gmra.mrb[32].mxu1 %v956_v26 }
 0x125   : > { %v2396_v28 = vpop.f32.mrb[0].mxu1 }
 0x126   : > { %v2356_v27 = vpop.f32.mrb[0].mxu0  ;;  %v2397_v30 = vpop.f32.mrb[1].mxu1 }
 0x127   : > { %v2357_v29 = vpop.f32.mrb[1].mxu0  ;;  %v2398_v32 = vadd.f32 %v2397_v30, %v2396_v28  ;;  %v2399_v36 = vpop.f32.mrb[2].mxu1 }
 0x128   : > { %v2358_v31 = vadd.f32 %v2357_v29, %v2356_v27  ;;  %v2359_v33 = vpop.f32.mrb[2].mxu0  ;;  %v2400_v38 = vpop.f32.mrb[3].mxu1 }
 0x129   : > { %v2360_v37 = vpop.f32.mrb[3].mxu0  ;;  %v2401_v41 = vadd.f32 %v2400_v38, %v2399_v36 }
 0x12a   : > { %v1633_v39 = vadd.f32 %v2398_v32, %v2358_v31  ;;  %v2361_v40 = vadd.f32 %v2360_v37, %v2359_v33 }
 0x12c   : > { %v1636_v42 = vadd.f32 %v2401_v41, %v2361_v40 }
 0x12d   : > { %v2402_v44 = vpop.f32.mrb[4].mxu1 }
 0x12e   : > { %v2362_v43 = vpop.f32.mrb[4].mxu0  ;;  %v2403_v34 = vpop.f32.mrb[5].mxu1 }
 0x12f   : > { %v2363_v45 = vpop.f32.mrb[5].mxu0  ;;  %v2404_v47 = vadd.f32 %v2403_v34, %v2402_v44  ;;  %v2405_v49 = vpop.f32.mrb[6].mxu1 }
 0x130   : > { %v2364_v46 = vadd.f32 %v2363_v45, %v2362_v43  ;;  %v2365_v48 = vpop.f32.mrb[6].mxu0  ;;  %v2406_v51 = vpop.f32.mrb[7].mxu1 }
 0x131   : > { %v2366_v50 = vpop.f32.mrb[7].mxu0  ;;  %v2407_v53 = vadd.f32 %v2406_v51, %v2405_v49 }
 0x132   : > { %v1641_v35 = vadd.f32 %v2404_v47, %v2364_v46  ;;  %v2367_v52 = vadd.f32 %v2366_v50, %v2365_v48 }
 0x134   : > { %v1644_v54 = vadd.f32 %v2407_v53, %v2367_v52 }
 0x135   : > { %v2408_v59 = vpop.f32.mrb[8].mxu1 }
 0x136   : > { %v2368_v55 = vpop.f32.mrb[8].mxu0  ;;  %v2409_v61 = vpop.f32.mrb[9].mxu1 }
 0x137   : > { %v2369_v56 = vpop.f32.mrb[9].mxu0  ;;  %v2410_v63 = vadd.f32 %v2409_v61, %v2408_v59  ;;  %v2411_v0 = vpop.f32.mrb[10].mxu1 }
 0x138   : > { %v2370_v57 = vadd.f32 %v2369_v56, %v2368_v55  ;;  %v2371_v58 = vpop.f32.mrb[10].mxu0  ;;  %v2412_v1 = vpop.f32.mrb[11].mxu1 }
 0x139   : > { %v2372_v60 = vpop.f32.mrb[11].mxu0  ;;  %v2413_v3 = vadd.f32 %v2412_v1, %v2411_v0 }
 0x13a   : > { %v2373_v62 = vadd.f32 %v2372_v60, %v2371_v58  ;;  %v1649_v2 = vadd.f32 %v2410_v63, %v2370_v57 }
 0x13c   : > { %v1652_v5 = vadd.f32 %v2413_v3, %v2373_v62 }
 0x13e   : > { %v2374_v4 = vpop.f32.mrb[12].mxu0 }
 0x13f   : > { %v2375_v6 = vpop.f32.mrb[13].mxu0 }
 0x140   : > { %v2376_v7 = vadd.f32 %v2375_v6, %v2374_v4  ;;  %v2377_v8 = vpop.f32.mrb[14].mxu0 }
 0x141   : > { %v2378_v9 = vpop.f32.mrb[15].mxu0 }
 0x142   : > { %v2379_v10 = vadd.f32 %v2378_v9, %v2377_v8 }
 0x144   : > { %v2414_v18 = vpop.f32.mrb[12].mxu1 }
 0x145   : > { %v2415_v19 = vpop.f32.mrb[13].mxu1 }
 0x146   : > { %v2436_v11 = vpop.f32.mrb[16].mxu0  ;;  %v2416_v21 = vadd.f32 %v2415_v19, %v2414_v18  ;;  %v2417_v22 = vpop.f32.mrb[14].mxu1 }
 0x147   : > { %v2437_v12 = vpop.f32.mrb[17].mxu0  ;;  %v2418_v23 = vpop.f32.mrb[15].mxu1 }
 0x148   : > { %v2438_v13 = vadd.f32 %v2437_v12, %v2436_v11  ;;  %v2439_v14 = vpop.f32.mrb[18].mxu0  ;;  %v1657_v25 = vadd.f32 %v2416_v21, %v2376_v7  ;;  %v2419_v26 = vadd.f32 %v2418_v23, %v2417_v22 }
 0x149   : > { %v2440_v15 = vpop.f32.mrb[19].mxu0 }
 0x14a   : > { %v1698_v16 = vadd.f32 %v2438_v13, %v1633_v39  ;;  %v2441_v17 = vadd.f32 %v2440_v15, %v2439_v14  ;;  %v1660_v30 = vadd.f32 %v2419_v26, %v2379_v10 }
 0x14c   : > { %v1701_v20 = vadd.f32 %v2441_v17, %v1636_v42  ;;  %v2476_v36 = vpop.f32.mrb[16].mxu1 }
 0x14d   : > { %v2477_v37 = vpop.f32.mrb[17].mxu1 }
 0x14e   : > { %v2442_v24 = vpop.f32.mrb[20].mxu0  ;;  %v2478_v39 = vadd.f32 %v2477_v37, %v2476_v36  ;;  %v2479_v40 = vpop.f32.mrb[18].mxu1 }
 0x14f   : > { %v2443_v27 = vpop.f32.mrb[21].mxu0  ;;  %v2480_v41 = vpop.f32.mrb[19].mxu1 }
 0x150   : > { %v2444_v28 = vadd.f32 %v2443_v27, %v2442_v24  ;;  %v2445_v29 = vpop.f32.mrb[22].mxu0  ;;  %v2481_v43 = vadd.f32 %v2480_v41, %v2479_v40  ;;  %v1763_v45 = vadd.f32 %v2478_v39, %v1698_v16 }
 0x151   : > { %v2446_v31 = vpop.f32.mrb[23].mxu0 }
 0x152   : > { %v1706_v32 = vadd.f32 %v2444_v28, %v1641_v35  ;;  %v2447_v33 = vadd.f32 %v2446_v31, %v2445_v29  ;;  %v1766_v48 = vadd.f32 %v2481_v43, %v1701_v20 }
 0x154   : > { %v1709_v38 = vadd.f32 %v2447_v33, %v1644_v54  ;;  %v2482_v51 = vpop.f32.mrb[20].mxu1 }
 0x155   : > { %v2483_v52 = vpop.f32.mrb[21].mxu1 }
 0x156   : > { %v2448_v42 = vpop.f32.mrb[24].mxu0  ;;  %v2484_v53 = vadd.f32 %v2483_v52, %v2482_v51  ;;  %v2485_v55 = vpop.f32.mrb[22].mxu1 }
 0x157   : > { %v2449_v44 = vpop.f32.mrb[25].mxu0  ;;  %v2486_v56 = vpop.f32.mrb[23].mxu1 }
 0x158   : > { %v2450_v34 = vadd.f32 %v2449_v44, %v2448_v42  ;;  %v2451_v46 = vpop.f32.mrb[26].mxu0  ;;  %v2487_v57 = vadd.f32 %v2486_v56, %v2485_v55  ;;  %v1771_v59 = vadd.f32 %v2484_v53, %v1706_v32 }
 0x159   : > { %v2452_v47 = vpop.f32.mrb[27].mxu0 }
 0x15a   : > { %v1714_v49 = vadd.f32 %v2450_v34, %v1649_v2  ;;  %v2453_v50 = vadd.f32 %v2452_v47, %v2451_v46  ;;  %v1774_v63 = vadd.f32 %v2487_v57, %v1709_v38 }
 0x15c   : > { %v1717_v35 = vadd.f32 %v2453_v50, %v1652_v5  ;;  %v2488_v3 = vpop.f32.mrb[24].mxu1 }
 0x15d   : > { %v2489_v2 = vpop.f32.mrb[25].mxu1 }
 0x15e   : > { %v2454_v54 = vpop.f32.mrb[28].mxu0  ;;  %v2490_v6 = vadd.f32 %v2489_v2, %v2488_v3  ;;  %v2491_v7 = vpop.f32.mrb[26].mxu1 }
 0x15f   : > { %v2455_v58 = vpop.f32.mrb[29].mxu0  ;;  %v2492_v5 = vpop.f32.mrb[27].mxu1 }
 0x160   : > { %v2456_v60 = vadd.f32 %v2455_v58, %v2454_v54  ;;  %v2457_v61 = vpop.f32.mrb[30].mxu0  ;;  %v2493_v9 = vadd.f32 %v2492_v5, %v2491_v7  ;;  %v1779_v11 = vadd.f32 %v2490_v6, %v1714_v49 }
 0x161   : > { %v2458_v62 = vpop.f32.mrb[31].mxu0 }
 0x162   : > { %v1722_v0 = vadd.f32 %v2456_v60, %v1657_v25  ;;  %v2459_v1 = vadd.f32 %v2458_v62, %v2457_v61  ;;  %v1782_v19 = vadd.f32 %v2493_v9, %v1717_v35 }
 0x164   : > { %v1725_v4 = vadd.f32 %v2459_v1, %v1660_v30  ;;  %v2494_v20 = vpop.f32.mrb[28].mxu1 }
 0x165   : > { %v2495_v22 = vpop.f32.mrb[29].mxu1 }
 0x166   : > { %v2530_v8 = vpop.f32.mrb[32].mxu0  ;;  %v2496_v25 = vadd.f32 %v2495_v22, %v2494_v20  ;;  %v2497_v26 = vpop.f32.mrb[30].mxu1 }
 0x167   : > { %v1836_v10 = vadd.f32 %v2530_v8, %v1771_v59  ;;  %v1827_v12 = vpop.f32.mrb[33].mxu0  ;;  %v2498_v28 = vpop.f32.mrb[31].mxu1 }
 0x168   : > { %v1828_v13 = vadd.f32 %v1827_v12, %v1763_v45  ;;  %v2531_v14 = vpop.f32.mrb[34].mxu0  ;;  %v2499_v33 = vadd.f32 %v2498_v28, %v2497_v26  ;;  %v1787_v36 = vadd.f32 %v2496_v25, %v1722_v0 }
 0x169   : > { %v2307_v15 = vpack.c.bf16 %v1836_v10, %v1836_v10  ;;  %v1839_v16 = vadd.f32 %v2531_v14, %v1774_v63  ;;  %v1830_v17 = vpop.f32.mrb[35].mxu0  ;;  %v1924_v27 = vmul.f32 %v1836_v10, %v1836_v10  ;;  %v1902_v38 = vsel %vm598_vm0, %v1836_v10, 0.0 }
 0x16a   : > { %v2305_v18 = vpack.c.bf16 %v1828_v13, %v1828_v13  ;;  %v1922_v23 = vmul.f32 %v1828_v13, %v1828_v13  ;;  %v1831_v24 = vadd.f32 %v1830_v17, %v1766_v48  ;;  %v1899_v29 = vsel %vm598_vm0, %v1828_v13, 0.0 }
 0x16b   : > { %1893 = vst.msk [vmem:[%s3340_s17 + $0x8] sm:$0xf] %vm1890_vm2, %v2307_v15  ;;  %v2308_v21 = vpack.c.bf16 %v1839_v16, %v1839_v16  ;;  %v1925_v40 = vmul.f32 %v1839_v16, %v1839_v16  ;;  %v1790_v42 = vadd.f32 %v2499_v33, %v1725_v4  ;;  %v1933_v45 = vsel %vm598_vm0, %v1924_v27, 0.0 }
 0x16c   : > { %1891 = vst.msk [vmem:[%s3340_s17] sm:$0xf] %vm1890_vm2, %v2305_v18  ;;  %v2306_v30 = vpack.c.bf16 %v1831_v24, %v1831_v24  ;;  %v1900_v31 = vsel %vm598_vm0, %v1831_v24, 0.0  ;;  %v1923_v32 = vmul.f32 %v1831_v24, %v1831_v24  ;;  %v1930_v39 = vsel %vm598_vm0, %v1922_v23, 0.0  ;;  %v2534_v46 = vpop.f32.mrb[32].mxu1 }
 0x16d   : > { %1894 = vst.msk [vmem:[%s3340_s17 + $0xc] sm:$0xf] %vm1890_vm2, %v2308_v21  ;;  %v1901_v37 = vadd.f32 %v1900_v31, %v1899_v29  ;;  %v1904_v34 = vsel %vm598_vm0, %v1839_v16, 0.0  ;;  %v1852_v49 = vadd.f32 %v2534_v46, %v1787_v36  ;;  %v1843_v50 = vpop.f32.mrb[33].mxu1  ;;  %v1935_v51 = vsel %vm598_vm0, %v1925_v40, 0.0 }
 0x16e   : > { %1892 = vst.msk [vmem:[%s3340_s17 + $0x4] sm:$0xf] %vm1890_vm2, %v2306_v30  ;;  %v1931_v41 = vsel %vm598_vm0, %v1923_v32, 0.0  ;;  %v1844_v52 = vadd.f32 %v1843_v50, %v1779_v11  ;;  %v2535_v35 = vpop.f32.mrb[34].mxu1 }
 0x16f   : > { %v1903_v43 = vadd.f32 %v1902_v38, %v1901_v37  ;;  %v1932_v44 = vadd.f32 %v1931_v41, %v1930_v39  ;;  %v2311_v55 = vpack.c.bf16 %v1852_v49, %v1852_v49  ;;  %v1855_v56 = vadd.f32 %v2535_v35, %v1790_v42  ;;  %v1846_v54 = vpop.f32.mrb[35].mxu1 }
 0x170   : > { %v2309_v57 = vpack.c.bf16 %v1844_v52, %v1844_v52  ;;  %v1926_v58 = vmul.f32 %v1844_v52, %v1844_v52  ;;  %v1847_v59 = vadd.f32 %v1846_v54, %v1782_v19  ;;  %v1928_v60 = vmul.f32 %v1852_v49, %v1852_v49 }
 0x171   : > { %v1905_v47 = vadd.f32 %v1904_v34, %v1903_v43  ;;  %v1934_v48 = vadd.f32 %v1933_v45, %v1932_v44  ;;  %1897 = vst.msk [vmem:[%s3340_s17 + $0x18] sm:$0xf] %vm1890_vm2, %v2311_v55  ;;  %v2312_v61 = vpack.c.bf16 %v1855_v56, %v1855_v56  ;;  %v1906_v62 = vsel %vm598_vm0, %v1844_v52, 0.0 }
 0x172   : > { %1895 = vst.msk [vmem:[%s3340_s17 + $0x10] sm:$0xf] %vm1890_vm2, %v2309_v57  ;;  %v1937_v63 = vsel %vm598_vm0, %v1926_v58, 0.0  ;;  %v2310_v0 = vpack.c.bf16 %v1847_v59, %v1847_v59  ;;  %v1927_v1 = vmul.f32 %v1847_v59, %v1847_v59  ;;  %v1929_v4 = vmul.f32 %v1855_v56, %v1855_v56 }
 0x173   : > { %v1936_v53 = vadd.f32 %v1935_v51, %v1934_v48  ;;  %1898 = vst.msk [vmem:[%s3340_s17 + $0x1c] sm:$0xf] %vm1890_vm2, %v2312_v61  ;;  %v1907_v3 = vadd.f32 %v1906_v62, %v1905_v47  ;;  %v1908_v6 = vsel %vm598_vm0, %v1847_v59, 0.0  ;;  %v1910_v9 = vsel %vm598_vm0, %v1852_v49, 0.0 }
 0x174   : > { %1896 = vst.msk [vmem:[%s3340_s17 + $0x14] sm:$0xf] %vm1890_vm2, %v2310_v0  ;;  %v1939_v7 = vsel %vm598_vm0, %v1927_v1, 0.0  ;;  %v1941_v10 = vsel %vm598_vm0, %v1928_v60, 0.0  ;;  %v1912_v13 = vsel %vm598_vm0, %v1855_v56, 0.0  ;;  %v1943_v14 = vsel %vm598_vm0, %v1929_v4, 0.0 }
 0x175   : > { %v1938_v2 = vadd.f32 %v1937_v63, %v1936_v53  ;;  %v1909_v5 = vadd.f32 %v1908_v6, %v1907_v3 }
 0x177   : > { %v1940_v8 = vadd.f32 %v1939_v7, %v1938_v2  ;;  %v1911_v11 = vadd.f32 %v1910_v9, %v1909_v5 }
 0x179   : > { %v1942_v12 = vadd.f32 %v1941_v10, %v1940_v8  ;;  %v1913_v15 = vadd.f32 %v1912_v13, %v1911_v11 }
 0x17b   : > { %v1944_v16 = vadd.f32 %v1943_v14, %v1942_v12  ;;  %v1914_v17 = vrot.slane %v1913_v15, 4 }
 0x17d   : > { %v1945_v18 = vrot.slane %v1944_v16, 4  ;;  %v1915_v19 = vadd.f32 %v1914_v17, %v1913_v15 }
 0x17f   : > { %v1946_v20 = vadd.f32 %v1945_v18, %v1944_v16  ;;  %v1916_v21 = vrot.slane %v1915_v19, 2 }
 0x181   : > { %v1947_v22 = vrot.slane %v1946_v20, 2  ;;  %v1917_v23 = vadd.f32 %v1916_v21, %v1915_v19 }
 0x183   : > { %v1948_v24 = vadd.f32 %v1947_v22, %v1946_v20  ;;  %v1918_v25 = vrot.slane %v1917_v23, 1 }
 0x185   : > { %v1949_v26 = vrot.slane %v1948_v24, 1  ;;  %v1919_v27 = vadd.f32 %v1918_v25, %v1917_v23 }
 0x187   : > { %v1950_v28 = vadd.f32 %v1949_v26, %v1948_v24  ;;  %1921 = vst.msk [vmem:[%s503_s11] sm:$0x1] %vm1920_vm3, %v1919_v27 }
 0x189   : > { %1951 = vst.msk [vmem:[%s510_s14] sm:$0x1] %vm1920_vm3, %v1950_v28 }
 0x18a PF: > { %s19_s9 = sadd.s32 1, %s2703_s9   ;;  %s3413_s16 = sld [smem:[#allocation4_spill]] }
 0x18b   : > { %p16_p12 = scmp.ge.s32.totalorder %s19_s9, 10   ;;  %s3414_s27 = smov %s2695_s29 }
 0x18c   : > { %s3415_s28 = smov %s2699_s30  ;;  %s3416_s29 = smov %s3419_s10 }
 0x18d   :  { %18 = sbr.rel (!%p16_p12) target bundleno = 3 (0x3), region = 107 }
 0x190   : > { %s3417_s30 = smov %s3413_s16 }

// kernel: resblock_forward.3
= control target key start
LH: loop header
LB: loop body
LE: loop exit
PB: predicated region body
PF: predicated region fallthrough
CT: control target
= control target key end

     0   :  { %s2635_s21 = smov 0   ;;  %s2637_s22 = smov 0   ;;  %s3228_s0 = inlined_call_operand.vmem [shape: bf16[2,16,16,4], index: 0, kind: input, shape index: {}, may-alias: {0,1,2}]   ;;  %s3229_s1 = inlined_call_operand.vmem [shape: bf16[2,16,16,4], index: 1, kind: input, shape index: {}, may-alias: {0,1,2}]   ;;  %s3230_s2 = inlined_call_operand.vmem [shape: bf16[2,16,16,4], index: 2, kind: input, shape index: {}, may-alias: {0,1,2}]   ;;  %s3231_s3 = inlined_call_operand.vmem [shape: bf16[1152,4], index: 3, kind: input, shape index: {}]   ;;  %s3232_s4 = inlined_call_operand.vmem [shape: bf16[2,16,16,4], index: 4, kind: output, shape index: {0}]   ;;  %s3233_s5 = inlined_call_operand.vmem [shape: f32[2,4,1,4], index: 5, kind: output, shape index: {1}]   ;;  %s3234_s6 = inlined_call_operand.vmem [shape: f32[2,4,1,4], index: 6, kind: output, shape index: {2}]  }
   0x1   :  { %s2639_s23 = smov 0   ;;  %s2641_s24 = smov 0  }
   0x2   :  { %s2643_s25 = smov 0  }
   0x3 LB: > { %s26_s26 = sadd.s32 1, %s2589_s23  ;;  %s29_s27 = sadd.s32 1, %s2593_s24  ;;  %s2597_s25 = sphi %s2643_s25, %s17_s25   ;;  %s2593_s24 = sphi %s2641_s24, %s3239_s24   ;;  %s2589_s23 = sphi %s2639_s23, %s3238_s23   ;;  %s2585_s22 = sphi %s2637_s22, %s3237_s22   ;;  %s2581_s21 = sphi %s2635_s21, %s3236_s21  }
   0x4   : > { %p27_p0 = scmp.ge.s32.totalorder %s26_s26, 4  ;;  %p2081_p1 = scmp.ge.s32.totalorder %s2597_s25, 1 }
   0x5   : > { %p307_p2 = scmp.lt.s32.totalorder %s2597_s25, 9 }
   0x6   : > { %s3241_s26 = smov (%p27_p0, %s26_s26), 0  ;;  %s3243_s27 = smov (!%p27_p0, %s29_s27), %s2593_s24 }
   0x7   : > { %p308_p3 = pnand %p2081_p1, %p307_p2  ;;  %p31_p4 = scmp.ge.s32.totalorder %s3243_s27, 2 }
   0x8   : > { %v2487_v0 = vld [vmem:[%s3231_s3 + $0x40] sm:$0xff] (!%p308_p3)   ;;  %s2671_s30 = sshll.u32 (!%p308_p3), %s2581_s21, 2  ;;  %p388_p5 = scmp.lt.s32.totalorder (!%p308_p3), %s2585_s22, 1  ;;  %v2491_v4 = vld [vmem:[%s3231_s3 + $0x48] sm:$0xff] (!%p308_p3)   ;;  %vm494_vm0 = vcmask (!%p308_p3), 31744   ;;  %v2495_v8 = vld [vmem:[%s3231_s3 + $0x50] sm:$0xff] (!%p308_p3)  }
   0x9   : > { %s3245_s27 = smov (%p31_p4, %s3243_s27), 0  ;;  %311 = sbr.rel (%p308_p3) target bundleno = 394 (0x18a), region = 36 }
   0xa   : > { %v2488_v1 = vld [vmem:[%s3231_s3 + $0xc0] sm:$0xff] (!%p308_p3)   ;;  %2234 = vmatprep.subr.bf16.mxu0 (!%p308_p3), %v2487_v0  ;;  %p390_p6 = scmp.lt.s32.totalorder (!%p308_p3), %s2671_s30, 15  ;;  %v2492_v5 = vld [vmem:[%s3231_s3 + $0xc8] sm:$0xff] (!%p308_p3)   ;;  %v2709_v9 = vld [vmem:[%s3231_s3 + $0xd0] sm:$0xff] (!%p308_p3)   ;;  %vm497_vm1 = vcmask (!%p308_p3), 25600   ;;  %v2599_v11 = vmov (!%p308_p3), 0.0  }
   0xb   : > { %v2489_v2 = vld [vmem:[%s3231_s3] sm:$0xff] (!%p308_p3)   ;;  %2274 = vmatprep.subr.bf16.mxu1 (!%p308_p3), %v2488_v1  ;;  %v2493_v6 = vld [vmem:[%s3231_s3 + $0x8] sm:$0xff] (!%p308_p3)   ;;  %v2714_v10 = vld [vmem:[%s3231_s3 + $0x10] sm:$0xff] (!%p308_p3)   ;;  %499 = vst.msk [vmem:[#allocation2 + $0x18] sm:$0xff] (!%p308_p3), %vm494_vm0, %v2599_v11  ;;  %s2087_s15 = sadd.s32 (!%p308_p3), 4294967295, %s2671_s30  ;;  %s2198_s16 = sadd.s32 (!%p308_p3), 4, %s2671_s30 }
   0xc   : > { %v2490_v3 = vld [vmem:[%s3231_s3 + $0x80] sm:$0xff] (!%p308_p3)   ;;  %2235 = vmatpush3.bf16.msra.mxu0 (!%p308_p3), %v2489_v2  ;;  %v2494_v7 = vld [vmem:[%s3231_s3 + $0x88] sm:$0xff] (!%p308_p3)   ;;  %500 = vst.msk [vmem:[#allocation2 + $0x20] sm:$0xff] (!%p308_p3), %vm494_vm0, %v2599_v11  ;;  %531 = vst [vmem:[#allocation3 + $0x18] sm:$0xff] (!%p308_p3), %v2599_v11  ;;  %p400_p7 = scmp.gt.s32.totalorder (!%p308_p3), %s2087_s15, 0  ;;  %p2088_p8 = scmp.lt.s32.totalorder (!%p308_p3), %s2087_s15, 15 }
   0xd   : > { %2275 = vmatpush3.bf16.msra.mxu1 (!%p308_p3), %v2490_v3  ;;  %2236 = vmatprep.subr.bf16.mxu0 (!%p308_p3), %v2491_v4  ;;  %540 = vst [vmem:[#allocation3 + $0x60] sm:$0xff] (!%p308_p3), %v2599_v11  ;;  %495 = vst.msk [vmem:[#allocation2] sm:$0xff] (!%p308_p3), %vm494_vm0, %v2599_v11  ;;  %v2498_v12 = vld [vmem:[%s3231_s3 + $0x90] sm:$0xff] (!%p308_p3)   ;;  %v2499_v13 = vld [vmem:[%s3231_s3 + $0x58] sm:$0xff] (!%p308_p3)   ;;  %p2856_p9 = scmp.lt.s32.totalorder (!%p308_p3), %s2198_s16, 15  ;;  %p482_p10 = scmp.gt.s32.totalorder (!%p308_p3), %s2581_s21, 0 }
   0xe   : > { %2276 = vmatprep.subr.bf16.mxu1 (!%p308_p3), %v2492_v5  ;;  %496 = vst.msk [vmem:[#allocation2 + $0x8] sm:$0xff] (!%p308_p3), %vm494_vm0, %v2599_v11  ;;  %502 = vst.msk [vmem:[#allocation2 + $0x30] sm:$0xff] (!%p308_p3), %vm494_vm0, %v2599_v11  ;;  %v2500_v14 = vld [vmem:[%s3231_s3 + $0xd8] sm:$0xff] (!%p308_p3)   ;;  %v2503_v17 = vld [vmem:[%s3231_s3 + $0x60] sm:$0xff] (!%p308_p3)   ;;  %p445_p11 = scmp.lt.s32.totalorder (!%p308_p3), %s2581_s21, 3  ;;  %vm1786_vm2 = vcmask (!%p308_p3), 27648  }
   0xf   : > { %503 = vst.msk [vmem:[#allocation2 + $0x38] sm:$0xff] (!%p308_p3), %vm494_vm0, %v2599_v11  ;;  %505 = vst.msk [vmem:[#allocation2 + $0x48] sm:$0xff] (!%p308_p3), %vm494_vm0, %v2599_v11  ;;  %v2501_v15 = vld [vmem:[%s3231_s3 + $0x18] sm:$0xff] (!%p308_p3)   ;;  %v2504_v18 = vld [vmem:[%s3231_s3 + $0xe0] sm:$0xff] (!%p308_p3)   ;;  %vm1816_vm3 = vcmask (!%p308_p3), 24576  }
  0x10   : > { %s3247_s22 = smov (!%p388_p5, %s2585_s22), 1  ;;  %2237 = vmatpush3.bf16.msra.mxu0 %v2493_v6  ;;  %506 = vst.msk [vmem:[#allocation2 + $0x50] sm:$0xff] %vm494_vm0, %v2599_v11  ;;  %508 = vst.msk [vmem:[#allocation2 + $0x60] sm:$0xff] %vm494_vm0, %v2599_v11  ;;  %s3249_s15 = smov (!%p400_p7, %s2087_s15), 0  ;;  %v2502_v16 = vld [vmem:[%s3231_s3 + $0x98] sm:$0xff]   ;;  %v2505_v19 = vld [vmem:[%s3231_s3 + $0x20] sm:$0xff]  }
  0x11   : > { %s2695_s19 = scalar_select %p390_p6, %s2671_s30, 15  ;;  %2277 = vmatpush3.bf16.msra.mxu1 %v2494_v7  ;;  %2238 = vmatprep.subr.bf16.mxu0 %v2495_v8  ;;  %509 = vst.msk [vmem:[#allocation2 + $0x68] sm:$0xff] %vm494_vm0, %v2599_v11  ;;  %511 = vst.msk [vmem:[#allocation2 + $0x78] sm:$0xff] %vm494_vm0, %v2599_v11  ;;  %v2506_v20 = vld [vmem:[%s3231_s3 + $0xa0] sm:$0xff]   ;;  %v2507_v21 = vld [vmem:[%s3231_s3 + $0x68] sm:$0xff]  }
  0x12   : > { %s2704_s8 = sshll.u32 %s3247_s22, 5  ;;  %512 = vst.msk [vmem:[#allocation2 + $0x80] sm:$0xff] %vm494_vm0, %v2599_v11  ;;  %528 = vst [vmem:[#allocation3] sm:$0xff] %v2599_v11  ;;  %2278 = vmatprep.subr.bf16.mxu1 %v2709_v9  ;;  %s3251_s15 = smov (!%p2088_p8, %s3249_s15), 15  ;;  %v2508_v22 = vld [vmem:[%s3231_s3 + $0xe8] sm:$0xff]   ;;  %v2511_v25 = vld [vmem:[%s3231_s3 + $0x70] sm:$0xff]  }
  0x13   : > { %529 = vst [vmem:[#allocation3 + $0x8] sm:$0xff] %v2599_v11  ;;  %530 = vst [vmem:[#allocation3 + $0x10] sm:$0xff] %v2599_v11  ;;  %s2083_s10 = sshll.u32 %s2695_s19, 1  ;;  %s2093_s20 = sshll.u32 %s3251_s15, 1  ;;  %v2509_v23 = vld [vmem:[%s3231_s3 + $0x28] sm:$0xff]   ;;  %v2512_v26 = vld [vmem:[%s3231_s3 + $0xf0] sm:$0xff]  }
  0x14   : > { %532 = vst [vmem:[#allocation3 + $0x20] sm:$0xff] %v2599_v11  ;;  %533 = vst [vmem:[#allocation3 + $0x28] sm:$0xff] %v2599_v11  ;;  %2239 = vmatpush3.bf16.msra.mxu0 %v2714_v10  ;;  %s2864_s9 = sadd.s32 %s2704_s8, %s2083_s10  ;;  %s408_s12 = sadd.s32 %s2093_s20, %s2704_s8  ;;  %v2510_v24 = vld [vmem:[%s3231_s3 + $0xa8] sm:$0xff]   ;;  %v2513_v27 = vld [vmem:[%s3231_s3 + $0x30] sm:$0xff]  }
  0x15   : > { %534 = vst [vmem:[#allocation3 + $0x30] sm:$0xff] %v2599_v11  ;;  %535 = vst [vmem:[#allocation3 + $0x38] sm:$0xff] %v2599_v11  ;;  %2279 = vmatpush3.bf16.msra.mxu1 %v2498_v12  ;;  %2240 = vmatprep.subr.bf16.mxu0 %v2499_v13  ;;  %s3253_s16 = smov (!%p2856_p9, %s2198_s16), 15  ;;  %s2085_s10 = sshll.u32 %s2864_s9, 2  ;;  %v2514_v28 = vld [vmem:[%s3231_s3 + $0xb0] sm:$0xff]   ;;  %v2515_v29 = vld [vmem:[%s3231_s3 + $0x78] sm:$0xff]  }
  0x16   : > { %536 = vst [vmem:[#allocation3 + $0x40] sm:$0xff] %v2599_v11  ;;  %537 = vst [vmem:[#allocation3 + $0x48] sm:$0xff] %v2599_v11  ;;  %2280 = vmatprep.subr.bf16.mxu1 %v2500_v14  ;;  %s3255_s16 = smov (!%p2856_p9, %s3253_s16), 15  ;;  %s2095_s30 = sshll.u32 %s408_s12, 2  ;;  %v2516_v30 = vld [vmem:[%s3231_s3 + $0xf8] sm:$0xff]   ;;  %v2519_v39 = vld [vmem:[%s3231_s3 + $0x140] sm:$0xff]  }
  0x17   : > { %538 = vst [vmem:[#allocation3 + $0x50] sm:$0xff] %v2599_v11  ;;  %539 = vst [vmem:[#allocation3 + $0x58] sm:$0xff] %v2599_v11  ;;  %s2890_s13 = sshll.u32 %s3255_s16, 1  ;;  %s2909_s7 = scalar_lea.vmem %s3228_s0, %s2085_s10  ;;  %v2517_v31 = vld [vmem:[%s3231_s3 + $0x38] sm:$0xff]   ;;  %v2520_v40 = vld [vmem:[%s3231_s3 + $0x1c0] sm:$0xff]  }
  0x18   : > { %541 = vst [vmem:[#allocation3 + $0x68] sm:$0xff] %v2599_v11  ;;  %542 = vst [vmem:[#allocation3 + $0x70] sm:$0xff] %v2599_v11  ;;  %2241 = vmatpush3.bf16.msra.mxu0 %v2501_v15  ;;  %s425_s29 = sadd.s32 %s2890_s13, %s2704_s8  ;;  %s410_s14 = scalar_lea.vmem %s3229_s1, %s2095_s30  ;;  %v2518_v32 = vld [vmem:[%s3231_s3 + $0xb8] sm:$0xff]   ;;  %v2208_v33 = vld [vmem:[%s2909_s7] sm:$0xff]  }
  0x19   : > { %543 = vst [vmem:[#allocation3 + $0x78] sm:$0xff] %v2599_v11  ;;  %544 = vst [vmem:[#allocation3 + $0x80] sm:$0xff] %v2599_v11  ;;  %2281 = vmatpush3.bf16.msra.mxu1 %v2502_v16  ;;  %2242 = vmatprep.subr.bf16.mxu0 %v2503_v17  ;;  %v2224_v34 = vld [vmem:[%s410_s14] sm:$0xff]   ;;  %s483_s28 = scalar_select %p482_p10, 1, 0  ;;  %v2209_v35 = vunpack.c.l.bf16 %v2208_v33  ;;  %v2210_v36 = vunpack.c.h.bf16 %v2208_v33  ;;  %v2231_v44 = vld [vmem:[%s2909_s7 + $0x8] sm:$0xff]  }
  0x1a   : > { %545 = vst [vmem:[#allocation3 + $0x88] sm:$0xff] %v2599_v11  ;;  %546 = vst [vmem:[#allocation3 + $0x90] sm:$0xff] %v2599_v11  ;;  %2282 = vmatprep.subr.bf16.mxu1 %v2504_v18  ;;  %v2225_v37 = vunpack.c.l.bf16 %v2224_v34  ;;  %v2226_v38 = vunpack.c.h.bf16 %v2224_v34  ;;  %v2213_v45 = vunpack.c.l.bf16 %v2231_v44  ;;  %v2214_v46 = vunpack.c.h.bf16 %v2231_v44  ;;  %v2521_v1 = vld [vmem:[%s3231_s3 + $0x100] sm:$0xff]   ;;  %v2523_v7 = vld [vmem:[%s3231_s3 + $0x148] sm:$0xff]   ;;  %s2102_s16 = sshll.u32 %s425_s29, 2  ;;  %s3169_s8 = scalar_lea.vmem %s3232_s4, %s2085_s10 }
  0x1b   : > { %547 = vst [vmem:[#allocation3 + $0x98] sm:$0xff] %v2599_v11  ;;  %548 = vst [vmem:[#allocation3 + $0xa0] sm:$0xff] %v2599_v11  ;;  %s484_s20 = scvt.s32.f32 %s483_s28  ;;  %v2522_v2 = vld [vmem:[%s3231_s3 + $0x180] sm:$0xff]   ;;  %v2524_v14 = vld [vmem:[%s3231_s3 + $0x1c8] sm:$0xff]   ;;  %s427_s29 = scalar_lea.vmem %s3230_s2, %s2102_s16 }
  0x1c   : > { %549 = vst [vmem:[#allocation3 + $0xa8] sm:$0xff] %v2599_v11  ;;  %550 = vst [vmem:[#allocation3 + $0xb0] sm:$0xff] %v2599_v11  ;;  %2243 = vmatpush3.bf16.msra.mxu0 %v2505_v19  ;;  %v2525_v15 = vld [vmem:[%s3231_s3 + $0x108] sm:$0xff]   ;;  %s3257_s21 = smov (!%p445_p11, %s2581_s21), 3  ;;  %s2107_s9 = sshll.u32 %s3247_s22, 2 }
  0x1d   : > { %551 = vst [vmem:[#allocation3 + $0xb8] sm:$0xff] %v2599_v11  ;;  %552 = vst [vmem:[#allocation3 + $0xc0] sm:$0xff] %v2599_v11  ;;  %2283 = vmatpush3.bf16.msra.mxu1 %v2506_v20  ;;  %2244 = vmatprep.subr.bf16.mxu0 %v2507_v21  ;;  %v485_v41 = vstv %s484_s20  ;;  %v2526_v16 = vld [vmem:[%s3231_s3 + $0x188] sm:$0xff]   ;;  %s448_s10 = sadd.s32 %s2107_s9, %s3257_s21 }
  0x1e   : > { %553 = vst [vmem:[#allocation3 + $0xc8] sm:$0xff] %v2599_v11  ;;  %554 = vst [vmem:[#allocation3 + $0xd0] sm:$0xff] %v2599_v11  ;;  %2284 = vmatprep.subr.bf16.mxu1 %v2508_v22  ;;  %v486_v42 = vmul.f32 %v2225_v37, %v485_v41  ;;  %v487_v43 = vmul.f32 %v2226_v38, %v485_v41  ;;  %v2527_v22 = vld [vmem:[%s3231_s3 + $0x150] sm:$0xff]   ;;  %v2531_v38 = vld [vmem:[%s3231_s3 + $0x158] sm:$0xff]   ;;  %s449_s14 = scalar_lea.vmem %s3233_s5, %s448_s10  ;;  %s456_s19 = scalar_lea.vmem %s3234_s6, %s448_s10 }
  0x1f   : > { %555 = vst [vmem:[#allocation3 + $0xd8] sm:$0xff] %v2599_v11  ;;  %556 = vst [vmem:[#allocation3 + $0xe0] sm:$0xff] %v2599_v11  ;;  %v2530_v37 = vld [vmem:[%s3231_s3 + $0x190] sm:$0xff]   ;;  %v2534_v41 = vld [vmem:[%s3231_s3 + $0x198] sm:$0xff]  }
  0x20   : > { %557 = vst [vmem:[#allocation3 + $0xe8] sm:$0xff] %v2599_v11  ;;  %558 = vst [vmem:[#allocation3 + $0xf0] sm:$0xff] %v2599_v11  ;;  %2245 = vmatpush3.bf16.msra.mxu0 %v2509_v23  ;;  %v2528_v23 = vld [vmem:[%s3231_s3 + $0x1d0] sm:$0xff]  }
  0x21   : > { %559 = vst [vmem:[#allocation3 + $0xf8] sm:$0xff] %v2599_v11  ;;  %560 = vst [vmem:[#allocation3 + $0x100] sm:$0xff] %v2599_v11  ;;  %2285 = vmatpush3.bf16.msra.mxu1 %v2510_v24  ;;  %2246 = vmatprep.subr.bf16.mxu0 %v2511_v25  ;;  %v2232_v25 = vld [vmem:[%s2909_s7 + $0x10] sm:$0xff]  }
  0x22   : > { %561 = vst [vmem:[#allocation3 + $0x108] sm:$0xff] %v2599_v11  ;;  %562 = vst [vmem:[#allocation3 + $0x110] sm:$0xff] %v2599_v11  ;;  %2286 = vmatprep.subr.bf16.mxu1 %v2512_v26 }
  0x23   : > { %563 = vst [vmem:[#allocation3 + $0x118] sm:$0xff] %v2599_v11  ;;  %564 = vst [vmem:[#allocation3 + $0x120] sm:$0xff] %v2599_v11 }
  0x24   : > { %565 = vst [vmem:[#allocation3 + $0x128] sm:$0xff] %v2599_v11  ;;  %566 = vst [vmem:[#allocation3 + $0x130] sm:$0xff] %v2599_v11  ;;  %2247 = vmatpush3.bf16.msra.mxu0 %v2513_v27  ;;  %v2217_v27 = vunpack.c.l.bf16 %v2232_v25 }
  0x25   : > { %567 = vst [vmem:[#allocation3 + $0x138] sm:$0xff] %v2599_v11  ;;  %568 = vst [vmem:[#allocation3 + $0x140] sm:$0xff] %v2599_v11  ;;  %2287 = vmatpush3.bf16.msra.mxu1 %v2514_v28  ;;  %2248 = vmatprep.subr.bf16.mxu0 %v2515_v29  ;;  %v2218_v28 = vunpack.c.h.bf16 %v2232_v25 }
  0x26   : > { %569 = vst [vmem:[#allocation3 + $0x148] sm:$0xff] %v2599_v11  ;;  %570 = vst [vmem:[#allocation3 + $0x150] sm:$0xff] %v2599_v11  ;;  %2288 = vmatprep.subr.bf16.mxu1 %v2516_v30 }
  0x27   : > { %571 = vst [vmem:[#allocation3 + $0x158] sm:$0xff] %v2599_v11  ;;  %572 = vst [vmem:[#allocation3 + $0x160] sm:$0xff] %v2599_v11 }
  0x28   : > { %573 = vst [vmem:[#allocation3 + $0x168] sm:$0xff] %v2599_v11  ;;  %574 = vst [vmem:[#allocation3 + $0x170] sm:$0xff] %v2599_v11  ;;  %2249 = vmatpush3.bf16.msra.mxu0 %v2517_v31 }
  0x29   : > { %575 = vst [vmem:[#allocation3 + $0x178] sm:$0xff] %v2599_v11  ;;  %576 = vst [vmem:[#allocation3 + $0x180] sm:$0xff] %v2599_v11  ;;  %2289 = vmatpush3.bf16.msra.mxu1 %v2518_v32  ;;  %2314 = vmatprep.subr.bf16.mxu0 %v2519_v39  ;;  %v2532_v39 = vld [vmem:[%s3231_s3 + $0x1d8] sm:$0xff]  }
  0x2a   : > { %577 = vst [vmem:[#allocation3 + $0x188] sm:$0xff] %v2599_v11  ;;  %578 = vst [vmem:[#allocation3 + $0x190] sm:$0xff] %v2599_v11  ;;  %2354 = vmatprep.subr.bf16.mxu1 %v2520_v40  ;;  %v2533_v40 = vld [vmem:[%s3231_s3 + $0x118] sm:$0xff]  }
  0x2b   : > { %579 = vst [vmem:[#allocation3 + $0x198] sm:$0xff] %v2599_v11  ;;  %580 = vst [vmem:[#allocation3 + $0x1a0] sm:$0xff] %v2599_v11 }
  0x2c   : > { %581 = vst [vmem:[#allocation3 + $0x1a8] sm:$0xff] %v2599_v11  ;;  %582 = vst [vmem:[#allocation3 + $0x1b0] sm:$0xff] %v2599_v11 }
  0x2d   : > { %583 = vst [vmem:[#allocation3 + $0x1b8] sm:$0xff] %v2599_v11  ;;  %584 = vst [vmem:[#allocation3 + $0x1c0] sm:$0xff] %v2599_v11 }
  0x2e   : > { %585 = vst [vmem:[#allocation3 + $0x1c8] sm:$0xff] %v2599_v11  ;;  %586 = vst [vmem:[#allocation3 + $0x1d0] sm:$0xff] %v2599_v11 }
  0x2f   : > { %587 = vst [vmem:[#allocation3 + $0x1d8] sm:$0xff] %v2599_v11  ;;  %588 = vst [vmem:[#allocation3 + $0x1e0] sm:$0xff] %v2599_v11 }
  0x30   : > { %589 = vst [vmem:[#allocation3 + $0x1e8] sm:$0xff] %v2599_v11  ;;  %590 = vst [vmem:[#allocation3 + $0x1f0] sm:$0xff] %v2599_v11 }
  0x31   : > { %591 = vst [vmem:[#allocation3 + $0x1f8] sm:$0xff] %v2599_v11  ;;  %592 = vst [vmem:[#allocation3 + $0x200] sm:$0xff] %v2599_v11 }
  0x32   : > { %593 = vst [vmem:[#allocation3 + $0x208] sm:$0xff] %v2599_v11  ;;  %594 = vst [vmem:[#allocation3 + $0x210] sm:$0xff] %v2599_v11 }
  0x33   : > { %595 = vst [vmem:[#allocation3 + $0x218] sm:$0xff] %v2599_v11  ;;  %596 = vst [vmem:[#allocation3 + $0x220] sm:$0xff] %v2599_v11 }
  0x34   : > { %597 = vst [vmem:[#allocation3 + $0x228] sm:$0xff] %v2599_v11  ;;  %598 = vst [vmem:[#allocation3 + $0x230] sm:$0xff] %v2599_v11 }
  0x35   : > { %599 = vst [vmem:[#allocation3 + $0x238] sm:$0xff] %v2599_v11  ;;  %501 = vst.msk [vmem:[#allocation2 + $0x28] sm:$0x3] %vm497_vm1, %v2599_v11 }
  0x36   : > { %498 = vst.msk [vmem:[#allocation2 + $0x10] sm:$0x3] %vm497_vm1, %v2599_v11  ;;  %504 = vst.msk [vmem:[#allocation2 + $0x40] sm:$0x3] %vm497_vm1, %v2599_v11 }
  0x37   : > { %507 = vst.msk [vmem:[#allocation2 + $0x58] sm:$0x3] %vm497_vm1, %v2599_v11  ;;  %510 = vst.msk [vmem:[#allocation2 + $0x70] sm:$0x3] %vm497_vm1, %v2599_v11 }
  0x38   : > { %513 = vst.msk [vmem:[#allocation2 + $0x88] sm:$0x3] %vm497_vm1, %v2599_v11 }
  0x39   : > { %520 = vst.msk [vmem:[#allocation2 + $0x19] sm:$0xff] %vm494_vm0, %v2209_v35  ;;  %521 = vst.msk [vmem:[#allocation2 + $0x21] sm:$0xff] %vm494_vm0, %v2210_v36  ;;  %v2529_v36 = vld [vmem:[%s3231_s3 + $0x110] sm:$0xff]  }
  0x3a   : > { %514 = vst.msk [vmem:[#allocation2 + $0x1] sm:$0xff] %vm494_vm0, %v486_v42  ;;  %515 = vst.msk [vmem:[#allocation2 + $0x9] sm:$0xff] %vm494_vm0, %v487_v43  ;;  %v2535_v42 = vld [vmem:[%s3231_s3 + $0x160] sm:$0xff]  }
  0x3b   : > { %522 = vst.msk [vmem:[#allocation2 + $0x31] sm:$0xff] %vm494_vm0, %v2213_v45  ;;  %523 = vst.msk [vmem:[#allocation2 + $0x39] sm:$0xff] %vm494_vm0, %v2214_v46 }
  0x3c   : > { %524 = vst.msk [vmem:[#allocation2 + $0x49] sm:$0xff] %vm494_vm0, %v2217_v27  ;;  %525 = vst.msk [vmem:[#allocation2 + $0x51] sm:$0xff] %vm494_vm0, %v2218_v28 }
  0x40   : > { %v648_v47 = vld [vmem:[#allocation2 + $0x18] sm:$0xff]  ;;  %v649_v48 = vld [vmem:[#allocation2 + $0x20] sm:$0xff] }
  0x41   : > { %v618_v49 = vld [vmem:[#allocation2 + $0x19] sm:$0xff]  ;;  %656 = vst.msk [vmem:[#allocation3 + $0x18] sm:$0xff] %vm494_vm0, %v648_v47  ;;  %657 = vst.msk [vmem:[#allocation3 + $0x60] sm:$0xff] %vm494_vm0, %v649_v48  ;;  %v619_v50 = vld [vmem:[#allocation2 + $0x21] sm:$0xff] }
  0x42   : > { %626 = vst.msk [vmem:[#allocation3 + $0x98] sm:$0xff] %vm494_vm0, %v618_v49  ;;  %v634_v51 = vld [vmem:[#allocation2 + $0x1a] sm:$0xff]  ;;  %v635_v52 = vld [vmem:[#allocation2 + $0x22] sm:$0xff]  ;;  %610 = vst.msk [vmem:[#allocation3 + $0x90] sm:$0xff] %vm494_vm0, %v648_v47 }
  0x43   : > { %611 = vst.msk [vmem:[#allocation3 + $0xd8] sm:$0xff] %vm494_vm0, %v649_v48  ;;  %672 = vst.msk [vmem:[#allocation3 + $0x20] sm:$0xff] %vm494_vm0, %v618_v49  ;;  %v616_v53 = vld [vmem:[#allocation2 + $0x1] sm:$0xff]  ;;  %v617_v54 = vld [vmem:[#allocation2 + $0x9] sm:$0xff] }
  0x44   : > { %627 = vst.msk [vmem:[#allocation3 + $0xe0] sm:$0xff] %vm494_vm0, %v619_v50  ;;  %642 = vst.msk [vmem:[#allocation3 + $0xa0] sm:$0xff] %vm494_vm0, %v634_v51  ;;  %v632_v55 = vld [vmem:[#allocation2 + $0x2] sm:$0xff]  ;;  %v633_v56 = vld [vmem:[#allocation2 + $0xa] sm:$0xff] }
  0x45   : > { %643 = vst.msk [vmem:[#allocation3 + $0xe8] sm:$0xff] %vm494_vm0, %v635_v52  ;;  %688 = vst.msk [vmem:[#allocation3 + $0x28] sm:$0xff] %vm494_vm0, %v634_v51  ;;  %v600_v57 = vld [vmem:[#allocation2] sm:$0xff]  ;;  %v601_v58 = vld [vmem:[#allocation2 + $0x8] sm:$0xff] }
  0x46   : > { %689 = vst.msk [vmem:[#allocation3 + $0x70] sm:$0xff] %vm494_vm0, %v635_v52  ;;  %673 = vst.msk [vmem:[#allocation3 + $0x68] sm:$0xff] %vm494_vm0, %v619_v50  ;;  %v650_v61 = vld [vmem:[#allocation2 + $0x30] sm:$0xff]  ;;  %v651_v63 = vld [vmem:[#allocation2 + $0x38] sm:$0xff] }
  0x47   : > { %624 = vst.msk [vmem:[#allocation3 + $0x8] sm:$0xff] %vm494_vm0, %v616_v53  ;;  %625 = vst.msk [vmem:[#allocation3 + $0x50] sm:$0xff] %vm494_vm0, %v617_v54  ;;  %v620_v29 = vld [vmem:[#allocation2 + $0x31] sm:$0xff]  ;;  %v621_v30 = vld [vmem:[#allocation2 + $0x39] sm:$0xff] }
  0x48   : > { %640 = vst.msk [vmem:[#allocation3 + $0x10] sm:$0xff] %vm494_vm0, %v632_v55  ;;  %641 = vst.msk [vmem:[#allocation3 + $0x58] sm:$0xff] %vm494_vm0, %v633_v56  ;;  %v748_v59 = vld [vmem:[#allocation3 + $0x18] sm:$0xff]  ;;  %v757_v60 = vld [vmem:[#allocation3 + $0x60] sm:$0xff] }
  0x49   : > { %608 = vst.msk [vmem:[#allocation3] sm:$0xff] %vm494_vm0, %v600_v57  ;;  %609 = vst.msk [vmem:[#allocation3 + $0x48] sm:$0xff] %vm494_vm0, %v601_v58  ;;  %v820_v62 = vpack.c.bf16 %v757_v60, %v748_v59  ;;  %v764_v0 = vld [vmem:[#allocation3 + $0x98] sm:$0xff]  ;;  %v763_v20 = vld [vmem:[#allocation3 + $0x90] sm:$0xff] }
  0x4a   : > { %658 = vst.msk [vmem:[#allocation3 + $0xa8] sm:$0xff] %vm494_vm0, %v650_v61  ;;  %612 = vst.msk [vmem:[#allocation3 + $0x120] sm:$0xff] %vm494_vm0, %v650_v61  ;;  %v772_v24 = vld [vmem:[#allocation3 + $0xd8] sm:$0xff]  ;;  %v636_v32 = vld [vmem:[#allocation2 + $0x32] sm:$0xff] }
  0x4b   : > { %705 = vst.msk [vmem:[#allocation3 + $0x30] sm:$0xff] %vm494_vm0, %v650_v61  ;;  %659 = vst.msk [vmem:[#allocation3 + $0xf0] sm:$0xff] %vm494_vm0, %v651_v63  ;;  %1526 = vmatprep.mubr.bf16.mxu1 %v820_v62  ;;  %v773_v3 = vld [vmem:[#allocation3 + $0xe0] sm:$0xff]  ;;  %v637_v33 = vld [vmem:[#allocation2 + $0x3a] sm:$0xff]  ;;  %v826_v35 = vpack.c.bf16 %v772_v24, %v763_v20 }
  0x4c   : > { %613 = vst.msk [vmem:[#allocation3 + $0x168] sm:$0xff] %vm494_vm0, %v651_v63  ;;  %706 = vst.msk [vmem:[#allocation3 + $0x78] sm:$0xff] %vm494_vm0, %v651_v63  ;;  %v827_v17 = vpack.c.bf16 %v773_v3, %v764_v0  ;;  %v765_v18 = vld [vmem:[#allocation3 + $0xa0] sm:$0xff]  ;;  %v774_v19 = vld [vmem:[#allocation3 + $0xe8] sm:$0xff] }
  0x4d   : > { %628 = vst.msk [vmem:[#allocation3 + $0x128] sm:$0xff] %vm494_vm0, %v620_v29  ;;  %629 = vst.msk [vmem:[#allocation3 + $0x170] sm:$0xff] %vm494_vm0, %v621_v30  ;;  %v828_v34 = vpack.c.bf16 %v774_v19, %v765_v18  ;;  %v652_v47 = vld [vmem:[#allocation2 + $0x48] sm:$0xff]  ;;  %v653_v48 = vld [vmem:[#allocation2 + $0x50] sm:$0xff] }
  0x4e   : > { %v746_v4 = vld [vmem:[#allocation3 + $0x8] sm:$0xff]  ;;  %v755_v5 = vld [vmem:[#allocation3 + $0x50] sm:$0xff]  ;;  %721 = vst.msk [vmem:[#allocation3 + $0x38] sm:$0xff] %vm494_vm0, %v620_v29  ;;  %722 = vst.msk [vmem:[#allocation3 + $0x80] sm:$0xff] %vm494_vm0, %v621_v30 }
  0x4f   : > { %v747_v6 = vld [vmem:[#allocation3 + $0x10] sm:$0xff]  ;;  %v818_v8 = vpack.c.bf16 %v755_v5, %v746_v4  ;;  %v756_v9 = vld [vmem:[#allocation3 + $0x58] sm:$0xff]  ;;  %674 = vst.msk [vmem:[#allocation3 + $0xb0] sm:$0xff] %vm494_vm0, %v620_v29  ;;  %675 = vst.msk [vmem:[#allocation3 + $0xf8] sm:$0xff] %vm494_vm0, %v621_v30 }
  0x50   : > { %v745_v10 = vld [vmem:[#allocation3] sm:$0xff]  ;;  %v754_v11 = vld [vmem:[#allocation3 + $0x48] sm:$0xff]  ;;  %v819_v12 = vpack.c.bf16 %v756_v9, %v747_v6  ;;  %644 = vst.msk [vmem:[#allocation3 + $0x130] sm:$0xff] %vm494_vm0, %v636_v32  ;;  %645 = vst.msk [vmem:[#allocation3 + $0x178] sm:$0xff] %vm494_vm0, %v637_v33 }
  0x51   : > { %v817_v13 = vpack.c.bf16 %v754_v11, %v745_v10  ;;  %1461 = vmatprep.mubr.bf16.mxu0 %v818_v8  ;;  %v766_v21 = vld [vmem:[#allocation3 + $0xa8] sm:$0xff]  ;;  %690 = vst.msk [vmem:[#allocation3 + $0xb8] sm:$0xff] %vm494_vm0, %v636_v32  ;;  %691 = vst.msk [vmem:[#allocation3 + $0x100] sm:$0xff] %vm494_vm0, %v637_v33  ;;  %v781_v43 = vld [vmem:[#allocation3 + $0x120] sm:$0xff] }
  0x52   : > { %1527 = vmatmul.mubr.bf16.vlgmr.msra.gmra.mrb[0].mxu1 %v819_v12  ;;  %v775_v26 = vld [vmem:[#allocation3 + $0xf0] sm:$0xff]  ;;  %737 = vst.msk [vmem:[#allocation3 + $0x40] sm:$0xff] %vm494_vm0, %v636_v32  ;;  %738 = vst.msk [vmem:[#allocation3 + $0x88] sm:$0xff] %vm494_vm0, %v637_v33  ;;  %v2539_v54 = vld [vmem:[%s3231_s3 + $0x168] sm:$0xff]  }
  0x53   : > { %1462 = vmatmul.mubr.bf16.vlgmr.msra.gmra.mrb[0].mxu0 %v817_v13  ;;  %2355 = vmatpush3.bf16.msra.mxu1 %v2522_v2  ;;  %v829_v31 = vpack.c.bf16 %v775_v26, %v766_v21  ;;  %v790_v46 = vld [vmem:[#allocation3 + $0x168] sm:$0xff]  ;;  %v2536_v50 = vld [vmem:[%s3231_s3 + $0x1e0] sm:$0xff]   ;;  %660 = vst.msk [vmem:[#allocation3 + $0x138] sm:$0xff] %vm494_vm0, %v652_v47  ;;  %661 = vst.msk [vmem:[#allocation3 + $0x180] sm:$0xff] %vm494_vm0, %v653_v48 }
  0x54   : > { %2315 = vmatpush3.bf16.msra.mxu0 %v2521_v1  ;;  %2356 = vmatprep.subr.bf16.mxu1 %v2524_v14  ;;  %v782_v44 = vld [vmem:[#allocation3 + $0x128] sm:$0xff]  ;;  %v791_v45 = vld [vmem:[#allocation3 + $0x170] sm:$0xff]  ;;  %614 = vst.msk [vmem:[#allocation3 + $0x1b0] sm:$0xff] %vm494_vm0, %v652_v47  ;;  %615 = vst.msk [vmem:[#allocation3 + $0x1f8] sm:$0xff] %vm494_vm0, %v653_v48  ;;  %v835_v53 = vpack.c.bf16 %v790_v46, %v781_v43 }
  0x55   : > { %2316 = vmatprep.subr.bf16.mxu0 %v2523_v7  ;;  %1469 = vmatprep.mubr.bf16.mxu0 %v827_v17  ;;  %v836_v49 = vpack.c.bf16 %v791_v45, %v782_v44  ;;  %v2537_v51 = vld [vmem:[%s3231_s3 + $0x120] sm:$0xff]   ;;  %707 = vst.msk [vmem:[#allocation3 + $0xc0] sm:$0xff] %vm494_vm0, %v652_v47  ;;  %708 = vst.msk [vmem:[#allocation3 + $0x108] sm:$0xff] %vm494_vm0, %v653_v48  ;;  %v2540_v55 = vld [vmem:[%s3231_s3 + $0x1e8] sm:$0xff]  }
  0x56   : > { %1534 = vmatprep.mubr.bf16.mxu1 %v829_v31  ;;  %v2538_v52 = vld [vmem:[%s3231_s3 + $0x1a0] sm:$0xff]   ;;  %v2233_v57 = vld [vmem:[%s2909_s7 + $0x18] sm:$0xff]   ;;  %v622_v58 = vld [vmem:[#allocation2 + $0x49] sm:$0xff]  ;;  %s3103_s7 = scalar_select %p445_p11, 1, 0 }
  0x57   : > { %2357 = vmatpush3.bf16.msra.mxu1 %v2526_v16  ;;  %v783_v56 = vld [vmem:[#allocation3 + $0x130] sm:$0xff]  ;;  %v2221_v59 = vunpack.c.l.bf16 %v2233_v57  ;;  %v2222_v60 = vunpack.c.h.bf16 %v2233_v57  ;;  %v623_v61 = vld [vmem:[#allocation2 + $0x51] sm:$0xff]  ;;  %630 = vst.msk [vmem:[#allocation3 + $0x1b8] sm:$0xff] %vm494_vm0, %v622_v58  ;;  %723 = vst.msk [vmem:[#allocation3 + $0xc8] sm:$0xff] %vm494_vm0, %v622_v58 }
  0x58   : > { %2317 = vmatpush3.bf16.msra.mxu0 %v2525_v15  ;;  %2358 = vmatprep.subr.bf16.mxu1 %v2528_v23  ;;  %v638_v62 = vld [vmem:[#allocation2 + $0x4a] sm:$0xff]  ;;  %v639_v63 = vld [vmem:[#allocation2 + $0x52] sm:$0xff]  ;;  %676 = vst.msk [vmem:[#allocation3 + $0x140] sm:$0xff] %vm494_vm0, %v622_v58  ;;  %631 = vst.msk [vmem:[#allocation3 + $0x200] sm:$0xff] %vm494_vm0, %v623_v61  ;;  %s490_s11 = scvt.s32.f32 %s3103_s7 }
  0x59   : > { %2318 = vmatprep.subr.bf16.mxu0 %v2527_v22  ;;  %v792_v0 = vld [vmem:[#allocation3 + $0x178] sm:$0xff]  ;;  %646 = vst.msk [vmem:[#allocation3 + $0x1c0] sm:$0xff] %vm494_vm0, %v638_v62  ;;  %647 = vst.msk [vmem:[#allocation3 + $0x208] sm:$0xff] %vm494_vm0, %v639_v63  ;;  %v2543_v3 = vld [vmem:[%s3231_s3 + $0x170] sm:$0xff]  }
  0x5a   : > { %1535 = vmatmul.mubr.bf16.gmra.mrb[4].mxu1 %v828_v34  ;;  %724 = vst.msk [vmem:[#allocation3 + $0x110] sm:$0xff] %vm494_vm0, %v623_v61  ;;  %692 = vst.msk [vmem:[#allocation3 + $0x148] sm:$0xff] %vm494_vm0, %v638_v62  ;;  %v2541_v1 = vld [vmem:[%s3231_s3 + $0x128] sm:$0xff]   ;;  %v793_v5 = vld [vmem:[#allocation3 + $0x180] sm:$0xff]  ;;  %v837_v6 = vpack.c.bf16 %v792_v0, %v783_v56 }
  0x5b   : > { %1470 = vmatmul.mubr.bf16.gmra.mrb[4].mxu0 %v826_v35  ;;  %2359 = vmatpush3.bf16.msra.mxu1 %v2530_v37  ;;  %693 = vst.msk [vmem:[#allocation3 + $0x190] sm:$0xff] %vm494_vm0, %v639_v63  ;;  %677 = vst.msk [vmem:[#allocation3 + $0x188] sm:$0xff] %vm494_vm0, %v623_v61  ;;  %v2542_v2 = vld [vmem:[%s3231_s3 + $0x1a8] sm:$0xff]   ;;  %v799_v7 = vld [vmem:[#allocation3 + $0x1b0] sm:$0xff] }
  0x5c   : > { %2319 = vmatpush3.bf16.msra.mxu0 %v2529_v36  ;;  %2360 = vmatprep.subr.bf16.mxu1 %v2532_v39  ;;  %739 = vst.msk [vmem:[#allocation3 + $0xd0] sm:$0xff] %vm494_vm0, %v638_v62  ;;  %740 = vst.msk [vmem:[#allocation3 + $0x118] sm:$0xff] %vm494_vm0, %v639_v63  ;;  %v784_v4 = vld [vmem:[#allocation3 + $0x138] sm:$0xff]  ;;  %v2544_v10 = vld [vmem:[%s3231_s3 + $0x1f0] sm:$0xff]  }
  0x5d   : > { %2320 = vmatprep.subr.bf16.mxu0 %v2531_v38  ;;  %1477 = vmatprep.mubr.bf16.mxu0 %v836_v49  ;;  %526 = vst.msk [vmem:[#allocation2 + $0x61] sm:$0xff] %vm494_vm0, %v2221_v59  ;;  %527 = vst.msk [vmem:[#allocation2 + $0x69] sm:$0xff] %vm494_vm0, %v2222_v60  ;;  %v838_v8 = vpack.c.bf16 %v793_v5, %v784_v4  ;;  %v808_v9 = vld [vmem:[#allocation3 + $0x1f8] sm:$0xff]  ;;  %v2545_v12 = vld [vmem:[%s3231_s3 + $0x130] sm:$0xff]   ;;  %v491_v59 = vstv %s490_s11 }
  0x5e   : > { %v800_v11 = vld [vmem:[#allocation3 + $0x1b8] sm:$0xff]  ;;  %v844_v14 = vpack.c.bf16 %v808_v9, %v799_v7  ;;  %v2546_v15 = vld [vmem:[%s3231_s3 + $0x1b0] sm:$0xff]   ;;  %v2547_v16 = vld [vmem:[%s3231_s3 + $0x178] sm:$0xff]  }
  0x5f   : > { %2361 = vmatpush3.bf16.msra.mxu1 %v2534_v41  ;;  %1542 = vmatprep.mubr.bf16.mxu1 %v838_v8  ;;  %v809_v13 = vld [vmem:[#allocation3 + $0x200] sm:$0xff]  ;;  %v2548_v20 = vld [vmem:[%s3231_s3 + $0x1f8] sm:$0xff]   ;;  %v752_v25 = vld [vmem:[#allocation3 + $0x38] sm:$0xff] }
  0x60   : > { %2321 = vmatpush3.bf16.msra.mxu0 %v2533_v40  ;;  %2362 = vmatprep.subr.bf16.mxu1 %v2536_v50  ;;  %v845_v19 = vpack.c.bf16 %v809_v13, %v800_v11  ;;  %v2549_v21 = vld [vmem:[%s3231_s3 + $0x138] sm:$0xff]   ;;  %v801_v22 = vld [vmem:[#allocation3 + $0x1c0] sm:$0xff]  ;;  %v759_v27 = vld [vmem:[#allocation3 + $0x70] sm:$0xff] }
  0x61   : > { %2322 = vmatprep.subr.bf16.mxu0 %v2535_v42  ;;  %v810_v23 = vld [vmem:[#allocation3 + $0x208] sm:$0xff]  ;;  %v761_v28 = vld [vmem:[#allocation3 + $0x80] sm:$0xff]  ;;  %v3091_v30 = vld [vmem:[%s3231_s3 + $0x200] sm:$0xff]  }
  0x62   : > { %1543 = vmatmul.mubr.bf16.gmra.mrb[8].mxu1 %v837_v6  ;;  %v2550_v24 = vld [vmem:[%s3231_s3 + $0x1b8] sm:$0xff]   ;;  %v749_v31 = vld [vmem:[#allocation3 + $0x20] sm:$0xff]  ;;  %v846_v36 = vpack.c.bf16 %v810_v23, %v801_v22  ;;  %v824_v38 = vpack.c.bf16 %v761_v28, %v752_v25  ;;  %v3099_v39 = vld [vmem:[%s3231_s3 + $0x208] sm:$0xff]  }
  0x63   : > { %1478 = vmatmul.mubr.bf16.gmra.mrb[8].mxu0 %v835_v53  ;;  %2363 = vmatpush3.bf16.msra.mxu1 %v2538_v52  ;;  %v750_v26 = vld [vmem:[#allocation3 + $0x28] sm:$0xff]  ;;  %v768_v40 = vld [vmem:[#allocation3 + $0xb8] sm:$0xff]  ;;  %v777_v41 = vld [vmem:[#allocation3 + $0x100] sm:$0xff] }
  0x64   : > { %2323 = vmatpush3.bf16.msra.mxu0 %v2537_v51  ;;  %2364 = vmatprep.subr.bf16.mxu1 %v2540_v55  ;;  %v654_v17 = vld [vmem:[#allocation2 + $0x60] sm:$0xff]  ;;  %v655_v18 = vld [vmem:[#allocation2 + $0x68] sm:$0xff]  ;;  %v822_v29 = vpack.c.bf16 %v759_v27, %v750_v26  ;;  %v758_v32 = vld [vmem:[#allocation3 + $0x68] sm:$0xff]  ;;  %v831_v42 = vpack.c.bf16 %v777_v41, %v768_v40 }
  0x65   : > { %2324 = vmatprep.subr.bf16.mxu0 %v2539_v54  ;;  %662 = vst.msk [vmem:[#allocation3 + $0x1c8] sm:$0xff] %vm494_vm0, %v654_v17  ;;  %663 = vst.msk [vmem:[#allocation3 + $0x210] sm:$0xff] %vm494_vm0, %v655_v18  ;;  %1485 = vmatprep.mubr.bf16.mxu0 %v845_v19  ;;  %v821_v33 = vpack.c.bf16 %v758_v32, %v749_v31  ;;  %v751_v43 = vld [vmem:[#allocation3 + $0x30] sm:$0xff]  ;;  %v760_v44 = vld [vmem:[#allocation3 + $0x78] sm:$0xff] }
  0x66   : > { %709 = vst.msk [vmem:[#allocation3 + $0x150] sm:$0xff] %vm494_vm0, %v654_v17  ;;  %710 = vst.msk [vmem:[#allocation3 + $0x198] sm:$0xff] %vm494_vm0, %v655_v18  ;;  %v767_v45 = vld [vmem:[#allocation3 + $0xb0] sm:$0xff]  ;;  %v776_v46 = vld [vmem:[#allocation3 + $0xf8] sm:$0xff]  ;;  %v823_v53 = vpack.c.bf16 %v760_v44, %v751_v43 }
  0x67   : > { %2365 = vmatpush3.bf16.msra.mxu1 %v2542_v2  ;;  %v3113_v47 = vld [vmem:[%s3231_s3 + $0x210] sm:$0xff]   ;;  %v717_v48 = vld [vmem:[#allocation2 + $0x61] sm:$0xff]  ;;  %v770_v50 = vld [vmem:[#allocation3 + $0xc8] sm:$0xff]  ;;  %v830_v52 = vpack.c.bf16 %v776_v46, %v767_v45 }
  0x68   : > { %2325 = vmatpush3.bf16.msra.mxu0 %v2541_v1  ;;  %2366 = vmatprep.subr.bf16.mxu1 %v2544_v10  ;;  %v718_v49 = vld [vmem:[#allocation2 + $0x69] sm:$0xff]  ;;  %v779_v51 = vld [vmem:[#allocation3 + $0x110] sm:$0xff]  ;;  %725 = vst.msk [vmem:[#allocation3 + $0x158] sm:$0xff] %vm494_vm0, %v717_v48  ;;  %678 = vst.msk [vmem:[#allocation3 + $0x1d0] sm:$0xff] %vm494_vm0, %v717_v48 }
  0x69   : > { %2326 = vmatprep.subr.bf16.mxu0 %v2543_v3  ;;  %726 = vst.msk [vmem:[#allocation3 + $0x1a0] sm:$0xff] %vm494_vm0, %v718_v49  ;;  %679 = vst.msk [vmem:[#allocation3 + $0x218] sm:$0xff] %vm494_vm0, %v718_v49  ;;  %v786_v54 = vld [vmem:[#allocation3 + $0x148] sm:$0xff]  ;;  %v795_v55 = vld [vmem:[#allocation3 + $0x190] sm:$0xff]  ;;  %v833_v56 = vpack.c.bf16 %v779_v51, %v770_v50 }
  0x6a   : > { %v3128_v57 = vld [vmem:[%s3231_s3 + $0x218] sm:$0xff]   ;;  %v2228_v58 = vld [vmem:[%s427_s29] sm:$0xff]   ;;  %v687_v61 = vld [vmem:[#allocation2 + $0x6a] sm:$0xff]  ;;  %v840_v62 = vpack.c.bf16 %v795_v55, %v786_v54 }
  0x6b   : > { %1486 = vmatmul.mubr.bf16.gmra.mrb[12].mxu0 %v844_v14  ;;  %2367 = vmatpush3.bf16.msra.mxu1 %v2546_v15  ;;  %v686_v60 = vld [vmem:[#allocation2 + $0x62] sm:$0xff]  ;;  %v785_v63 = vld [vmem:[#allocation3 + $0x140] sm:$0xff]  ;;  %v2229_v0 = vunpack.c.l.bf16 %v2228_v58  ;;  %v2230_v1 = vunpack.c.h.bf16 %v2228_v58  ;;  %695 = vst.msk [vmem:[#allocation3 + $0x220] sm:$0xff] %vm494_vm0, %v687_v61  ;;  %742 = vst.msk [vmem:[#allocation3 + $0x1a8] sm:$0xff] %vm494_vm0, %v687_v61 }
  0x6c   : > { %2327 = vmatpush3.bf16.msra.mxu0 %v2545_v12  ;;  %2368 = vmatprep.subr.bf16.mxu1 %v2548_v20  ;;  %v802_v34 = vld [vmem:[#allocation3 + $0x1c8] sm:$0xff]  ;;  %v811_v35 = vld [vmem:[#allocation3 + $0x210] sm:$0xff]  ;;  %694 = vst.msk [vmem:[#allocation3 + $0x1d8] sm:$0xff] %vm494_vm0, %v686_v60  ;;  %741 = vst.msk [vmem:[#allocation3 + $0x160] sm:$0xff] %vm494_vm0, %v686_v60 }
  0x6d   : > { %2328 = vmatprep.subr.bf16.mxu0 %v2547_v16  ;;  %1591 = vmatprep.mubr.bf16.mxu0 %v822_v29  ;;  %v847_v37 = vpack.c.bf16 %v811_v35, %v802_v34  ;;  %v794_v2 = vld [vmem:[#allocation3 + $0x188] sm:$0xff]  ;;  %v769_v3 = vld [vmem:[#allocation3 + $0xc0] sm:$0xff]  ;;  %v2555_v5 = vld [vmem:[%s3231_s3 + $0x220] sm:$0xff]   ;;  %v492_v6 = vmul.f32 %v2229_v0, %v491_v59  ;;  %v493_v7 = vmul.f32 %v2230_v1, %v491_v59 }
  0x6e   : > { %v778_v4 = vld [vmem:[#allocation3 + $0x108] sm:$0xff]  ;;  %v839_v10 = vpack.c.bf16 %v794_v2, %v785_v63  ;;  %v2556_v13 = vld [vmem:[%s3231_s3 + $0x228] sm:$0xff]   ;;  %v787_v16 = vld [vmem:[#allocation3 + $0x150] sm:$0xff] }
  0x6f   : > { %2369 = vmatpush3.bf16.msra.mxu1 %v2550_v24  ;;  %1550 = vmatprep.mubr.bf16.mxu1 %v847_v37  ;;  %v788_v8 = vld [vmem:[#allocation3 + $0x158] sm:$0xff]  ;;  %517 = vst.msk [vmem:[#allocation2 + $0x79] sm:$0xff] %vm494_vm0, %v492_v6  ;;  %518 = vst.msk [vmem:[#allocation2 + $0x81] sm:$0xff] %vm494_vm0, %v493_v7  ;;  %v832_v11 = vpack.c.bf16 %v778_v4, %v769_v3  ;;  %v803_v19 = vld [vmem:[#allocation3 + $0x1d0] sm:$0xff] }
  0x70   : > { %2329 = vmatpush3.bf16.msra.mxu0 %v2549_v21  ;;  %2430 = vmatprep.subr.bf16.mxu1 %v3091_v30  ;;  %v797_v9 = vld [vmem:[#allocation3 + $0x1a0] sm:$0xff]  ;;  %v796_v18 = vld [vmem:[#allocation3 + $0x198] sm:$0xff]  ;;  %v762_v23 = vld [vmem:[#allocation3 + $0x88] sm:$0xff] }
  0x71   : > { %2406 = vmatprep.subr.bf16.mxu0 %v3091_v30  ;;  %1551 = vmatmul.mubr.bf16.gmra.mrb[12].mxu1 %v846_v36  ;;  %v842_v12 = vpack.c.bf16 %v797_v9, %v788_v8  ;;  %v812_v20 = vld [vmem:[#allocation3 + $0x218] sm:$0xff]  ;;  %v2557_v21 = vld [vmem:[%s3231_s3 + $0x230] sm:$0xff]   ;;  %v841_v31 = vpack.c.bf16 %v796_v18, %v787_v16  ;;  %v2558_v32 = vld [vmem:[%s3231_s3 + $0x238] sm:$0xff]  }
  0x72   : > { %1656 = vmatprep.mubr.bf16.mxu1 %v824_v38  ;;  %v813_v15 = vld [vmem:[#allocation3 + $0x220] sm:$0xff]  ;;  %v848_v28 = vpack.c.bf16 %v812_v20, %v803_v19  ;;  %v771_v34 = vld [vmem:[#allocation3 + $0xd0] sm:$0xff]  ;;  %v780_v35 = vld [vmem:[#allocation3 + $0x118] sm:$0xff] }
  0x73   : > { %1592 = vmatmul.mubr.bf16.vlgmr.msra.gmra.mrb[16].mxu0 %v821_v33  ;;  %v804_v14 = vld [vmem:[#allocation3 + $0x1d8] sm:$0xff]  ;;  %v753_v22 = vld [vmem:[#allocation3 + $0x40] sm:$0xff]  ;;  %v798_v37 = vld [vmem:[#allocation3 + $0x1a8] sm:$0xff]  ;;  %v834_v43 = vpack.c.bf16 %v780_v35, %v771_v34 }
  0x74   : > { %2407 = vmatpush3.bf16.msra.mxu0 %v3091_v30  ;;  %1599 = vmatprep.mubr.bf16.mxu0 %v831_v42  ;;  %v849_v17 = vpack.c.bf16 %v813_v15, %v804_v14  ;;  %v825_v33 = vpack.c.bf16 %v762_v23, %v753_v22  ;;  %v789_v36 = vld [vmem:[#allocation3 + $0x160] sm:$0xff] }
  0x75   : > { %2408 = vmatprep.subr.bf16.mxu0 %v3099_v39  ;;  %v843_v45 = vpack.c.bf16 %v798_v37, %v789_v36 }
  0x76   : > { %v719_v24 = vld [vmem:[#allocation2 + $0x79] sm:$0xff]  ;;  %v720_v25 = vld [vmem:[#allocation2 + $0x81] sm:$0xff] }
  0x77   : > { %v703_v26 = vld [vmem:[#allocation2 + $0x78] sm:$0xff]  ;;  %727 = vst.msk [vmem:[#allocation3 + $0x1e8] sm:$0xff] %vm494_vm0, %v719_v24  ;;  %728 = vst.msk [vmem:[#allocation3 + $0x230] sm:$0xff] %vm494_vm0, %v720_v25  ;;  %v704_v27 = vld [vmem:[#allocation2 + $0x80] sm:$0xff] }
  0x78   : > { %2409 = vmatpush3.bf16.msra.mxu0 %v3099_v39  ;;  %711 = vst.msk [vmem:[#allocation3 + $0x1e0] sm:$0xff] %vm494_vm0, %v703_v26  ;;  %v735_v29 = vld [vmem:[#allocation2 + $0x7a] sm:$0xff]  ;;  %712 = vst.msk [vmem:[#allocation3 + $0x228] sm:$0xff] %vm494_vm0, %v704_v27 }
  0x79   : > { %2410 = vmatprep.subr.bf16.mxu0 %v3113_v47  ;;  %1657 = vmatmul.mubr.bf16.vlgmr.msra.gmra.mrb[16].mxu1 %v823_v53  ;;  %743 = vst.msk [vmem:[#allocation3 + $0x1f0] sm:$0xff] %vm494_vm0, %v735_v29 }
  0x7a   : > { %2438 = vmatpush3.bf16.msra.mxu1 %v3091_v30  ;;  %1664 = vmatprep.mubr.bf16.mxu1 %v833_v56  ;;  %v736_v30 = vld [vmem:[#allocation2 + $0x82] sm:$0xff] }
  0x7b   : > { %1600 = vmatmul.mubr.bf16.gmra.mrb[20].mxu0 %v830_v52  ;;  %2431 = vmatprep.subr.bf16.mxu1 %v3099_v39  ;;  %744 = vst.msk [vmem:[#allocation3 + $0x238] sm:$0xff] %vm494_vm0, %v736_v30 }
  0x7c   : > { %2411 = vmatpush3.bf16.msra.mxu0 %v3113_v47  ;;  %1607 = vmatprep.mubr.bf16.mxu0 %v840_v62 }
  0x7d   : > { %2412 = vmatprep.subr.bf16.mxu0 %v3128_v57 }
  0x7e   : > { %2439 = vmatpush3.bf16.msra.mxu1 %v3099_v39  ;;  %v806_v38 = vld [vmem:[#allocation3 + $0x1e8] sm:$0xff]  ;;  %v815_v39 = vld [vmem:[#allocation3 + $0x230] sm:$0xff] }
  0x7f   : > { %2432 = vmatprep.subr.bf16.mxu1 %v3113_v47  ;;  %v805_v40 = vld [vmem:[#allocation3 + $0x1e0] sm:$0xff]  ;;  %v851_v41 = vpack.c.bf16 %v815_v39, %v806_v38  ;;  %v814_v42 = vld [vmem:[#allocation3 + $0x228] sm:$0xff] }
  0x80   : > { %2413 = vmatpush3.bf16.msra.mxu0 %v3128_v57  ;;  %v850_v44 = vpack.c.bf16 %v814_v42, %v805_v40  ;;  %v807_v46 = vld [vmem:[#allocation3 + $0x1f0] sm:$0xff] }
  0x81   : > { %2414 = vmatprep.subr.bf16.mxu0 %v2555_v5  ;;  %1665 = vmatmul.mubr.bf16.gmra.mrb[20].mxu1 %v832_v11 }
  0x82   : > { %2440 = vmatpush3.bf16.msra.mxu1 %v3113_v47  ;;  %1672 = vmatprep.mubr.bf16.mxu1 %v842_v12  ;;  %v816_v47 = vld [vmem:[#allocation3 + $0x238] sm:$0xff] }
  0x83   : > { %1608 = vmatmul.mubr.bf16.gmra.mrb[24].mxu0 %v839_v10  ;;  %2433 = vmatprep.subr.bf16.mxu1 %v3128_v57  ;;  %v852_v48 = vpack.c.bf16 %v816_v47, %v807_v46 }
  0x84   : > { %2415 = vmatpush3.bf16.msra.mxu0 %v2555_v5  ;;  %1615 = vmatprep.mubr.bf16.mxu0 %v849_v17 }
  0x85   : > { %2416 = vmatprep.subr.bf16.mxu0 %v2556_v13 }
  0x86   : > { %2441 = vmatpush3.bf16.msra.mxu1 %v3128_v57 }
  0x87   : > { %2434 = vmatprep.subr.bf16.mxu1 %v2555_v5 }
  0x88   : > { %2417 = vmatpush3.bf16.msra.mxu0 %v2556_v13 }
  0x89   : > { %2418 = vmatprep.subr.bf16.mxu0 %v2557_v21  ;;  %1673 = vmatmul.mubr.bf16.gmra.mrb[24].mxu1 %v841_v31 }
  0x8a   : > { %2442 = vmatpush3.bf16.msra.mxu1 %v2555_v5  ;;  %1680 = vmatprep.mubr.bf16.mxu1 %v851_v41 }
  0x8b   : > { %1616 = vmatmul.mubr.bf16.gmra.mrb[28].mxu0 %v848_v28  ;;  %2435 = vmatprep.subr.bf16.mxu1 %v2556_v13 }
  0x8c   : > { %2419 = vmatpush3.bf16.msra.mxu0 %v2557_v21  ;;  %2422 = vmatprep.mubr.bf16.mxu0 %v825_v33 }
  0x8d   : > { %2420 = vmatprep.subr.bf16.mxu0 %v2558_v32 }
  0x8e   : > { %2443 = vmatpush3.bf16.msra.mxu1 %v2556_v13 }
  0x8f   : > { %2436 = vmatprep.subr.bf16.mxu1 %v2557_v21 }
  0x90   : > { %2421 = vmatpush3.bf16.msra.mxu0 %v2558_v32 }
  0x91   : > { %1681 = vmatmul.mubr.bf16.gmra.mrb[28].mxu1 %v850_v44 }
  0x92   : > { %2444 = vmatpush3.bf16.msra.mxu1 %v2557_v21  ;;  %2426 = vmatprep.mubr.bf16.mxu1 %v843_v45 }
  0x93   : > { %2423 = vmatmul.mubr.bf16.vlgmr.msra.gmra.mrb[32].mxu0 %v834_v43  ;;  %2437 = vmatprep.subr.bf16.mxu1 %v2558_v32 }
  0x96   : > { %2445 = vmatpush3.bf16.msra.mxu1 %v2558_v32 }
  0x99   : > { %2427 = vmatmul.mubr.bf16.vlgmr.msra.gmra.mrb[32].mxu1 %v852_v48 }
 0x125   : > { %v2290_v50 = vpop.f32.mrb[0].mxu1 }
 0x126   : > { %v2250_v49 = vpop.f32.mrb[0].mxu0  ;;  %v2291_v52 = vpop.f32.mrb[1].mxu1 }
 0x127   : > { %v2251_v51 = vpop.f32.mrb[1].mxu0  ;;  %v2292_v54 = vadd.f32 %v2291_v52, %v2290_v50  ;;  %v2293_v56 = vpop.f32.mrb[2].mxu1 }
 0x128   : > { %v2252_v53 = vadd.f32 %v2251_v51, %v2250_v49  ;;  %v2253_v55 = vpop.f32.mrb[2].mxu0  ;;  %v2294_v58 = vpop.f32.mrb[3].mxu1 }
 0x129   : > { %v2254_v57 = vpop.f32.mrb[3].mxu0  ;;  %v2295_v61 = vadd.f32 %v2294_v58, %v2293_v56 }
 0x12a   : > { %v1529_v59 = vadd.f32 %v2292_v54, %v2252_v53  ;;  %v2255_v60 = vadd.f32 %v2254_v57, %v2253_v55 }
 0x12c   : > { %v1532_v62 = vadd.f32 %v2295_v61, %v2255_v60 }
 0x12d   : > { %v2296_v0 = vpop.f32.mrb[4].mxu1 }
 0x12e   : > { %v2256_v63 = vpop.f32.mrb[4].mxu0  ;;  %v2297_v2 = vpop.f32.mrb[5].mxu1 }
 0x12f   : > { %v2257_v1 = vpop.f32.mrb[5].mxu0  ;;  %v2298_v4 = vadd.f32 %v2297_v2, %v2296_v0  ;;  %v2299_v6 = vpop.f32.mrb[6].mxu1 }
 0x130   : > { %v2258_v3 = vadd.f32 %v2257_v1, %v2256_v63  ;;  %v2259_v5 = vpop.f32.mrb[6].mxu0  ;;  %v2300_v8 = vpop.f32.mrb[7].mxu1 }
 0x131   : > { %v2260_v7 = vpop.f32.mrb[7].mxu0  ;;  %v2301_v11 = vadd.f32 %v2300_v8, %v2299_v6 }
 0x132   : > { %v1537_v9 = vadd.f32 %v2298_v4, %v2258_v3  ;;  %v2261_v10 = vadd.f32 %v2260_v7, %v2259_v5 }
 0x134   : > { %v1540_v12 = vadd.f32 %v2301_v11, %v2261_v10 }
 0x135   : > { %v2302_v19 = vpop.f32.mrb[8].mxu1 }
 0x136   : > { %v2262_v13 = vpop.f32.mrb[8].mxu0  ;;  %v2303_v20 = vpop.f32.mrb[9].mxu1 }
 0x137   : > { %v2263_v14 = vpop.f32.mrb[9].mxu0  ;;  %v2304_v21 = vadd.f32 %v2303_v20, %v2302_v19  ;;  %v2305_v22 = vpop.f32.mrb[10].mxu1 }
 0x138   : > { %v2264_v15 = vadd.f32 %v2263_v14, %v2262_v13  ;;  %v2265_v16 = vpop.f32.mrb[10].mxu0  ;;  %v2306_v23 = vpop.f32.mrb[11].mxu1 }
 0x139   : > { %v2266_v17 = vpop.f32.mrb[11].mxu0  ;;  %v2307_v25 = vadd.f32 %v2306_v23, %v2305_v22 }
 0x13a   : > { %v2267_v18 = vadd.f32 %v2266_v17, %v2265_v16  ;;  %v1545_v24 = vadd.f32 %v2304_v21, %v2264_v15 }
 0x13c   : > { %v1548_v28 = vadd.f32 %v2307_v25, %v2267_v18 }
 0x13e   : > { %v2268_v26 = vpop.f32.mrb[12].mxu0 }
 0x13f   : > { %v2269_v27 = vpop.f32.mrb[13].mxu0 }
 0x140   : > { %v2270_v29 = vadd.f32 %v2269_v27, %v2268_v26  ;;  %v2271_v30 = vpop.f32.mrb[14].mxu0 }
 0x141   : > { %v2272_v31 = vpop.f32.mrb[15].mxu0 }
 0x142   : > { %v2273_v32 = vadd.f32 %v2272_v31, %v2271_v30 }
 0x144   : > { %v2308_v34 = vpop.f32.mrb[12].mxu1 }
 0x145   : > { %v2309_v36 = vpop.f32.mrb[13].mxu1 }
 0x146   : > { %v2330_v33 = vpop.f32.mrb[16].mxu0  ;;  %v2310_v39 = vadd.f32 %v2309_v36, %v2308_v34  ;;  %v2311_v40 = vpop.f32.mrb[14].mxu1 }
 0x147   : > { %v2331_v35 = vpop.f32.mrb[17].mxu0  ;;  %v2312_v42 = vpop.f32.mrb[15].mxu1 }
 0x148   : > { %v2332_v37 = vadd.f32 %v2331_v35, %v2330_v33  ;;  %v2333_v38 = vpop.f32.mrb[18].mxu0  ;;  %v1553_v45 = vadd.f32 %v2310_v39, %v2270_v29  ;;  %v2313_v46 = vadd.f32 %v2312_v42, %v2311_v40 }
 0x149   : > { %v2334_v41 = vpop.f32.mrb[19].mxu0 }
 0x14a   : > { %v1594_v43 = vadd.f32 %v2332_v37, %v1529_v59  ;;  %v2335_v44 = vadd.f32 %v2334_v41, %v2333_v38  ;;  %v1556_v48 = vadd.f32 %v2313_v46, %v2273_v32 }
 0x14c   : > { %v1597_v47 = vadd.f32 %v2335_v44, %v1532_v62  ;;  %v2370_v50 = vpop.f32.mrb[16].mxu1 }
 0x14d   : > { %v2371_v52 = vpop.f32.mrb[17].mxu1 }
 0x14e   : > { %v2336_v49 = vpop.f32.mrb[20].mxu0  ;;  %v2372_v55 = vadd.f32 %v2371_v52, %v2370_v50  ;;  %v2373_v56 = vpop.f32.mrb[18].mxu1 }
 0x14f   : > { %v2337_v51 = vpop.f32.mrb[21].mxu0  ;;  %v2374_v58 = vpop.f32.mrb[19].mxu1 }
 0x150   : > { %v2338_v53 = vadd.f32 %v2337_v51, %v2336_v49  ;;  %v2339_v54 = vpop.f32.mrb[22].mxu0  ;;  %v2375_v63 = vadd.f32 %v2374_v58, %v2373_v56  ;;  %v1659_v0 = vadd.f32 %v2372_v55, %v1594_v43 }
 0x151   : > { %v2340_v57 = vpop.f32.mrb[23].mxu0 }
 0x152   : > { %v1602_v60 = vadd.f32 %v2338_v53, %v1537_v9  ;;  %v2341_v61 = vadd.f32 %v2340_v57, %v2339_v54  ;;  %v1662_v1 = vadd.f32 %v2375_v63, %v1597_v47 }
 0x154   : > { %v1605_v59 = vadd.f32 %v2341_v61, %v1540_v12  ;;  %v2376_v3 = vpop.f32.mrb[20].mxu1 }
 0x155   : > { %v2377_v4 = vpop.f32.mrb[21].mxu1 }
 0x156   : > { %v2342_v2 = vpop.f32.mrb[24].mxu0  ;;  %v2378_v7 = vadd.f32 %v2377_v4, %v2376_v3  ;;  %v2379_v8 = vpop.f32.mrb[22].mxu1 }
 0x157   : > { %v2343_v62 = vpop.f32.mrb[25].mxu0  ;;  %v2380_v11 = vpop.f32.mrb[23].mxu1 }
 0x158   : > { %v2344_v5 = vadd.f32 %v2343_v62, %v2342_v2  ;;  %v2345_v6 = vpop.f32.mrb[26].mxu0  ;;  %v2381_v15 = vadd.f32 %v2380_v11, %v2379_v8  ;;  %v1667_v16 = vadd.f32 %v2378_v7, %v1602_v60 }
 0x159   : > { %v2346_v10 = vpop.f32.mrb[27].mxu0 }
 0x15a   : > { %v1610_v13 = vadd.f32 %v2344_v5, %v1545_v24  ;;  %v2347_v14 = vadd.f32 %v2346_v10, %v2345_v6  ;;  %v1670_v17 = vadd.f32 %v2381_v15, %v1605_v59 }
 0x15c   : > { %v1613_v9 = vadd.f32 %v2347_v14, %v1548_v28  ;;  %v2382_v19 = vpop.f32.mrb[24].mxu1 }
 0x15d   : > { %v2383_v20 = vpop.f32.mrb[25].mxu1 }
 0x15e   : > { %v2348_v18 = vpop.f32.mrb[28].mxu0  ;;  %v2384_v23 = vadd.f32 %v2383_v20, %v2382_v19  ;;  %v2385_v25 = vpop.f32.mrb[26].mxu1 }
 0x15f   : > { %v2349_v12 = vpop.f32.mrb[29].mxu0  ;;  %v2386_v27 = vpop.f32.mrb[27].mxu1 }
 0x160   : > { %v2350_v21 = vadd.f32 %v2349_v12, %v2348_v18  ;;  %v2351_v22 = vpop.f32.mrb[30].mxu0  ;;  %v2387_v31 = vadd.f32 %v2386_v27, %v2385_v25  ;;  %v1675_v24 = vadd.f32 %v2384_v23, %v1610_v13 }
 0x161   : > { %v2352_v26 = vpop.f32.mrb[31].mxu0 }
 0x162   : > { %v1618_v29 = vadd.f32 %v2350_v21, %v1553_v45  ;;  %v2353_v30 = vadd.f32 %v2352_v26, %v2351_v22  ;;  %v1678_v33 = vadd.f32 %v2387_v31, %v1613_v9 }
 0x164   : > { %v1621_v32 = vadd.f32 %v2353_v30, %v1556_v48  ;;  %v2388_v28 = vpop.f32.mrb[28].mxu1 }
 0x165   : > { %v2389_v37 = vpop.f32.mrb[29].mxu1 }
 0x166   : > { %v2424_v34 = vpop.f32.mrb[32].mxu0  ;;  %v2390_v40 = vadd.f32 %v2389_v37, %v2388_v28  ;;  %v2391_v41 = vpop.f32.mrb[30].mxu1 }
 0x167   : > { %v1732_v35 = vadd.f32 %v2424_v34, %v1667_v16  ;;  %v1723_v36 = vpop.f32.mrb[33].mxu0  ;;  %v2392_v44 = vpop.f32.mrb[31].mxu1 }
 0x168   : > { %v1724_v38 = vadd.f32 %v1723_v36, %v1659_v0  ;;  %v2425_v39 = vpop.f32.mrb[34].mxu0  ;;  %v2393_v47 = vadd.f32 %v2392_v44, %v2391_v41  ;;  %v1683_v48 = vadd.f32 %v2390_v40, %v1618_v29 }
 0x169   : > { %v2201_v42 = vpack.c.bf16 %v1732_v35, %v1732_v35  ;;  %v1726_v43 = vpop.f32.mrb[35].mxu0  ;;  %v1735_v46 = vadd.f32 %v2425_v39, %v1670_v17  ;;  %v1798_v60 = vsel %vm494_vm0, %v1732_v35, 0.0  ;;  %v1820_v3 = vmul.f32 %v1732_v35, %v1732_v35 }
 0x16a   : > { %v2199_v45 = vpack.c.bf16 %v1724_v38, %v1724_v38  ;;  %v1818_v49 = vmul.f32 %v1724_v38, %v1724_v38  ;;  %v1727_v50 = vadd.f32 %v1726_v43, %v1662_v1  ;;  %v1795_v51 = vsel %vm494_vm0, %v1724_v38, 0.0 }
 0x16b   : > { %1789 = vst.msk [vmem:[%s3169_s8 + $0x8] sm:$0xf] %vm1786_vm2, %v2201_v42  ;;  %v2202_v52 = vpack.c.bf16 %v1735_v46, %v1735_v46  ;;  %v1686_v53 = vadd.f32 %v2393_v47, %v1621_v32  ;;  %v1821_v10 = vmul.f32 %v1735_v46, %v1735_v46  ;;  %v1829_v14 = vsel %vm494_vm0, %v1820_v3, 0.0 }
 0x16c   : > { %1787 = vst.msk [vmem:[%s3169_s8] sm:$0xf] %vm1786_vm2, %v2199_v45  ;;  %v2200_v54 = vpack.c.bf16 %v1727_v50, %v1727_v50  ;;  %v1796_v55 = vsel %vm494_vm0, %v1727_v50, 0.0  ;;  %v1819_v56 = vmul.f32 %v1727_v50, %v1727_v50  ;;  %v2428_v58 = vpop.f32.mrb[32].mxu1  ;;  %v1826_v61 = vsel %vm494_vm0, %v1818_v49, 0.0 }
 0x16d   : > { %1790 = vst.msk [vmem:[%s3169_s8 + $0xc] sm:$0xf] %vm1786_vm2, %v2202_v52  ;;  %v1797_v57 = vadd.f32 %v1796_v55, %v1795_v51  ;;  %v1748_v0 = vadd.f32 %v2428_v58, %v1683_v48  ;;  %v1739_v59 = vpop.f32.mrb[33].mxu1  ;;  %v1800_v16 = vsel %vm494_vm0, %v1735_v46, 0.0  ;;  %v1831_v12 = vsel %vm494_vm0, %v1821_v10, 0.0 }
 0x16e   : > { %1788 = vst.msk [vmem:[%s3169_s8 + $0x4] sm:$0xf] %vm1786_vm2, %v2200_v54  ;;  %v1827_v63 = vsel %vm494_vm0, %v1819_v56, 0.0  ;;  %v1740_v62 = vadd.f32 %v1739_v59, %v1675_v24  ;;  %v2429_v4 = vpop.f32.mrb[34].mxu1 }
 0x16f   : > { %v1799_v1 = vadd.f32 %v1798_v60, %v1797_v57  ;;  %v1828_v2 = vadd.f32 %v1827_v63, %v1826_v61  ;;  %v2205_v5 = vpack.c.bf16 %v1748_v0, %v1748_v0  ;;  %v1751_v6 = vadd.f32 %v2429_v4, %v1686_v53  ;;  %v1742_v7 = vpop.f32.mrb[35].mxu1 }
 0x170   : > { %v2203_v8 = vpack.c.bf16 %v1740_v62, %v1740_v62  ;;  %v1743_v11 = vadd.f32 %v1742_v7, %v1678_v33  ;;  %v1822_v15 = vmul.f32 %v1740_v62, %v1740_v62  ;;  %v1802_v19 = vsel %vm494_vm0, %v1740_v62, 0.0 }
 0x171   : > { %1793 = vst.msk [vmem:[%s3169_s8 + $0x18] sm:$0xf] %vm1786_vm2, %v2205_v5  ;;  %v2206_v13 = vpack.c.bf16 %v1751_v6, %v1751_v6  ;;  %v1801_v17 = vadd.f32 %v1800_v16, %v1799_v1  ;;  %v1830_v18 = vadd.f32 %v1829_v14, %v1828_v2  ;;  %v1824_v23 = vmul.f32 %v1748_v0, %v1748_v0 }
 0x172   : > { %1791 = vst.msk [vmem:[%s3169_s8 + $0x10] sm:$0xf] %vm1786_vm2, %v2203_v8  ;;  %v2204_v9 = vpack.c.bf16 %v1743_v11, %v1743_v11  ;;  %v1823_v20 = vmul.f32 %v1743_v11, %v1743_v11  ;;  %v1833_v25 = vsel %vm494_vm0, %v1822_v15, 0.0  ;;  %v1804_v26 = vsel %vm494_vm0, %v1743_v11, 0.0 }
 0x173   : > { %1794 = vst.msk [vmem:[%s3169_s8 + $0x1c] sm:$0xf] %vm1786_vm2, %v2206_v13  ;;  %v1803_v21 = vadd.f32 %v1802_v19, %v1801_v17  ;;  %v1832_v22 = vadd.f32 %v1831_v12, %v1830_v18  ;;  %v1806_v30 = vsel %vm494_vm0, %v1748_v0, 0.0  ;;  %v1825_v31 = vmul.f32 %v1751_v6, %v1751_v6 }
 0x174   : > { %1792 = vst.msk [vmem:[%s3169_s8 + $0x14] sm:$0xf] %vm1786_vm2, %v2204_v9  ;;  %v1835_v24 = vsel %vm494_vm0, %v1823_v20, 0.0  ;;  %v1837_v34 = vsel %vm494_vm0, %v1824_v23, 0.0  ;;  %v1808_v28 = vsel %vm494_vm0, %v1751_v6, 0.0 }
 0x175   : > { %v1805_v27 = vadd.f32 %v1804_v26, %v1803_v21  ;;  %v1834_v29 = vadd.f32 %v1833_v25, %v1832_v22  ;;  %v1839_v37 = vsel %vm494_vm0, %v1825_v31, 0.0 }
 0x177   : > { %v1807_v32 = vadd.f32 %v1806_v30, %v1805_v27  ;;  %v1836_v33 = vadd.f32 %v1835_v24, %v1834_v29 }
 0x179   : > { %v1809_v35 = vadd.f32 %v1808_v28, %v1807_v32  ;;  %v1838_v36 = vadd.f32 %v1837_v34, %v1836_v33 }
 0x17b   : > { %v1810_v38 = vrot.slane %v1809_v35, 4  ;;  %v1840_v39 = vadd.f32 %v1839_v37, %v1838_v36 }
 0x17d   : > { %v1811_v40 = vadd.f32 %v1810_v38, %v1809_v35  ;;  %v1841_v41 = vrot.slane %v1840_v39, 4 }
 0x17f   : > { %v1812_v42 = vrot.slane %v1811_v40, 2  ;;  %v1842_v43 = vadd.f32 %v1841_v41, %v1840_v39 }
 0x181   : > { %v1813_v44 = vadd.f32 %v1812_v42, %v1811_v40  ;;  %v1843_v45 = vrot.slane %v1842_v43, 2 }
 0x183   : > { %v1814_v46 = vrot.slane %v1813_v44, 1  ;;  %v1844_v47 = vadd.f32 %v1843_v45, %v1842_v43 }
 0x185   : > { %v1815_v48 = vadd.f32 %v1814_v46, %v1813_v44  ;;  %v1845_v49 = vrot.slane %v1844_v47, 1 }
 0x187   : > { %1817 = vst.msk [vmem:[%s449_s14] sm:$0x1] %vm1816_vm3, %v1815_v48  ;;  %v1846_v50 = vadd.f32 %v1845_v49, %v1844_v47 }
 0x189   : > { %1847 = vst.msk [vmem:[%s456_s19] sm:$0x1] %vm1816_vm3, %v1846_v50 }
 0x18a PF: > { %s17_s25 = sadd.s32 1, %s2597_s25   ;;  %s3236_s21 = smov %s2589_s23 }
 0x18b   : > { %p14_p12 = scmp.ge.s32.totalorder %s17_s25, 10   ;;  %s3237_s22 = smov %s2593_s24 }
 0x18c   : > { %s3238_s23 = smov %s3241_s26  ;;  %s3239_s24 = smov %s3245_s27 }
 0x18d   :  { %16 = sbr.rel (!%p14_p12) target bundleno = 3 (0x3), region = 99 }

</bundles_post_ra>
